<compile_context>
chip_gen: v7x
topology: tpu7x:2x2x1
jax: 0.10.0
libtpu: 0.0.40
codegen_flags: <defaults>
</compile_context>

<pallas_src>
import functools

import jax
import jax.numpy as jnp
from jax.experimental import pallas as pl
from jax.experimental.pallas import tpu as pltpu


def _mlp_segmax_kernel(off_ref, x_ref, pos_ref, w1x_ref, w1p_ref, b1_ref,
                       w2_ref, b2_ref, w3_ref, b3_ref, pooled_ref, acc_ref,
                       *, num_batches, tile_n, tiles_per_slice, matmul_dtype):
    """Phase 1: pointwise MLP (MXU) + per-batch segment-max partial reduction.

    Grid = (num_slices [parallel], tiles_per_slice [arbitrary]).  Each slice
    produces its own [B, H3] partial max (output block indexed by the slice);
    off_ref is an SMEM [B+1] segment-offset vector from scalar prefetch.
    """
    s = pl.program_id(0)          # slice (megacore shard on v7x)
    k = pl.program_id(1)          # reduction step within the slice

    @pl.when(k == 0)
    def _init():
        acc_ref[...] = jnp.full(acc_ref.shape, -jnp.inf, acc_ref.dtype)

    # ---- self.nn: Linear+ReLU x3, input cat([x, pos]) fused via split W1. ----
    # The K=3 `pos @ W1p` MXU pass (<2% utilised) is replaced by 3 VPU FMAs.
    # TODO(synk): torch_geometric's MLP also inserts BatchNorm between layers;
    # in eval mode it is an affine map foldable into (W, b) host-side, omitted.
    pos_v = pos_ref[...]                          # [tile_n, 3]  f32
    w1p_v = w1p_ref[...]                          # [3, H1]      f32
    h = jnp.dot(x_ref[...], w1x_ref[...],
                preferred_element_type=jnp.float32) + b1_ref[...]
    for d in range(3):
        h = h + pos_v[:, d:d + 1] * w1p_v[d:d + 1, :]
    h = jnp.maximum(h, 0.0)
    h = jnp.maximum(
        jnp.dot(h.astype(matmul_dtype), w2_ref[...],
                preferred_element_type=jnp.float32) + b2_ref[...], 0.0)
    h = jnp.maximum(
        jnp.dot(h.astype(matmul_dtype), w3_ref[...],
                preferred_element_type=jnp.float32) + b3_ref[...], 0.0)

    # ---- global_max_pool: gated segment max into sublane-padded scratch. ----
    tile_start = (s * tiles_per_slice + k) * tile_n     # logical row offset
    rows = tile_start + jax.lax.broadcasted_iota(jnp.int32, (tile_n, 1), 0)
    neg_inf = jnp.float32(-jnp.inf)
    for b in range(num_batches):                         # small static Python int
        seg_lo = off_ref[b]
        seg_hi = off_ref[b + 1]
        lo = jnp.maximum(seg_lo, tile_start)
        hi = jnp.minimum(seg_hi, tile_start + tile_n)

        @pl.when(lo < hi)                                # skip non-intersecting
        def _update(b=b, seg_lo=seg_lo, seg_hi=seg_hi):
            m = (rows >= seg_lo) & (rows < seg_hi)                 # [tile_n, 1]
            seg = jnp.max(jnp.where(m, h, neg_inf), axis=0, keepdims=True)
            acc_ref[pl.ds(b, 1), :] = jnp.maximum(acc_ref[pl.ds(b, 1), :], seg)

    @pl.when(k == pl.num_programs(1) - 1)
    def _flush():
        pooled_ref[...] = acc_ref[pl.ds(0, num_batches), :]


def _broadcast_concat_kernel(skip_off_ref, pooled_ref, xs_ref, out_ref,
                             *, num_batches, tile_ns, h3):
    """Phase 2: degenerate knn_interpolate (per-batch broadcast of pooled rows)
    fused with cat([x_interp, x_skip], dim=1); per-batch selects are pl.when-
    gated and the output is written with two lane-aligned sub-stores."""
    i = pl.program_id(0)
    tile_start = i * tile_ns
    rows = tile_start + jax.lax.broadcasted_iota(jnp.int32, (tile_ns, 1), 0)

    out_ref[:, :h3] = jnp.zeros((tile_ns, h3), jnp.float32)
    for b in range(num_batches):                         # disjoint sorted segments
        lo = jnp.maximum(skip_off_ref[b], tile_start)
        hi = jnp.minimum(skip_off_ref[b + 1], tile_start + tile_ns)

        @pl.when(lo < hi)                                # skip non-intersecting
        def _select(b=b):
            m = (rows >= skip_off_ref[b]) & (rows < skip_off_ref[b + 1])
            out_ref[:, :h3] = jnp.where(m, pooled_ref[pl.ds(b, 1), :],
                                        out_ref[:, :h3])

    out_ref[:, h3:] = xs_ref[...]


def global_sa_module(x, pos, batch, x_skip, pos_skip, batch_skip, params,
                     num_batches, *, tile_n=512, tile_ns=512, num_slices=2,
                     matmul_dtype=jnp.bfloat16):
    """Wrapper mirroring GlobalSAModule.forward. Returns (x_out, pos, batch)."""
    w1, b1, w2, b2, w3, b3 = params
    n, c = x.shape
    ns, cs = x_skip.shape
    h1, h2, h3 = w1.shape[1], w2.shape[1], w3.shape[1]
    f32 = jnp.float32

    # bf16 (default) operands feed the MXU; biases / ReLU / accumulation stay f32.
    x_mm = x.astype(matmul_dtype)
    pos = pos.astype(f32)
    x_skip = x_skip.astype(f32)
    # Fused cat([x, pos], dim=1): split W1 once on the host.
    w1x = w1[:c].astype(matmul_dtype)
    w1p = w1[c:].astype(f32)                    # K=3 half applied as VPU FMAs
    b1 = b1.astype(f32).reshape(1, h1)
    w2 = w2.astype(matmul_dtype)
    b2 = b2.astype(f32).reshape(1, h2)
    w3 = w3.astype(matmul_dtype)
    b3 = b3.astype(f32).reshape(1, h3)

    # Per-batch segment offsets (batch / batch_skip are sorted) -> SMEM metadata.
    batch = batch.astype(jnp.int32)
    batch_skip = batch_skip.astype(jnp.int32)
    ids = jnp.arange(num_batches + 1, dtype=jnp.int32)
    seg_off = jnp.searchsorted(batch, ids).astype(jnp.int32)        # [B+1]
    skip_off = jnp.searchsorted(batch_skip, ids).astype(jnp.int32)  # [B+1]

    tile_n = min(tile_n, n)
    tile_ns = min(tile_ns, ns)
    n_tiles = pl.cdiv(n, tile_n)
    num_slices = max(1, min(num_slices, n_tiles))
    tiles_per_slice = pl.cdiv(n_tiles, num_slices)
    pad_b = ((num_batches + 7) // 8) * 8        # sublane-padded accumulator rows

    def tile_idx(s, k):
        # Clamp OOB logical tiles of the last slice; in-kernel row masks make
        # the (re-read) clamped tile a no-op for the reduction.
        return jnp.minimum(s * tiles_per_slice + k, n_tiles - 1)

    # ---------- Phase 1: MLP + segment max -> partials [num_slices, B, H3] ----------
    kernel1 = functools.partial(
        _mlp_segmax_kernel, num_batches=num_batches, tile_n=tile_n,
        tiles_per_slice=tiles_per_slice, matmul_dtype=matmul_dtype)
    partials = pl.pallas_call(
        kernel1,
        out_shape=jax.ShapeDtypeStruct((num_slices, num_batches, h3), f32),
        grid_spec=pltpu.PrefetchScalarGridSpec(
            num_scalar_prefetch=1,
            grid=(num_slices, tiles_per_slice),
            in_specs=[
                pl.BlockSpec((tile_n, c), lambda s, k, off: (tile_idx(s, k), 0)),
                pl.BlockSpec((tile_n, 3), lambda s, k, off: (tile_idx(s, k), 0)),
                pl.BlockSpec((c, h1), lambda s, k, off: (0, 0)),
                pl.BlockSpec((3, h1), lambda s, k, off: (0, 0)),
                pl.BlockSpec((1, h1), lambda s, k, off: (0, 0)),
                pl.BlockSpec((h1, h2), lambda s, k, off: (0, 0)),
                pl.BlockSpec((1, h2), lambda s, k, off: (0, 0)),
                pl.BlockSpec((h2, h3), lambda s, k, off: (0, 0)),
                pl.BlockSpec((1, h3), lambda s, k, off: (0, 0)),
            ],
            out_specs=pl.BlockSpec((None, num_batches, h3),
                                   lambda s, k, off: (s, 0, 0)),
            scratch_shapes=[pltpu.VMEM((pad_b, h3), f32)],
        ),
        compiler_params=pltpu.CompilerParams(
            dimension_semantics=("parallel", "arbitrary"),
            vmem_limit_bytes=48 * 1024 * 1024,
        ),
    )(seg_off, x_mm, pos, w1x, w1p, b1, w2, b2, w3, b3)

    # Tiny XLA combine of the per-slice partial maxima (identity for -inf rows).
    pooled = jnp.max(partials, axis=0)                       # [B, H3]

    # -------- Phase 2: broadcast pooled + fused skip concat -> [Ns, H3+Cs] --------
    kernel2 = functools.partial(_broadcast_concat_kernel,
                                num_batches=num_batches, tile_ns=tile_ns, h3=h3)
    x_out = pl.pallas_call(
        kernel2,
        out_shape=jax.ShapeDtypeStruct((ns, h3 + cs), f32),
        grid_spec=pltpu.PrefetchScalarGridSpec(
            num_scalar_prefetch=1,
            grid=(pl.cdiv(ns, tile_ns),),
            in_specs=[
                pl.BlockSpec((num_batches, h3), lambda i, off: (0, 0)),
                pl.BlockSpec((tile_ns, cs), lambda i, off: (i, 0)),
            ],
            out_specs=pl.BlockSpec((tile_ns, h3 + cs), lambda i, off: (i, 0)),
        ),
        compiler_params=pltpu.CompilerParams(
            dimension_semantics=("parallel",),           # shards Ns across cores
            vmem_limit_bytes=32 * 1024 * 1024,
        ),
    )(skip_off, pooled, x_skip)

    # pos, batch = pos_skip, batch_skip (per GlobalSAModule.forward)
    return x_out, pos_skip, batch_skip


def _reference(x, pos, batch, x_skip, pos_skip, batch_skip, params, num_batches):
    """Pure-JAX f32 reference of the same forward pass (highest matmul precision)."""
    w1, b1, w2, b2, w3, b3 = params
    hp = jax.lax.Precision.HIGHEST
    h = jnp.maximum(
        jnp.dot(jnp.concatenate([x, pos], axis=1), w1, precision=hp) + b1, 0.0)
    h = jnp.maximum(jnp.dot(h, w2, precision=hp) + b2, 0.0)
    h = jnp.maximum(jnp.dot(h, w3, precision=hp) + b3, 0.0)
    pooled = jnp.stack([
        jnp.max(jnp.where((batch == b)[:, None], h, -jnp.inf), axis=0)
        for b in range(num_batches)
    ])
    x_interp = pooled[batch_skip]
    return jnp.concatenate([x_interp, x_skip], axis=1), pos_skip, batch_skip


if __name__ == "__main__":
    key = jax.random.PRNGKey(0)
    keys = jax.random.split(key, 10)

    # Small shapes consistent with GlobalSAModule's place in SplineCNNUNet_V1
    # (real config: C=128, self.nn = MLP([131, 256, 512, 1024]), Cs=128; scaled
    # down but keeping H3 and Cs multiples of 128 so both fused output
    # sub-stores stay lane-aligned, as in the real config: 1024 + 128).
    B = 2
    N, C = 1024, 8              # input points, feature channels
    Ns, Cs = 1024, 128          # skip-connection points / channels
    H1, H2, H3 = 32, 64, 128    # MLP hidden widths

    x = jax.random.normal(keys[0], (N, C), jnp.float32)
    pos = jax.random.normal(keys[1], (N, 3), jnp.float32)
    batch = jnp.repeat(jnp.arange(B, dtype=jnp.int32), N // B)
    x_skip = jax.random.normal(keys[2], (Ns, Cs), jnp.float32)
    pos_skip = jax.random.normal(keys[3], (Ns, 3), jnp.float32)
    batch_skip = jnp.repeat(jnp.arange(B, dtype=jnp.int32), Ns // B)

    # Deterministic parameter init for self.nn (Linear(C+3,H1), Linear(H1,H2),
    # Linear(H2,H3)); weights stored [C_in, C_out].
    w1 = 0.1 * jax.random.normal(keys[4], (C + 3, H1), jnp.float32)
    b1 = 0.1 * jax.random.normal(keys[5], (1, H1), jnp.float32)
    w2 = 0.1 * jax.random.normal(keys[6], (H1, H2), jnp.float32)
    b2 = 0.1 * jax.random.normal(keys[7], (1, H2), jnp.float32)
    w3 = 0.1 * jax.random.normal(keys[8], (H2, H3), jnp.float32)
    b3 = 0.1 * jax.random.normal(keys[9], (1, H3), jnp.float32)
    params = (w1, b1, w2, b2, w3, b3)

    x_ref_out, _, _ = _reference(
        x, pos, batch, x_skip, pos_skip, batch_skip, params, B)

    # f32 MXU path: tight parity with the pure-JAX reference.
    x_f32, pos_out, batch_out = global_sa_module(
        x, pos, batch, x_skip, pos_skip, batch_skip, params, B,
        matmul_dtype=jnp.float32)
    jax.block_until_ready(x_f32)
    assert x_f32.shape == (Ns, H3 + Cs), x_f32.shape
    assert pos_out.shape == (Ns, 3) and batch_out.shape == (Ns,)
    assert jnp.allclose(x_f32, x_ref_out, atol=1e-3, rtol=1e-3), \
        float(jnp.max(jnp.abs(x_f32 - x_ref_out)))

    # bf16-operand MXU path (default; ~2x MXU on v5e/v6e/v7x): looser tolerance.
    x_bf16, _, _ = global_sa_module(
        x, pos, batch, x_skip, pos_skip, batch_skip, params, B)
    jax.block_until_ready(x_bf16)
    assert jnp.allclose(x_bf16, x_ref_out, atol=3e-2, rtol=3e-2), \
        float(jnp.max(jnp.abs(x_bf16 - x_ref_out)))

    print("KERNEL_OK")
</pallas_src>

<mosaic_0001>
module attributes {stable_mosaic.version = 11 : i64} {
  func.func @_mlp_segmax_kernel(%arg0: i32, %arg1: i32, %arg2: memref<3xi32, #tpu.memory_space<smem>>, %arg3: memref<512x8xf32, #tpu.memory_space<vmem>>, %arg4: memref<512x3xf32, #tpu.memory_space<vmem>>, %arg5: memref<8x32xf32, #tpu.memory_space<vmem>>, %arg6: memref<3x32xf32, #tpu.memory_space<vmem>>, %arg7: memref<1x32xf32, #tpu.memory_space<vmem>>, %arg8: memref<32x64xf32, #tpu.memory_space<vmem>>, %arg9: memref<1x64xf32, #tpu.memory_space<vmem>>, %arg10: memref<64x128xf32, #tpu.memory_space<vmem>>, %arg11: memref<1x128xf32, #tpu.memory_space<vmem>>, %arg12: memref<1x2x128xf32, #tpu.memory_space<vmem>>, %arg13: memref<8x128xf32, #tpu.memory_space<vmem>>) attributes {dimension_semantics = [#tpu.dimension_semantics<parallel>, #tpu.dimension_semantics<arbitrary>], iteration_bounds = array<i64: 2, 1>, scalar_prefetch = 1 : i64, scratch_operands = 1 : i64, tpu.core_type = #tpu.core_type<tc>, window_params = [{transform_indices = @transform_0, window_bounds = array<i64: 512, 8>}, {transform_indices = @transform_1, window_bounds = array<i64: 512, 3>}, {pipeline_mode = #tpu.pipeline_mode<synchronous>, transform_indices = @transform_2, window_bounds = array<i64: 8, 32>}, {pipeline_mode = #tpu.pipeline_mode<synchronous>, transform_indices = @transform_3, window_bounds = array<i64: 3, 32>}, {pipeline_mode = #tpu.pipeline_mode<synchronous>, transform_indices = @transform_4, window_bounds = array<i64: 1, 32>}, {pipeline_mode = #tpu.pipeline_mode<synchronous>, transform_indices = @transform_5, window_bounds = array<i64: 32, 64>}, {pipeline_mode = #tpu.pipeline_mode<synchronous>, transform_indices = @transform_6, window_bounds = array<i64: 1, 64>}, {pipeline_mode = #tpu.pipeline_mode<synchronous>, transform_indices = @transform_7, window_bounds = array<i64: 64, 128>}, {pipeline_mode = #tpu.pipeline_mode<synchronous>, transform_indices = @transform_8, window_bounds = array<i64: 1, 128>}, {transform_indices = @transform_9, window_bounds = array<i64: 1, 2, 128>}]} {
    %c0_i32 = arith.constant 0 : i32
    %0 = arith.cmpi eq, %arg1, %c0_i32 : i32
    %1 = arith.extui %0 : i1 to i32
    %c0_i32_0 = arith.constant 0 : i32
    %2 = arith.cmpi ne, %1, %c0_i32_0 : i32
    scf.if %2 {
      %cst_33 = arith.constant 0xFF800000 : f32
      %70 = vector.broadcast %cst_33 : f32 to vector<8x128xf32>
      %c0_34 = arith.constant 0 : index
      %c0_35 = arith.constant 0 : index
      %71 = vector.load %arg13[%c0_34, %c0_35] : memref<8x128xf32, #tpu.memory_space<vmem>>, vector<8x128xf32>
      tpu.vector_store %arg13[%c0_34, %c0_35], %70 {strides = array<i32>} : memref<8x128xf32, #tpu.memory_space<vmem>>, vector<8x128xf32>,
    } else {
    }
    %c0 = arith.constant 0 : index
    %c0_1 = arith.constant 0 : index
    %3 = vector.load %arg4[%c0, %c0_1] : memref<512x3xf32, #tpu.memory_space<vmem>>, vector<512x3xf32>
    %c0_2 = arith.constant 0 : index
    %c0_3 = arith.constant 0 : index
    %4 = vector.load %arg6[%c0_2, %c0_3] : memref<3x32xf32, #tpu.memory_space<vmem>>, vector<3x32xf32>
    %c0_4 = arith.constant 0 : index
    %c0_5 = arith.constant 0 : index
    %5 = vector.load %arg3[%c0_4, %c0_5] : memref<512x8xf32, #tpu.memory_space<vmem>>, vector<512x8xf32>
    %c0_6 = arith.constant 0 : index
    %c0_7 = arith.constant 0 : index
    %6 = vector.load %arg5[%c0_6, %c0_7] : memref<8x32xf32, #tpu.memory_space<vmem>>, vector<8x32xf32>
    %cst = arith.constant dense<0.000000e+00> : vector<512x32xf32>
    %7 = tpu.matmul %5, %6, %cst {dimension_numbers = #tpu.dot_dimension_numbers<[1], [0], [0], [1], [0, 0, 1, 1], [], []>} : vector<512x8xf32>, vector<8x32xf32>, vector<512x32xf32> -> vector<512x32xf32>
    %c0_8 = arith.constant 0 : index
    %c0_9 = arith.constant 0 : index
    %8 = vector.load %arg7[%c0_8, %c0_9] : memref<1x32xf32, #tpu.memory_space<vmem>>, vector<1x32xf32>
    %9 = vector.broadcast %8 : vector<1x32xf32> to vector<512x32xf32>
    %10 = arith.addf %7, %9 : vector<512x32xf32>
    %11 = vector.extract_strided_slice %3 {offsets = [0, 0], sizes = [512, 1], strides = [1, 1]} : vector<512x3xf32> to vector<512x1xf32>
    %12 = vector.extract_strided_slice %4 {offsets = [0, 0], sizes = [1, 32], strides = [1, 1]} : vector<3x32xf32> to vector<1x32xf32>
    %13 = vector.broadcast %11 : vector<512x1xf32> to vector<512x32xf32>
    %14 = vector.broadcast %12 : vector<1x32xf32> to vector<512x32xf32>
    %15 = arith.mulf %13, %14 : vector<512x32xf32>
    %16 = arith.addf %10, %15 : vector<512x32xf32>
    %17 = vector.extract_strided_slice %3 {offsets = [0, 1], sizes = [512, 1], strides = [1, 1]} : vector<512x3xf32> to vector<512x1xf32>
    %18 = vector.extract_strided_slice %4 {offsets = [1, 0], sizes = [1, 32], strides = [1, 1]} : vector<3x32xf32> to vector<1x32xf32>
    %19 = vector.broadcast %17 : vector<512x1xf32> to vector<512x32xf32>
    %20 = vector.broadcast %18 : vector<1x32xf32> to vector<512x32xf32>
    %21 = arith.mulf %19, %20 : vector<512x32xf32>
    %22 = arith.addf %16, %21 : vector<512x32xf32>
    %23 = vector.extract_strided_slice %3 {offsets = [0, 2], sizes = [512, 1], strides = [1, 1]} : vector<512x3xf32> to vector<512x1xf32>
    %24 = vector.extract_strided_slice %4 {offsets = [2, 0], sizes = [1, 32], strides = [1, 1]} : vector<3x32xf32> to vector<1x32xf32>
    %25 = vector.broadcast %23 : vector<512x1xf32> to vector<512x32xf32>
    %26 = vector.broadcast %24 : vector<1x32xf32> to vector<512x32xf32>
    %27 = arith.mulf %25, %26 : vector<512x32xf32>
    %28 = arith.addf %22, %27 : vector<512x32xf32>
    %cst_10 = arith.constant 0.000000e+00 : f32
    %29 = vector.broadcast %cst_10 : f32 to vector<512x32xf32>
    %30 = arith.maximumf %28, %29 : vector<512x32xf32>
    %c0_11 = arith.constant 0 : index
    %c0_12 = arith.constant 0 : index
    %31 = vector.load %arg8[%c0_11, %c0_12] : memref<32x64xf32, #tpu.memory_space<vmem>>, vector<32x64xf32>
    %cst_13 = arith.constant dense<0.000000e+00> : vector<512x64xf32>
    %32 = tpu.matmul %30, %31, %cst_13 {dimension_numbers = #tpu.dot_dimension_numbers<[1], [0], [0], [1], [0, 0, 1, 1], [], []>} : vector<512x32xf32>, vector<32x64xf32>, vector<512x64xf32> -> vector<512x64xf32>
    %c0_14 = arith.constant 0 : index
    %c0_15 = arith.constant 0 : index
    %33 = vector.load %arg9[%c0_14, %c0_15] : memref<1x64xf32, #tpu.memory_space<vmem>>, vector<1x64xf32>
    %34 = vector.broadcast %33 : vector<1x64xf32> to vector<512x64xf32>
    %35 = arith.addf %32, %34 : vector<512x64xf32>
    %cst_16 = arith.constant 0.000000e+00 : f32
    %36 = vector.broadcast %cst_16 : f32 to vector<512x64xf32>
    %37 = arith.maximumf %35, %36 : vector<512x64xf32>
    %c0_17 = arith.constant 0 : index
    %c0_18 = arith.constant 0 : index
    %38 = vector.load %arg10[%c0_17, %c0_18] : memref<64x128xf32, #tpu.memory_space<vmem>>, vector<64x128xf32>
    %cst_19 = arith.constant dense<0.000000e+00> : vector<512x128xf32>
    %39 = tpu.matmul %37, %38, %cst_19 {dimension_numbers = #tpu.dot_dimension_numbers<[1], [0], [0], [1], [0, 0, 1, 1], [], []>} : vector<512x64xf32>, vector<64x128xf32>, vector<512x128xf32> -> vector<512x128xf32>
    %c0_20 = arith.constant 0 : index
    %c0_21 = arith.constant 0 : index
    %40 = vector.load %arg11[%c0_20, %c0_21] : memref<1x128xf32, #tpu.memory_space<vmem>>, vector<1x128xf32>
    %41 = vector.broadcast %40 : vector<1x128xf32> to vector<512x128xf32>
    %42 = arith.addf %39, %41 : vector<512x128xf32>
    %cst_22 = arith.constant 0.000000e+00 : f32
    %43 = vector.broadcast %cst_22 : f32 to vector<512x128xf32>
    %44 = arith.maximumf %42, %43 : vector<512x128xf32>
    %c1_i32 = arith.constant 1 : i32
    %45 = arith.muli %arg0, %c1_i32 : i32
    %46 = arith.addi %45, %arg1 : i32
    %c512_i32 = arith.constant 512 : i32
    %47 = arith.muli %46, %c512_i32 : i32
    %48 = tpu.iota {dimensions = array<i32: 0>} : vector<512x1xi32>
    %49 = vector.broadcast %47 : i32 to vector<512x1xi32>
    %50 = arith.addi %49, %48 : vector<512x1xi32>
    %c0_23 = arith.constant 0 : index
    %51 = memref.load %arg2[%c0_23] : memref<3xi32, #tpu.memory_space<smem>>
    %c1 = arith.constant 1 : index
    %52 = memref.load %arg2[%c1] : memref<3xi32, #tpu.memory_space<smem>>
    %53 = arith.maxsi %51, %47 : i32
    %c512_i32_24 = arith.constant 512 : i32
    %54 = arith.addi %47, %c512_i32_24 : i32
    %55 = arith.minsi %52, %54 : i32
    %56 = arith.cmpi slt, %53, %55 : i32
    %57 = arith.extui %56 : i1 to i32
    %cst_25 = arith.constant 0xFF800000 : f32
    %c0_i32_26 = arith.constant 0 : i32
    %58 = arith.cmpi ne, %57, %c0_i32_26 : i32
    scf.if %58 {
      %70 = vector.broadcast %51 : i32 to vector<512x1xi32>
      %71 = arith.cmpi sge, %50, %70 : vector<512x1xi32>
      %72 = vector.broadcast %52 : i32 to vector<512x1xi32>
      %73 = arith.cmpi slt, %50, %72 : vector<512x1xi32>
      %74 = arith.andi %71, %73 : vector<512x1xi1>
      %75 = vector.shape_cast %74 : vector<512x1xi1> to vector<512x1xi1>
      %76 = vector.broadcast %75 : vector<512x1xi1> to vector<512x128xi1>
      %77 = vector.broadcast %cst_25 : f32 to vector<512x128xf32>
      %78 = arith.select %76, %44, %77 : vector<512x128xi1>, vector<512x128xf32>
      %cst_33 = arith.constant dense<0xFF800000> : vector<128xf32>
      %79 = vector.multi_reduction <maximumf>, %78, %cst_33 [0] : vector<512x128xf32> to vector<128xf32>
      %80 = vector.shape_cast %79 : vector<128xf32> to vector<1x128xf32>
      %c0_34 = arith.constant 0 : index
      %c0_35 = arith.constant 0 : index
      %81 = vector.load %arg13[%c0_34, %c0_35] : memref<8x128xf32, #tpu.memory_space<vmem>>, vector<1x128xf32>
      %82 = arith.maximumf %81, %80 : vector<1x128xf32>
      %c0_36 = arith.constant 0 : index
      %c0_37 = arith.constant 0 : index
      %83 = vector.load %arg13[%c0_36, %c0_37] : memref<8x128xf32, #tpu.memory_space<vmem>>, vector<1x128xf32>
      tpu.vector_store %arg13[%c0_36, %c0_37], %82 {strides = array<i32>} : memref<8x128xf32, #tpu.memory_space<vmem>>, vector<1x128xf32>,
    } else {
    }
    %c1_27 = arith.constant 1 : index
    %59 = memref.load %arg2[%c1_27] : memref<3xi32, #tpu.memory_space<smem>>
    %c2 = arith.constant 2 : index
    %60 = memref.load %arg2[%c2] : memref<3xi32, #tpu.memory_space<smem>>
    %61 = arith.maxsi %59, %47 : i32
    %c512_i32_28 = arith.constant 512 : i32
    %62 = arith.addi %47, %c512_i32_28 : i32
    %63 = arith.minsi %60, %62 : i32
    %64 = arith.cmpi slt, %61, %63 : i32
    %65 = arith.extui %64 : i1 to i32
    %cst_29 = arith.constant 0xFF800000 : f32
    %c0_i32_30 = arith.constant 0 : i32
    %66 = arith.cmpi ne, %65, %c0_i32_30 : i32
    scf.if %66 {
      %70 = vector.broadcast %59 : i32 to vector<512x1xi32>
      %71 = arith.cmpi sge, %50, %70 : vector<512x1xi32>
      %72 = vector.broadcast %60 : i32 to vector<512x1xi32>
      %73 = arith.cmpi slt, %50, %72 : vector<512x1xi32>
      %74 = arith.andi %71, %73 : vector<512x1xi1>
      %75 = vector.shape_cast %74 : vector<512x1xi1> to vector<512x1xi1>
      %76 = vector.broadcast %75 : vector<512x1xi1> to vector<512x128xi1>
      %77 = vector.broadcast %cst_29 : f32 to vector<512x128xf32>
      %78 = arith.select %76, %44, %77 : vector<512x128xi1>, vector<512x128xf32>
      %cst_33 = arith.constant dense<0xFF800000> : vector<128xf32>
      %79 = vector.multi_reduction <maximumf>, %78, %cst_33 [0] : vector<512x128xf32> to vector<128xf32>
      %80 = vector.shape_cast %79 : vector<128xf32> to vector<1x128xf32>
      %c1_34 = arith.constant 1 : index
      %c0_35 = arith.constant 0 : index
      %81 = vector.load %arg13[%c1_34, %c0_35] : memref<8x128xf32, #tpu.memory_space<vmem>>, vector<1x128xf32>
      %82 = arith.maximumf %81, %80 : vector<1x128xf32>
      %c1_36 = arith.constant 1 : index
      %c0_37 = arith.constant 0 : index
      %83 = vector.load %arg13[%c1_36, %c0_37] : memref<8x128xf32, #tpu.memory_space<vmem>>, vector<1x128xf32>
      tpu.vector_store %arg13[%c1_36, %c0_37], %82 {strides = array<i32>} : memref<8x128xf32, #tpu.memory_space<vmem>>, vector<1x128xf32>,
    } else {
    }
    %c0_i32_31 = arith.constant 0 : i32
    %67 = arith.cmpi eq, %arg1, %c0_i32_31 : i32
    %68 = arith.extui %67 : i1 to i32
    %c0_i32_32 = arith.constant 0 : i32
    %69 = arith.cmpi ne, %68, %c0_i32_32 : i32
    scf.if %69 {
      %c0_33 = arith.constant 0 : index
      %c0_34 = arith.constant 0 : index
      %70 = vector.load %arg13[%c0_33, %c0_34] : memref<8x128xf32, #tpu.memory_space<vmem>>, vector<2x128xf32>
      %c0_35 = arith.constant 0 : index
      %c0_36 = arith.constant 0 : index
      %c0_37 = arith.constant 0 : index
      %71 = vector.load %arg12[%c0_35, %c0_36, %c0_37] : memref<1x2x128xf32, #tpu.memory_space<vmem>>, vector<1x2x128xf32>
      %72 = vector.shape_cast %71 : vector<1x2x128xf32> to vector<2x128xf32>
      %73 = vector.shape_cast %70 : vector<2x128xf32> to vector<1x2x128xf32>
      tpu.vector_store %arg12[%c0_35, %c0_36, %c0_37], %73 {strides = array<i32>} : memref<1x2x128xf32, #tpu.memory_space<vmem>>, vector<1x2x128xf32>,
    } else {
    }
    return
  }
  func.func @transform_0(%arg0: i32, %arg1: i32, %arg2: memref<3xi32, #tpu.memory_space<smem>>) -> (i32, i32) {
    %c1_i32 = arith.constant 1 : i32
    %0 = arith.muli %arg0, %c1_i32 : i32
    %1 = arith.addi %0, %arg1 : i32
    %c1_i32_0 = arith.constant 1 : i32
    %2 = arith.minsi %1, %c1_i32_0 : i32
    %c0_i32 = arith.constant 0 : i32
    %c0_i32_1 = arith.constant 0 : i32
    return %2, %c0_i32 : i32, i32
  }
  func.func @transform_1(%arg0: i32, %arg1: i32, %arg2: memref<3xi32, #tpu.memory_space<smem>>) -> (i32, i32) {
    %c1_i32 = arith.constant 1 : i32
    %0 = arith.muli %arg0, %c1_i32 : i32
    %1 = arith.addi %0, %arg1 : i32
    %c1_i32_0 = arith.constant 1 : i32
    %2 = arith.minsi %1, %c1_i32_0 : i32
    %c0_i32 = arith.constant 0 : i32
    %c0_i32_1 = arith.constant 0 : i32
    return %2, %c0_i32 : i32, i32
  }
  func.func @transform_2(%arg0: i32, %arg1: i32, %arg2: memref<3xi32, #tpu.memory_space<smem>>) -> (i32, i32) {
    %c0_i32 = arith.constant 0 : i32
    %c0_i32_0 = arith.constant 0 : i32
    %c0_i32_1 = arith.constant 0 : i32
    return %c0_i32, %c0_i32_0 : i32, i32
  }
  func.func @transform_3(%arg0: i32, %arg1: i32, %arg2: memref<3xi32, #tpu.memory_space<smem>>) -> (i32, i32) {
    %c0_i32 = arith.constant 0 : i32
    %c0_i32_0 = arith.constant 0 : i32
    %c0_i32_1 = arith.constant 0 : i32
    return %c0_i32, %c0_i32_0 : i32, i32
  }
  func.func @transform_4(%arg0: i32, %arg1: i32, %arg2: memref<3xi32, #tpu.memory_space<smem>>) -> (i32, i32) {
    %c0_i32 = arith.constant 0 : i32
    %c0_i32_0 = arith.constant 0 : i32
    %c0_i32_1 = arith.constant 0 : i32
    return %c0_i32, %c0_i32_0 : i32, i32
  }
  func.func @transform_5(%arg0: i32, %arg1: i32, %arg2: memref<3xi32, #tpu.memory_space<smem>>) -> (i32, i32) {
    %c0_i32 = arith.constant 0 : i32
    %c0_i32_0 = arith.constant 0 : i32
    %c0_i32_1 = arith.constant 0 : i32
    return %c0_i32, %c0_i32_0 : i32, i32
  }
  func.func @transform_6(%arg0: i32, %arg1: i32, %arg2: memref<3xi32, #tpu.memory_space<smem>>) -> (i32, i32) {
    %c0_i32 = arith.constant 0 : i32
    %c0_i32_0 = arith.constant 0 : i32
    %c0_i32_1 = arith.constant 0 : i32
    return %c0_i32, %c0_i32_0 : i32, i32
  }
  func.func @transform_7(%arg0: i32, %arg1: i32, %arg2: memref<3xi32, #tpu.memory_space<smem>>) -> (i32, i32) {
    %c0_i32 = arith.constant 0 : i32
    %c0_i32_0 = arith.constant 0 : i32
    %c0_i32_1 = arith.constant 0 : i32
    return %c0_i32, %c0_i32_0 : i32, i32
  }
  func.func @transform_8(%arg0: i32, %arg1: i32, %arg2: memref<3xi32, #tpu.memory_space<smem>>) -> (i32, i32) {
    %c0_i32 = arith.constant 0 : i32
    %c0_i32_0 = arith.constant 0 : i32
    %c0_i32_1 = arith.constant 0 : i32
    return %c0_i32, %c0_i32_0 : i32, i32
  }
  func.func @transform_9(%arg0: i32, %arg1: i32, %arg2: memref<3xi32, #tpu.memory_space<smem>>) -> (i32, i32, i32) {
    %c0_i32 = arith.constant 0 : i32
    %c0_i32_0 = arith.constant 0 : i32
    %c0_i32_1 = arith.constant 0 : i32
    return %arg0, %c0_i32, %c0_i32_0 : i32, i32, i32
  }
}

</mosaic_0001>

<bundles_post_ra>
// kernel: tpu_custom_call.1
= control target key start
LH: loop header
LB: loop body
LE: loop exit
PB: predicated region body
PF: predicated region fallthrough
CT: control target
= control target key end

     0   :  { %s9966_s0 = inlined_call_operand.vmem [shape: s32[3], index: 0, kind: input, shape index: {}]   ;;  %s9967_s1 = inlined_call_operand.vmem [shape: f32[1024,8], index: 1, kind: input, shape index: {}]   ;;  %s9968_s2 = inlined_call_operand.vmem [shape: f32[1024,3], index: 2, kind: input, shape index: {}]   ;;  %s9969_s3 = inlined_call_operand.vmem [shape: f32[8,32], index: 3, kind: input, shape index: {}]   ;;  %s9970_s4 = inlined_call_operand.vmem [shape: f32[3,32], index: 4, kind: input, shape index: {}]   ;;  %s9971_s5 = inlined_call_operand.vmem [shape: f32[1,32], index: 5, kind: input, shape index: {}]   ;;  %s9972_s6 = inlined_call_operand.vmem [shape: f32[32,64], index: 6, kind: input, shape index: {}]   ;;  %s9973_s7 = inlined_call_operand.vmem [shape: f32[1,64], index: 7, kind: input, shape index: {}]   ;;  %s9974_s8 = inlined_call_operand.vmem [shape: f32[64,128], index: 8, kind: input, shape index: {}]   ;;  %s9975_s9 = inlined_call_operand.vmem [shape: f32[1,128], index: 9, kind: input, shape index: {}]   ;;  %s9976_s10 = inlined_call_operand.hbm [shape: f32[2,2,128], index: 10, kind: output, shape index: {}]  }
   0x1   :  { %10173 = sst [smem:[#allocation114_spill]] %s9967_s1  ;;  %s15_s15 = sshll.u32 %s9966_s0, 4  ;;  %s16_s15 = int_to_ptr.vmem [resolvable:$true] %s15_s15 }
   0x2   :  { %s5826_s16 = scalar_lea.vmem %s16_s15, 16  ;;  %p5831_p1 = scmp.lt.s32.totalorder %s16_s15, %s16_s15 }
   0x3   :  { %p5827_p0 = scmp.ne.s32.totalorder %s16_s15, %s5826_s16  ;;  %p5832_p2 = scmp.lt.s32.totalorder %s5826_s16, %s5826_s16 }
   0x5   :  { %p5833_p3 = por %p5832_p2, %p5831_p1 }
   0x7   :  { %p5834_p4 = pnand %p5833_p3, %p5827_p0 }
   0x9   :  { %5837 = shalt.err (!%p5834_p4)  }
   0xa   :  { %s5920_s17 = smov [#allocation4]  }
   0xb   :  { %18 = dma.vmem_to_smem %s16_s15, 16, %s5920_s17, [#allocation3] }
   0xc   :  { %5890 = dma.done.wait [#allocation3], 16 }
   0xd   :  { %5891 = vsyncadd [#allocation3], 4294967280 }
   0xe   :  { %20 = sfence }
   0xf   :  { %21 = vsyncpa [#allocation6], 0 }
  0x10   :  { %23 = vsyncpa [#allocation6 + $0x1], 0  ;;  %s5984_s18 = smov 0   ;;  %s5986_s19 = smov 0  }
  0x11   :  { %s5988_s0 = smov 0   ;;  %s5990_s20 = smov 0  }
  0x12   :  { %s5992_s21 = smov 0   ;;  %s5994_s22 = smov 0  }
  0x13 LB: > { %s4905_s23 = sadd.s32 4294967295, %s5918_s22   ;;  %s4906_s24 = sadd.s32 4294967294, %s5918_s22   ;;  %s5918_s22 = sphi %s5994_s22, %s29_s22   ;;  %s5914_s21 = sphi %s5992_s21, %s10921_s21   ;;  %s5910_s20 = sphi %s5990_s20, %s10920_s20   ;;  %s5906_s0 = sphi %s5988_s0, %s10919_s0   ;;  %s5902_s19 = sphi %s5986_s19, %s10918_s19   ;;  %s5898_s18 = sphi %s5984_s18, %s10917_s18  }
  0x14   : > { %s41_s25 = sadd.s32 1, %s5914_s21  ;;  %s259_s26 = sadd.s32 1, %s5906_s0 }
  0x15   : > { %p43_p5 = scmp.ge.s32.totalorder %s41_s25, 2  ;;  %p269_p6 = scmp.ne.s32.totalorder %s5906_s0, %s5902_s19 }
  0x16   : > { %p270_p7 = scmp.eq.s32.totalorder %s4905_s23, 1  ;;  %p275_p8 = scmp.ne.s32.totalorder %s5902_s19, %s5898_s18 }
  0x17   : > { %s10923_s25 = smov (%p43_p5, %s41_s25), 0  ;;  %p276_p10 = scmp.eq.s32.totalorder %s4906_s24, 1 }
  0x18   : > { %p6024_p9 = por %p270_p7, %p269_p6  ;;  %s256_s28 = ssub.s32 %s5914_s21, %s10923_s25 }
  0x19   : > { %p4909_p11 = scmp.ge.s32.totalorder %s5918_s22, 1  ;;  %p257_p12 = scmp.eq.s32.totalorder %s256_s28, 0 }
  0x1a   : > { %p6031_p13 = por %p276_p10, %p275_p8  ;;  %p345_p0 = scmp.lt.s32.totalorder %s5918_s22, 3 }
  0x1b   : > { %s6037_s30 = scalar_select %p257_p12, %s5906_s0, %s259_s26  }
  0x1c   : > { %p346_p1 = pnand %p4909_p11, %p345_p0 }
  0x1e   : > { %349 = sbr.rel (%p346_p1) target bundleno = 1416 (0x588), region = 56 }
  0x25   : > { %s10129_s11 = sand.u32 1, %s5902_s19   ;;  %v550_v0 = vld [vmem:[%s9969_s3] sm:$0xff]  ;;  %p393_p2 = scmp.lt.s32.totalorder %s5910_s20, 1  ;;  %v9979_v1 = vmov 2   ;;  %v9977_v2 = vmov 0   ;;  %v5923_v3 = vmov -inf  }
  0x26   : > { %5729 = vset.pattern.permute.xlu0 %v9979_v1  ;;  %5725 = vset.pattern.permute.xlu1 %v9977_v2  ;;  %s6048_s14 = sshll.u32 %s10129_s11, 1  ;;  %420 = vst [vmem:[#allocation2] sm:$0xff] %v5923_v3  ;;  %s10176_s1 = sld [smem:[#allocation114_spill]]  ;;  %vm558_vm0 = vcmask 64512   ;;  %v9981_v37 = vmov 1   ;;  %vm2439_vm1 = vcmask 261120  }
  0x27   : > { %5325 = vmatprep.subr.mxu0 %v550_v0  ;;  %5663 = vmatprep.subr.mxu1 %v550_v0  ;;  %s394_s15 = scalar_select %p393_p2, %s5910_s20, 1  ;;  %vm3096_vm2 = vcmask 523264  }
  0x28   : > { %5326 = vmatpush3.msra.mxu0 %v550_v0  ;;  %5664 = vmatpush3.msra.mxu1 %v550_v0 }
  0x29   : > { %s4911_s16 = sshll.u32 %s394_s15, 6 }
  0x2a   : > { %p396_p3 = scmp.lt.s32.totalorder %s4911_s16, 127 }
  0x2c   : > { %s10925_s16 = smov (!%p396_p3, %s4911_s16), 127 }
  0x2d   : > { %s4912_s17 = sshll.u32 %s10925_s16, 3  ;;  %s6337_s16 = sshll.u32 %s5910_s20, 9 }
  0x2e   : > { %s6054_s26 = scalar_lea.vmem %s9968_s2, %s4912_s17  ;;  %s6059_s13 = scalar_lea.vmem %s10176_s1, %s4912_s17 }
  0x2f   : > { %v6062_v4 = vld [vmem:[%s6054_s26 + $0x10] sm:$0xff]  ;;  %v486_v5 = vld [vmem:[%s6059_s13] sm:$0xff]  ;;  %v487_v7 = vld [vmem:[%s6059_s13 + $0x8] sm:$0xff]  ;;  %s6339_s17 = sld [smem:[#allocation4 + $0x1]]  ;;  %s6379_s23 = sadd.s32 512, %s6337_s16 }
  0x30   : > { %v518_v6 = vld [vmem:[%s6059_s13 + $0x100] sm:$0xff]  ;;  %1985 = vperm.xlu0 %5729, %v6062_v4   ;;  %1148 = vperm.xlu1 %5725, %v6062_v4   ;;  %v519_v8 = vld [vmem:[%s6059_s13 + $0x108] sm:$0xff]  ;;  %v6073_v9 = vld [vmem:[%s6054_s26 + $0x30] sm:$0xff]  ;;  %s391_s1 = scalar_lea.vmem [#allocation5], %s6048_s14 }
  0x31   : > { %5327 = vmatprep.mubr.msk.f32.mxu0 %vm558_vm0, %v486_v5  ;;  %5375 = vmatprep.mubr.msk.f32.mxu1 %vm558_vm0, %v518_v6  ;;  %v6076_v10 = vld [vmem:[%s6054_s26 + $0x18] sm:$0xff]  ;;  %v488_v11 = vld [vmem:[%s6059_s13 + $0x10] sm:$0xff]  ;;  %v490_v13 = vld [vmem:[%s6059_s13 + $0x20] sm:$0xff] }
  0x32   : > { %5328 = vmatmul.mubr.msk.f32.vlgmr.msra.gmra.mrb[0].mxu0 %vm558_vm0, %v487_v7  ;;  %5376 = vmatmul.mubr.msk.f32.vlgmr.msra.gmra.mrb[0].mxu1 %vm558_vm0, %v519_v8  ;;  %v489_v12 = vld [vmem:[%s6059_s13 + $0x18] sm:$0xff]  ;;  %v6087_v14 = vld [vmem:[%s6054_s26 + $0x50] sm:$0xff]  ;;  %v6090_v15 = vld [vmem:[%s6054_s26 + $0x28] sm:$0xff] }
  0x33   : > { %5330 = vmatprep.mubr.msk.f32.mxu0 %vm558_vm0, %v488_v11  ;;  %v491_v16 = vld [vmem:[%s6059_s13 + $0x28] sm:$0xff]  ;;  %v492_v17 = vld [vmem:[%s6059_s13 + $0x30] sm:$0xff]  ;;  %v6102_v19 = vld [vmem:[%s6054_s26 + $0x38] sm:$0xff] }
  0x34   : > { %2001 = vperm.xlu0 %5729, %v6073_v9   ;;  %1153 = vperm.xlu1 %5725, %v6076_v10   ;;  %v6099_v18 = vld [vmem:[%s6054_s26 + $0x70] sm:$0xff]  ;;  %v493_v20 = vld [vmem:[%s6059_s13 + $0x38] sm:$0xff]  ;;  %v494_v21 = vld [vmem:[%s6059_s13 + $0x40] sm:$0xff] }
  0x35   : > { %v6111_v22 = vld [vmem:[%s6054_s26 + $0x90] sm:$0xff]  ;;  %v6114_v23 = vld [vmem:[%s6054_s26 + $0x48] sm:$0xff]  ;;  %v6126_v27 = vld [vmem:[%s6054_s26 + $0x58] sm:$0xff]  ;;  %p3875_p5 = scmp.lt.s32.totalorder %s6339_s17, %s6379_s23 }
  0x36   : > { %5331 = vmatmul.mubr.msk.f32.gmra.mrb[2].mxu0 %vm558_vm0, %v489_v12  ;;  %v495_v24 = vld [vmem:[%s6059_s13 + $0x48] sm:$0xff]  ;;  %v496_v25 = vld [vmem:[%s6059_s13 + $0x50] sm:$0xff]  ;;  %v497_v28 = vld [vmem:[%s6059_s13 + $0x58] sm:$0xff] }
  0x37   : > { %5333 = vmatprep.mubr.msk.f32.mxu0 %vm558_vm0, %v490_v13  ;;  %v6123_v26 = vld [vmem:[%s6054_s26 + $0xb0] sm:$0xff]  ;;  %v498_v29 = vld [vmem:[%s6059_s13 + $0x60] sm:$0xff]  ;;  %v6138_v31 = vld [vmem:[%s6054_s26 + $0x68] sm:$0xff]  ;;  %s6453_s28 = scalar_select %p3875_p5, %s6339_s17, %s6379_s23 }
  0x38   : > { %2017 = vperm.xlu0 %5729, %v6087_v14   ;;  %1163 = vperm.xlu1 %5725, %v6090_v15   ;;  %v6135_v30 = vld [vmem:[%s6054_s26 + $0xd0] sm:$0xff]  ;;  %10178 = vst [vmem:[#allocation10_spill] sm:$0xff] %v6138_v31  ;;  %v499_v32 = vld [vmem:[%s6059_s13 + $0x68] sm:$0xff]  ;;  %v6147_v34 = vld [vmem:[%s6054_s26 + $0x78] sm:$0xff] }
  0x39   : > { %10177 = vst [vmem:[#allocation9_spill] sm:$0xff] %v6135_v30  ;;  %v500_v33 = vld [vmem:[%s6059_s13 + $0x70] sm:$0xff]  ;;  %10179 = vst [vmem:[#allocation11_spill] sm:$0xff] %v6147_v34  ;;  %v6151_v35 = vld [vmem:[%s6054_s26 + $0x8] sm:$0xff] }
  0x3a   : > { %5334 = vmatmul.mubr.msk.f32.gmra.mrb[4].mxu0 %vm558_vm0, %v491_v16  ;;  %v501_v36 = vld [vmem:[%s6059_s13 + $0x78] sm:$0xff]  ;;  %v502_v38 = vld [vmem:[%s6059_s13 + $0x80] sm:$0xff]  ;;  %v6160_v39 = vld [vmem:[%s6054_s26 + $0x88] sm:$0xff] }
  0x3b   : > { %5336 = vmatprep.mubr.msk.f32.mxu0 %vm558_vm0, %v492_v17  ;;  %10180 = vst [vmem:[#allocation12_spill] sm:$0xff] %v6160_v39  ;;  %v503_v40 = vld [vmem:[%s6059_s13 + $0x88] sm:$0xff]  ;;  %v504_v41 = vld [vmem:[%s6059_s13 + $0x90] sm:$0xff]  ;;  %v6169_v42 = vld [vmem:[%s6054_s26 + $0x98] sm:$0xff] }
  0x3c   : > { %2033 = vperm.xlu0 %5729, %v6099_v18   ;;  %1173 = vperm.xlu1 %5725, %v6102_v19   ;;  %10181 = vst [vmem:[#allocation13_spill] sm:$0xff] %v6169_v42  ;;  %v505_v43 = vld [vmem:[%s6059_s13 + $0x98] sm:$0xff]  ;;  %v506_v44 = vld [vmem:[%s6059_s13 + $0xa0] sm:$0xff]  ;;  %v6178_v45 = vld [vmem:[%s6054_s26 + $0xa8] sm:$0xff] }
  0x3d   : > { %10182 = vst [vmem:[#allocation14_spill] sm:$0xff] %v6178_v45  ;;  %v507_v46 = vld [vmem:[%s6059_s13 + $0xa8] sm:$0xff]  ;;  %v508_v47 = vld [vmem:[%s6059_s13 + $0xb0] sm:$0xff]  ;;  %v6187_v48 = vld [vmem:[%s6054_s26 + $0xb8] sm:$0xff] }
  0x3e   : > { %5337 = vmatmul.mubr.msk.f32.gmra.mrb[6].mxu0 %vm558_vm0, %v493_v20  ;;  %10183 = vst [vmem:[#allocation15_spill] sm:$0xff] %v6187_v48  ;;  %v509_v49 = vld [vmem:[%s6059_s13 + $0xb8] sm:$0xff]  ;;  %v510_v50 = vld [vmem:[%s6059_s13 + $0xc0] sm:$0xff]  ;;  %v6196_v51 = vld [vmem:[%s6054_s26 + $0xc8] sm:$0xff] }
  0x3f   : > { %5339 = vmatprep.mubr.msk.f32.mxu0 %vm558_vm0, %v494_v21  ;;  %10184 = vst [vmem:[#allocation16_spill] sm:$0xff] %v6196_v51  ;;  %v511_v52 = vld [vmem:[%s6059_s13 + $0xc8] sm:$0xff]  ;;  %v512_v53 = vld [vmem:[%s6059_s13 + $0xd0] sm:$0xff]  ;;  %v6205_v54 = vld [vmem:[%s6054_s26 + $0xd8] sm:$0xff] }
  0x40   : > { %2049 = vperm.xlu0 %5729, %v6111_v22   ;;  %1183 = vperm.xlu1 %5725, %v6114_v23   ;;  %10185 = vst [vmem:[#allocation17_spill] sm:$0xff] %v6205_v54  ;;  %v520_v55 = vld [vmem:[%s6059_s13 + $0x110] sm:$0xff]  ;;  %v513_v56 = vld [vmem:[%s6059_s13 + $0xd8] sm:$0xff]  ;;  %v514_v58 = vld [vmem:[%s6059_s13 + $0xe0] sm:$0xff] }
  0x41   : > { %5378 = vmatprep.mubr.msk.f32.mxu1 %vm558_vm0, %v520_v55  ;;  %v521_v57 = vld [vmem:[%s6059_s13 + $0x118] sm:$0xff]  ;;  %v450_v59 = vld [vmem:[%s6054_s26 + $0xe8] sm:$0xff]  ;;  %v522_v60 = vld [vmem:[%s6059_s13 + $0x120] sm:$0xff] }
  0x42   : > { %5340 = vmatmul.mubr.msk.f32.gmra.mrb[8].mxu0 %vm558_vm0, %v495_v24  ;;  %5379 = vmatmul.mubr.msk.f32.gmra.mrb[2].mxu1 %vm558_vm0, %v521_v57  ;;  %v515_v61 = vld [vmem:[%s6059_s13 + $0xe8] sm:$0xff]  ;;  %v516_v63 = vld [vmem:[%s6059_s13 + $0xf0] sm:$0xff]  ;;  %v452_v0 = vld [vmem:[%s6054_s26 + $0xf8] sm:$0xff] }
  0x43   : > { %5342 = vmatprep.mubr.msk.f32.mxu0 %vm558_vm0, %v496_v25  ;;  %5381 = vmatprep.mubr.msk.f32.mxu1 %vm558_vm0, %v522_v60  ;;  %v523_v62 = vld [vmem:[%s6059_s13 + $0x128] sm:$0xff]  ;;  %v524_v3 = vld [vmem:[%s6059_s13 + $0x130] sm:$0xff]  ;;  %v525_v5 = vld [vmem:[%s6059_s13 + $0x138] sm:$0xff] }
  0x44   : > { %2065 = vperm.xlu0 %5729, %v6123_v26   ;;  %1193 = vperm.xlu1 %5725, %v6126_v27   ;;  %v6237_v6 = vld [vmem:[%s6054_s26 + $0x108] sm:$0xff]  ;;  %v526_v7 = vld [vmem:[%s6059_s13 + $0x140] sm:$0xff]  ;;  %v528_v12 = vld [vmem:[%s6059_s13 + $0x150] sm:$0xff] }
  0x45   : > { %10186 = vst [vmem:[#allocation18_spill] sm:$0xff] %v6237_v6  ;;  %v527_v8 = vld [vmem:[%s6059_s13 + $0x148] sm:$0xff]  ;;  %v421_v11 = vld [vmem:[%s6054_s26] sm:$0xff]  ;;  %v529_v13 = vld [vmem:[%s6059_s13 + $0x158] sm:$0xff] }
  0x46   : > { %5343 = vmatmul.mubr.msk.f32.gmra.mrb[10].mxu0 %vm558_vm0, %v497_v28  ;;  %5382 = vmatmul.mubr.msk.f32.gmra.mrb[4].mxu1 %vm558_vm0, %v523_v62  ;;  %v530_v16 = vld [vmem:[%s6059_s13 + $0x160] sm:$0xff]  ;;  %v531_v17 = vld [vmem:[%s6059_s13 + $0x168] sm:$0xff]  ;;  %v532_v20 = vld [vmem:[%s6059_s13 + $0x170] sm:$0xff] }
  0x47   : > { %5345 = vmatprep.mubr.msk.f32.mxu0 %vm558_vm0, %v498_v29  ;;  %5384 = vmatprep.mubr.msk.f32.mxu1 %vm558_vm0, %v524_v3  ;;  %v533_v21 = vld [vmem:[%s6059_s13 + $0x178] sm:$0xff]  ;;  %v534_v24 = vld [vmem:[%s6059_s13 + $0x180] sm:$0xff]  ;;  %v535_v25 = vld [vmem:[%s6059_s13 + $0x188] sm:$0xff] }
  0x48   : > { %2081 = vperm.xlu0 %5729, %v6135_v30   ;;  %1203 = vperm.xlu1 %5725, %v6138_v31   ;;  %v536_v28 = vld [vmem:[%s6059_s13 + $0x190] sm:$0xff]  ;;  %v537_v29 = vld [vmem:[%s6059_s13 + $0x198] sm:$0xff]  ;;  %v6352_v62 = vld [vmem:[%s6054_s26 + $0x60] sm:$0xff] }
  0x49   : > { %v2431_v55 = vld [vmem:[%s9972_s6 + $0x18] sm:$0xff] }
  0x4a   : > { %5346 = vmatmul.mubr.msk.f32.gmra.mrb[12].mxu0 %vm558_vm0, %v499_v32  ;;  %5385 = vmatmul.mubr.msk.f32.gmra.mrb[6].mxu1 %vm558_vm0, %v525_v5  ;;  %v6277_v32 = vld [vmem:[%s6054_s26 + $0xf0] sm:$0xff] }
  0x4b   : > { %5348 = vmatprep.mubr.msk.f32.mxu0 %vm558_vm0, %v500_v33  ;;  %5387 = vmatprep.mubr.msk.f32.mxu1 %vm558_vm0, %v526_v7  ;;  %10187 = vst [vmem:[#allocation19_spill] sm:$0xff] %v6277_v32  ;;  %v538_v33 = vld [vmem:[%s6059_s13 + $0x1a0] sm:$0xff] }
  0x4c   : > { %5754 = vset.pattern.permute.xlu0 %v9981_v37  ;;  %1213 = vperm.xlu1 %5725, %v6147_v34  }
  0x4d   : > { %1593 = vperm.xlu0 %5754, %v6151_v35  }
  0x4e   : > { %5349 = vmatmul.mubr.msk.f32.gmra.mrb[14].mxu0 %vm558_vm0, %v501_v36  ;;  %5388 = vmatmul.mubr.msk.f32.gmra.mrb[8].mxu1 %vm558_vm0, %v527_v8  ;;  %v539_v36 = vld [vmem:[%s6059_s13 + $0x1a8] sm:$0xff] }
  0x4f   : > { %5351 = vmatprep.mubr.msk.f32.mxu0 %vm558_vm0, %v502_v38  ;;  %5390 = vmatprep.mubr.msk.f32.mxu1 %vm558_vm0, %v528_v12  ;;  %v425_v38 = vld [vmem:[%s6054_s26 + $0x20] sm:$0xff] }
  0x50   : > { %1223 = vperm.xlu1 %5725, %v6160_v39  }
  0x51   : > { %1597 = vperm.xlu0 %5754, %v6062_v4   ;;  %v517_v4 = vld [vmem:[%s6059_s13 + $0xf8] sm:$0xff] }
  0x52   : > { %5352 = vmatmul.mubr.msk.f32.gmra.mrb[16].mxu0 %vm558_vm0, %v503_v40  ;;  %5391 = vmatmul.mubr.msk.f32.gmra.mrb[10].mxu1 %vm558_vm0, %v529_v13  ;;  %v540_v40 = vld [vmem:[%s6059_s13 + $0x1b0] sm:$0xff] }
  0x53   : > { %5354 = vmatprep.mubr.msk.f32.mxu0 %vm558_vm0, %v504_v41  ;;  %5393 = vmatprep.mubr.msk.f32.mxu1 %vm558_vm0, %v530_v16  ;;  %v541_v41 = vld [vmem:[%s6059_s13 + $0x1b8] sm:$0xff] }
  0x54   : > { %1233 = vperm.xlu1 %5725, %v6169_v42  }
  0x55   : > { %1609 = vperm.xlu0 %5754, %v6090_v15  }
  0x56   : > { %5355 = vmatmul.mubr.msk.f32.gmra.mrb[18].mxu0 %vm558_vm0, %v505_v43  ;;  %5394 = vmatmul.mubr.msk.f32.gmra.mrb[12].mxu1 %vm558_vm0, %v531_v17  ;;  %v543_v43 = vld [vmem:[%s6059_s13 + $0x1c8] sm:$0xff] }
  0x57   : > { %5357 = vmatprep.mubr.msk.f32.mxu0 %vm558_vm0, %v506_v44  ;;  %5396 = vmatprep.mubr.msk.f32.mxu1 %vm558_vm0, %v532_v20  ;;  %v544_v44 = vld [vmem:[%s6059_s13 + $0x1d0] sm:$0xff] }
  0x58   : > { %1243 = vperm.xlu1 %5725, %v6178_v45  }
  0x59   : > { %1613 = vperm.xlu0 %5754, %v6073_v9  }
  0x5a   : > { %5358 = vmatmul.mubr.msk.f32.gmra.mrb[20].mxu0 %vm558_vm0, %v507_v46  ;;  %5397 = vmatmul.mubr.msk.f32.gmra.mrb[14].mxu1 %vm558_vm0, %v533_v21  ;;  %v545_v46 = vld [vmem:[%s6059_s13 + $0x1d8] sm:$0xff] }
  0x5b   : > { %5360 = vmatprep.mubr.msk.f32.mxu0 %vm558_vm0, %v508_v47  ;;  %5399 = vmatprep.mubr.msk.f32.mxu1 %vm558_vm0, %v534_v24  ;;  %v546_v47 = vld [vmem:[%s6059_s13 + $0x1e0] sm:$0xff] }
  0x5c   : > { %1253 = vperm.xlu1 %5725, %v6187_v48  }
  0x5d   : > { %1625 = vperm.xlu0 %5754, %v6114_v23  }
  0x5e   : > { %5361 = vmatmul.mubr.msk.f32.gmra.mrb[22].mxu0 %vm558_vm0, %v509_v49  ;;  %5400 = vmatmul.mubr.msk.f32.gmra.mrb[16].mxu1 %vm558_vm0, %v535_v25  ;;  %v2428_v49 = vld [vmem:[%s9972_s6] sm:$0xff] }
  0x5f   : > { %5363 = vmatprep.mubr.msk.f32.mxu0 %vm558_vm0, %v510_v50  ;;  %5402 = vmatprep.mubr.msk.f32.mxu1 %vm558_vm0, %v536_v28  ;;  %v2429_v50 = vld [vmem:[%s9972_s6 + $0x8] sm:$0xff] }
  0x60   : > { %1263 = vperm.xlu1 %5725, %v6196_v51  }
  0x61   : > { %1629 = vperm.xlu0 %5754, %v6087_v14  }
  0x62   : > { %5364 = vmatmul.mubr.msk.f32.gmra.mrb[24].mxu0 %vm558_vm0, %v511_v52  ;;  %5403 = vmatmul.mubr.msk.f32.gmra.mrb[18].mxu1 %vm558_vm0, %v537_v29  ;;  %v547_v52 = vld [vmem:[%s6059_s13 + $0x1e8] sm:$0xff] }
  0x63   : > { %5366 = vmatprep.mubr.msk.f32.mxu0 %vm558_vm0, %v512_v53  ;;  %5405 = vmatprep.mubr.msk.f32.mxu1 %vm558_vm0, %v538_v33  ;;  %v5639_v53 = vpack.c.bf16 %v2429_v50, %v2428_v49 }
  0x64   : > { %1273 = vperm.xlu1 %5725, %v6205_v54   ;;  %v10191_v54 = vmov 1  }
  0x65   : > { %1641 = vperm.xlu0 %5754, %v6138_v31   ;;  %5640 = vmatprep.subr.bf16.mxu1 %v5639_v53  ;;  %v6541_v31 = vstv %s6337_s16 }
  0x66   : > { %5367 = vmatmul.mubr.msk.f32.gmra.mrb[26].mxu0 %vm558_vm0, %v513_v56  ;;  %5406 = vmatmul.mubr.msk.f32.gmra.mrb[20].mxu1 %vm558_vm0, %v539_v36  ;;  %v549_v56 = vld [vmem:[%s6059_s13 + $0x1f8] sm:$0xff] }
  0x67   : > { %5369 = vmatprep.mubr.msk.f32.mxu0 %vm558_vm0, %v514_v58  ;;  %5408 = vmatprep.mubr.msk.f32.mxu1 %vm558_vm0, %v540_v40  ;;  %v429_v58 = vld [vmem:[%s6054_s26 + $0x40] sm:$0xff] }
  0x68   : > { %1283 = vperm.xlu1 %5725, %v450_v59   ;;  %5642 = vmatpush3.bf16.msra.mxu1 %v5639_v53 }
  0x69   : > { %1645 = vperm.xlu0 %5754, %v6099_v18  }
  0x6a   : > { %5370 = vmatmul.mubr.msk.f32.gmra.mrb[28].mxu0 %vm558_vm0, %v515_v61  ;;  %5409 = vmatmul.mubr.msk.f32.gmra.mrb[22].mxu1 %vm558_vm0, %v541_v41 }
  0x6b   : > { %5372 = vmatprep.mubr.msk.f32.mxu0 %vm558_vm0, %v516_v63 }
  0x6c   : > { %1293 = vperm.xlu1 %5725, %v452_v0  }
  0x6d   : > { %1657 = vperm.xlu0 %5754, %v6160_v39  }
  0x6e   : > { %5373 = vmatmul.mubr.msk.f32.gmra.mrb[30].mxu0 %vm558_vm0, %v517_v4 }
  0x70   : > { %1303 = vperm.xlu1 %5725, %v6237_v6  }
  0x71   : > { %1661 = vperm.xlu0 %5754, %v6111_v22  }
  0x74   : > { %5726 = vset.pattern.permute.xlu1 %v9981_v37 }
  0x75   : > { %1673 = vperm.xlu0 %5754, %v6178_v45   ;;  %1589 = vperm.xlu1 %5726, %v421_v11  }
  0x79   : > { %1677 = vperm.xlu0 %5754, %v6123_v26   ;;  %5727 = vset.pattern.permute.xlu1 %v9979_v1 }
  0x7a   : > { %1977 = vperm.xlu1 %5727, %v421_v11  }
  0x7d   : > { %1689 = vperm.xlu0 %5754, %v6196_v51  }
  0x7e   : > { %1981 = vperm.xlu1 %5727, %v6151_v35  }
  0x81   : > { %1693 = vperm.xlu0 %5754, %v6135_v30  }
  0x82   : > { %5728 = vset.pattern.permute.xlu1 %v9981_v37 }
  0x83   : > { %1601 = vperm.xlu1 %5728, %v6076_v10  }
  0x85   : > { %1705 = vperm.xlu0 %5754, %v450_v59   ;;  %v1456_v59 = vlaneseq }
  0x87   : > { %5730 = vset.pattern.permute.xlu1 %v9979_v1  ;;  %v6332_v60 = vshrl.u32 %v1456_v59, 7 }
  0x88   : > { %1989 = vperm.xlu1 %5730, %v6076_v10   ;;  %v542_v10 = vld [vmem:[%s6059_s13 + $0x1c0] sm:$0xff] }
  0x89   : > { %1709 = vperm.xlu0 %5754, %v6277_v32   ;;  %5411 = vmatprep.mubr.msk.f32.mxu1 %vm558_vm0, %v542_v10  ;;  %v6349_v61 = vadd.s32 24, %v6332_v60  ;;  %v6355_v63 = vadd.s32 32, %v6332_v60  ;;  %v6358_v0 = vadd.s32 40, %v6332_v60  ;;  %v6361_v3 = vadd.s32 48, %v6332_v60 }
  0x8a   : > { %5412 = vmatmul.mubr.msk.f32.gmra.mrb[24].mxu1 %vm558_vm0, %v543_v43  ;;  %v6367_v4 = vadd.s32 64, %v6332_v60  ;;  %v6370_v5 = vadd.s32 72, %v6332_v60  ;;  %v6373_v7 = vadd.s32 80, %v6332_v60  ;;  %v6376_v8 = vadd.s32 88, %v6332_v60 }
  0x8b   : > { %5414 = vmatprep.mubr.msk.f32.mxu1 %vm558_vm0, %v544_v44  ;;  %v6386_v12 = vadd.s32 104, %v6332_v60  ;;  %v6389_v13 = vadd.s32 112, %v6332_v60  ;;  %v6392_v16 = vadd.s32 120, %v6332_v60  ;;  %v6396_v17 = vadd.s32 128, %v6332_v60 }
  0x8c   : > { %5731 = vset.pattern.permute.xlu1 %v9981_v37  ;;  %v6399_v20 = vadd.s32 136, %v6332_v60  ;;  %v6402_v21 = vadd.s32 144, %v6332_v60  ;;  %v6405_v24 = vadd.s32 152, %v6332_v60  ;;  %v6410_v25 = vadd.s32 160, %v6332_v60 }
  0x8d   : > { %1721 = vperm.xlu0 %5754, %v6237_v6   ;;  %1605 = vperm.xlu1 %5731, %v425_v38   ;;  %v6413_v28 = vadd.s32 168, %v6332_v60  ;;  %v6416_v29 = vadd.s32 176, %v6332_v60  ;;  %v6419_v33 = vadd.s32 184, %v6332_v60  ;;  %v6424_v36 = vadd.s32 192, %v6332_v60 }
  0x8e   : > { %5415 = vmatmul.mubr.msk.f32.gmra.mrb[26].mxu1 %vm558_vm0, %v545_v46  ;;  %v6430_v40 = vadd.s32 208, %v6332_v60  ;;  %v6433_v41 = vadd.s32 216, %v6332_v60  ;;  %v6440_v10 = vadd.s32 224, %v6332_v60  ;;  %v6443_v43 = vadd.s32 232, %v6332_v60 }
  0x8f   : > { %5417 = vmatprep.mubr.msk.f32.mxu1 %vm558_vm0, %v546_v47  ;;  %v6446_v44 = vadd.s32 240, %v6332_v60  ;;  %v6449_v46 = vadd.s32 248, %v6332_v60  ;;  %v6458_v47 = vadd.s32 256, %v6332_v60  ;;  %v6461_v49 = vadd.s32 264, %v6332_v60 }
  0x90   : > { %v6464_v50 = vadd.s32 272, %v6332_v60  ;;  %v6495_v59 = vadd.s32 336, %v6332_v60  ;;  %v6507_v6 = vadd.s32 368, %v6332_v60  ;;  %v6518_v51 = vadd.s32 392, %v6332_v60 }
  0x91   : > { %5761 = vset.pattern.permute.xlu0 %v9977_v2  ;;  %5732 = vset.pattern.permute.xlu1 %v9979_v1  ;;  %v6498_v2 = vadd.s32 344, %v6332_v60  ;;  %v6521_v48 = vadd.s32 400, %v6332_v60  ;;  %v6524_v45 = vadd.s32 408, %v6332_v60  ;;  %v6535_v32 = vadd.s32 424, %v6332_v60 }
  0x92   : > { %1138 = vperm.xlu0 %5761, %v421_v11   ;;  %1993 = vperm.xlu1 %5732, %v425_v38   ;;  %v6383_v11 = vadd.s32 96, %v6332_v60  ;;  %v6538_v34 = vadd.s32 432, %v6332_v60  ;;  %v6544_v30 = vadd.s32 440, %v6332_v60 }
  0x93   : > { %5418 = vmatmul.mubr.msk.f32.gmra.mrb[28].mxu1 %vm558_vm0, %v547_v52  ;;  %v6467_v52 = vadd.s32 280, %v6332_v60  ;;  %10195 = vst [vmem:[#allocation26_spill] sm:$0xff] %v6535_v32  ;;  %v6563_v32 = vadd.s32 %v6541_v31, %v6349_v61  ;;  %v6584_v61 = vadd.s32 %v6541_v31, %v6367_v4  ;;  %v6604_v4 = vadd.s32 %v6541_v31, %v6376_v8 }
  0x94   : > { %10196 = vst [vmem:[#allocation27_spill] sm:$0xff] %v6538_v34  ;;  %10197 = vst [vmem:[#allocation28_spill] sm:$0xff] %v6544_v30  ;;  %v6567_v30 = vadd.s32 %v6541_v31, %v6355_v63  ;;  %v6588_v63 = vadd.s32 %v6541_v31, %v6370_v5  ;;  %v6608_v5 = vadd.s32 %v6541_v31, %v6383_v11 }
  0x95   : > { %10202 = vst [vmem:[#allocation33_spill] sm:$0xff] %v6563_v32  ;;  %10207 = vst [vmem:[#allocation38_spill] sm:$0xff] %v6584_v61  ;;  %v6616_v61 = vadd.s32 456, %v6332_v60  ;;  %v6623_v8 = vadd.s32 %v6541_v31, %v6389_v13  ;;  %v6627_v11 = vadd.s32 %v6541_v31, %v6392_v16  ;;  %v6643_v13 = vadd.s32 %v6541_v31, %v6405_v24 }
  0x96   : > { %1143 = vperm.xlu0 %5761, %v6151_v35   ;;  %1997 = vperm.xlu1 %5732, %v6090_v15   ;;  %v548_v15 = vld [vmem:[%s6059_s13 + $0x1f0] sm:$0xff]  ;;  %s6334_s13 = sld [smem:[#allocation4]]  ;;  %10203 = vst [vmem:[#allocation34_spill] sm:$0xff] %v6567_v30  ;;  %10208 = vst [vmem:[#allocation39_spill] sm:$0xff] %v6588_v63  ;;  %v6612_v63 = vadd.s32 %v6541_v31, %v6386_v12  ;;  %v6631_v12 = vadd.s32 %v6541_v31, %v6396_v17  ;;  %v1846_v32 = vsub.s32 1, %v6332_v60 }
  0x97   : > { %v2430_v35 = vld [vmem:[%s9972_s6 + $0x10] sm:$0xff]  ;;  %5420 = vmatprep.mubr.msk.f32.mxu1 %vm558_vm0, %v548_v15  ;;  %10211 = vst [vmem:[#allocation41_spill] sm:$0xff] %v6604_v4  ;;  %10212 = vst [vmem:[#allocation42_spill] sm:$0xff] %v6608_v5  ;;  %v6648_v16 = vadd.s32 %v6541_v31, %v6410_v25  ;;  %v6652_v17 = vadd.s32 %v6541_v31, %v6413_v28  ;;  %v6668_v25 = vadd.s32 %v6541_v31, %v6424_v36 }
  0x98   : > { %v5643_v57 = vpack.c.bf16 %v2431_v55, %v2430_v35  ;;  %5421 = vmatmul.mubr.msk.f32.gmra.mrb[30].mxu1 %vm558_vm0, %v549_v56  ;;  %v6474_v35 = vld [vmem:[%s6054_s26 + $0x80] sm:$0xff]  ;;  %v6483_v55 = vadd.s32 304, %v6332_v60  ;;  %v6486_v56 = vadd.s32 312, %v6332_v60  ;;  %10213 = vst [vmem:[#allocation43_spill] sm:$0xff] %v6612_v63  ;;  %10214 = vst [vmem:[#allocation44_spill] sm:$0xff] %v6623_v8  ;;  %v6639_v63 = vadd.s32 %v6541_v31, %v6402_v21 }
  0x99   : > { %10190 = vst [vmem:[#allocation22_spill] sm:$0xff] %v6474_v35  ;;  %10215 = vst [vmem:[#allocation45_spill] sm:$0xff] %v6627_v11  ;;  %v6660_v21 = vadd.s32 %v6541_v31, %v6419_v33  ;;  %v6680_v33 = vadd.s32 %v6541_v31, %v6433_v41  ;;  %v3801_v36 = vadd.s32 480, %v6332_v60  ;;  %v6700_v41 = vadd.s32 %v6541_v31, %v6449_v46 }
  0x9a   : > { %1158 = vperm.xlu0 %5761, %v425_v38   ;;  %5733 = vset.pattern.permute.xlu1 %v9981_v37  ;;  %v6427_v38 = vadd.s32 200, %v6332_v60  ;;  %10216 = vst [vmem:[#allocation46_spill] sm:$0xff] %v6631_v12  ;;  %10218 = vst [vmem:[#allocation48_spill] sm:$0xff] %v6639_v63  ;;  %v479_v12 = vld [vmem:[%s6054_s26 + $0x1d0] sm:$0xff] }
  0x9b   : > { %1617 = vperm.xlu1 %5733, %v6102_v19   ;;  %5644 = vmatprep.subr.bf16.mxu1 %v5643_v57  ;;  %10219 = vst [vmem:[#allocation49_spill] sm:$0xff] %v6643_v13  ;;  %10220 = vst [vmem:[#allocation50_spill] sm:$0xff] %v6648_v16 }
  0x9c   : > { %5646 = vmatpush3.bf16.msra.mxu1 %v5643_v57  ;;  %p3872_p4 = scmp.gt.s32.totalorder %s6334_s13, %s6337_s16  ;;  %v6489_v57 = vadd.s32 320, %v6332_v60  ;;  %10221 = vst [vmem:[#allocation51_spill] sm:$0xff] %v6652_v17  ;;  %10223 = vst [vmem:[#allocation53_spill] sm:$0xff] %v6660_v21  ;;  %v6672_v28 = vadd.s32 %v6541_v31, %v6427_v38  ;;  %v3800_v21 = vadd.s32 472, %v6332_v60  ;;  %v6691_v38 = vadd.s32 %v6541_v31, %v6443_v43 }
  0x9d   : > { %10224 = vst [vmem:[#allocation54_spill] sm:$0xff] %v6668_v25  ;;  %10227 = vst [vmem:[#allocation57_spill] sm:$0xff] %v6680_v33  ;;  %v6687_v25 = vadd.s32 %v6541_v31, %v6440_v10  ;;  %v6704_v33 = vadd.s32 %v6541_v31, %v6458_v47  ;;  %v6708_v10 = vadd.s32 %v6541_v31, %v6461_v49 }
  0x9e   : > { %1168 = vperm.xlu0 %5761, %v6073_v9   ;;  %v6343_v9 = vadd.s32 8, %v6332_v60  ;;  %s6437_s24 = scalar_select %p3872_p4, %s6334_s13, %s6337_s16  ;;  %10225 = vst [vmem:[#allocation55_spill] sm:$0xff] %v6672_v28  ;;  %10229 = vst [vmem:[#allocation59_spill] sm:$0xff] %v6691_v38  ;;  %v6713_v43 = vadd.s32 %v6541_v31, %v6464_v50  ;;  %v6736_v50 = vadd.s32 %v6541_v31, %v6483_v55 }
  0x9f   : > { %5734 = vset.pattern.permute.xlu1 %v9979_v1  ;;  %10228 = vst [vmem:[#allocation58_spill] sm:$0xff] %v6687_v25  ;;  %10231 = vst [vmem:[#allocation61_spill] sm:$0xff] %v6700_v41  ;;  %v6754_v55 = vadd.s32 %v6541_v31, %v6495_v59  ;;  %v469_v25 = vld [vmem:[%s6054_s26 + $0x180] sm:$0xff] }
  0xa0   : > { %2005 = vperm.xlu1 %5734, %v6102_v19   ;;  %v6346_v19 = vadd.s32 16, %v6332_v60  ;;  %10232 = vst [vmem:[#allocation62_spill] sm:$0xff] %v6704_v33  ;;  %10233 = vst [vmem:[#allocation63_spill] sm:$0xff] %v6708_v10  ;;  %p5112_p6 = scmp.ge.s32.totalorder %s6437_s24, %s6453_s28 }
  0xa1   : > { %10234 = vst [vmem:[#allocation64_spill] sm:$0xff] %v6713_v43  ;;  %10238 = vst [vmem:[#allocation68_spill] sm:$0xff] %v6736_v50  ;;  %v10280_v50 = vld [vmem:[#allocation13_spill] sm:$0xff] }
  0xa2   : > { %1178 = vperm.xlu0 %5761, %v429_v58   ;;  %v6559_v34 = vadd.s32 %v6541_v31, %v6346_v19  ;;  %10242 = vst [vmem:[#allocation72_spill] sm:$0xff] %v6754_v55 }
  0xa4   : > { %5735 = vset.pattern.permute.xlu1 %v9981_v37  ;;  %v6504_v37 = vadd.s32 360, %v6332_v60  ;;  %10201 = vst [vmem:[#allocation32_spill] sm:$0xff] %v6559_v34 }
  0xa5   : > { %1621 = vperm.xlu1 %5735, %v429_v58  }
  0xa6   : > { %1188 = vperm.xlu0 %5761, %v6087_v14   ;;  %v6364_v14 = vadd.s32 56, %v6332_v60 }
  0xa8   : > { %v6580_v19 = vadd.s32 %v6541_v31, %v6364_v14  ;;  %v6600_v14 = vadd.s32 %v6541_v31, %v6373_v7  ;;  %v6619_v7 = vadd.s32 464, %v6332_v60 }
  0xa9   : > { %5736 = vset.pattern.permute.xlu1 %v9979_v1  ;;  %v6501_v1 = vadd.s32 352, %v6332_v60 }
  0xaa   : > { %1198 = vperm.xlu0 %5761, %v6352_v62   ;;  %2009 = vperm.xlu1 %5736, %v429_v58   ;;  %v6492_v58 = vadd.s32 328, %v6332_v60  ;;  %10206 = vst [vmem:[#allocation37_spill] sm:$0xff] %v6580_v19  ;;  %10210 = vst [vmem:[#allocation40_spill] sm:$0xff] %v6600_v14  ;;  %v481_v14 = vld [vmem:[%s6054_s26 + $0x1e0] sm:$0xff] }
  0xae   : > { %1208 = vperm.xlu0 %5761, %v6099_v18   ;;  %2013 = vperm.xlu1 %5736, %v6114_v23   ;;  %v6477_v18 = vadd.s32 288, %v6332_v60  ;;  %v6480_v23 = vadd.s32 296, %v6332_v60 }
  0xaf   : > { %v6469_v53 = vpop.permute.xlu1 %1148  ;;  %v6471_v15 = vpop.permute.xlu0 %1985 }
  0xb0   : > { %10188 = vst [vmem:[#allocation20_spill] sm:$0xff] %v6469_v53  ;;  %10189 = vst [vmem:[#allocation21_spill] sm:$0xff] %v6471_v15  ;;  %v6510_v15 = vadd.s32 376, %v6332_v60  ;;  %v6515_v53 = vadd.s32 384, %v6332_v60  ;;  %v6721_v46 = vadd.s32 %v6541_v31, %v6477_v18  ;;  %v6725_v47 = vadd.s32 %v6541_v31, %v6480_v23 }
  0xb1   : > { %v6744_v18 = vadd.s32 %v6541_v31, %v6489_v57  ;;  %v6748_v23 = vadd.s32 %v6541_v31, %v6492_v58  ;;  %v6763_v57 = vadd.s32 %v6541_v31, %v6501_v1  ;;  %v6767_v58 = vadd.s32 %v6541_v31, %v6504_v37 }
  0xb2   : > { %1218 = vperm.xlu0 %5761, %v6474_v35   ;;  %5737 = vset.pattern.permute.xlu1 %v10191_v54  ;;  %v6532_v35 = vadd.s32 416, %v6332_v60  ;;  %10236 = vst [vmem:[#allocation66_spill] sm:$0xff] %v6721_v46  ;;  %10237 = vst [vmem:[#allocation67_spill] sm:$0xff] %v6725_v47  ;;  %v3802_v47 = vadd.s32 488, %v6332_v60  ;;  %v3803_v46 = vadd.s32 496, %v6332_v60  ;;  %v6775_v59 = vadd.s32 %v6541_v31, %v6510_v15 }
  0xb3   : > { %v6526_v42 = vpop.permute.xlu1 %1153  ;;  %1633 = vperm.xlu1 %5737, %v6126_v27   ;;  %v6529_v39 = vpop.permute.xlu0 %2001  ;;  %10240 = vst [vmem:[#allocation70_spill] sm:$0xff] %v6744_v18  ;;  %10241 = vst [vmem:[#allocation71_spill] sm:$0xff] %v6748_v23  ;;  %v6771_v23 = vadd.s32 %v6541_v31, %v6507_v6  ;;  %v6782_v1 = vadd.s32 %v6541_v31, %v6515_v53  ;;  %v6786_v37 = vadd.s32 %v6541_v31, %v6518_v51  ;;  %v461_v18 = vld [vmem:[%s6054_s26 + $0x140] sm:$0xff] }
  0xb4   : > { %10192 = vst [vmem:[#allocation23_spill] sm:$0xff] %v6526_v42  ;;  %10193 = vst [vmem:[#allocation24_spill] sm:$0xff] %v6529_v39  ;;  %v6547_v42 = vadd.s32 448, %v6332_v60  ;;  %v6551_v39 = vadd.s32 %v6541_v31, %v6332_v60  ;;  %v6790_v6 = vadd.s32 %v6541_v31, %v6521_v48 }
  0xb5   : > { %10194 = vst [vmem:[#allocation25_spill] sm:$0xff] %v6532_v35  ;;  %v6555_v35 = vadd.s32 %v6541_v31, %v6343_v9  ;;  %v6576_v9 = vadd.s32 %v6541_v31, %v6361_v3  ;;  %v6596_v3 = vld [vmem:[%s6054_s26 + $0xa0] sm:$0xff]  ;;  %10244 = vst [vmem:[#allocation74_spill] sm:$0xff] %v6763_v57 }
  0xb6   : > { %10198 = vst [vmem:[#allocation29_spill] sm:$0xff] %v6547_v42  ;;  %10199 = vst [vmem:[#allocation30_spill] sm:$0xff] %v6551_v39  ;;  %v6571_v42 = vadd.s32 %v6541_v31, %v6358_v0  ;;  %1228 = vperm.xlu0 %5761, %v6111_v22  }
  0xb7   : > { %10200 = vst [vmem:[#allocation31_spill] sm:$0xff] %v6555_v35  ;;  %10205 = vst [vmem:[#allocation36_spill] sm:$0xff] %v6576_v9  ;;  %v6590_v0 = vpop.permute.xlu1 %1163  ;;  %v6593_v22 = vpop.permute.xlu0 %2017  ;;  %v485_v9 = vld [vmem:[%s9970_s4] sm:$0x7] }
  0xb8   : > { %10204 = vst [vmem:[#allocation35_spill] sm:$0xff] %v6571_v42  ;;  %v10209_v42 = vmov 2   ;;  %10245 = vst [vmem:[#allocation75_spill] sm:$0xff] %v6767_v58 }
  0xb9   : > { %5738 = vset.pattern.permute.xlu1 %v10209_v42  ;;  %10246 = vst [vmem:[#allocation76_spill] sm:$0xff] %v6771_v23  ;;  %10247 = vst [vmem:[#allocation77_spill] sm:$0xff] %v6775_v59 }
  0xba   : > { %2021 = vperm.xlu1 %5738, %v6126_v27   ;;  %v6635_v27 = vadd.s32 %v6541_v31, %v6399_v20  ;;  %1238 = vperm.xlu0 %5761, %v6596_v3   ;;  %v6656_v20 = vadd.s32 %v6541_v31, %v6416_v29  ;;  %v6676_v29 = vadd.s32 %v6541_v31, %v6430_v40 }
  0xbb   : > { %v6662_v24 = vpop.permute.xlu1 %1173  ;;  %v6664_v13 = vpop.permute.xlu0 %2033  ;;  %v6696_v40 = vadd.s32 %v6541_v31, %v6446_v44  ;;  %v6717_v44 = vadd.s32 %v6541_v31, %v6467_v52  ;;  %v6740_v52 = vadd.s32 %v6541_v31, %v6486_v56  ;;  %v6758_v56 = vadd.s32 %v6541_v31, %v6498_v2  ;;  %10248 = vst [vmem:[#allocation78_spill] sm:$0xff] %v6782_v1  ;;  %v10254_v1 = vld [vmem:[#allocation26_spill] sm:$0xff] }
  0xbc   : > { %10217 = vst [vmem:[#allocation47_spill] sm:$0xff] %v6635_v27  ;;  %10222 = vst [vmem:[#allocation52_spill] sm:$0xff] %v6656_v20  ;;  %v3804_v2 = vadd.s32 504, %v6332_v60  ;;  %v10252_v23 = vld [vmem:[#allocation25_spill] sm:$0xff]  ;;  %v6806_v51 = vadd.s32 %v6541_v31, %v10254_v1  ;;  %v6826_v1 = vadd.s32 %v6541_v31, %v6619_v7  ;;  %v10285_v20 = vld [vmem:[#allocation14_spill] sm:$0xff] }
  0xbd   : > { %10226 = vst [vmem:[#allocation56_spill] sm:$0xff] %v6676_v29  ;;  %10230 = vst [vmem:[#allocation60_spill] sm:$0xff] %v6696_v40  ;;  %v6802_v53 = vadd.s32 %v6541_v31, %v10252_v23  ;;  %v10260_v57 = vld [vmem:[#allocation29_spill] sm:$0xff]  ;;  %v6822_v23 = vadd.s32 %v6541_v31, %v6616_v61  ;;  %v6840_v61 = vadd.s32 %v6541_v31, %v3803_v46 }
  0xbe   : > { %5739 = vset.pattern.permute.xlu1 %v10191_v54  ;;  %1248 = vperm.xlu0 %5761, %v6123_v26   ;;  %10235 = vst [vmem:[#allocation65_spill] sm:$0xff] %v6717_v44  ;;  %v6732_v26 = vld [vmem:[%s6054_s26 + $0xc0] sm:$0xff]  ;;  %10239 = vst [vmem:[#allocation69_spill] sm:$0xff] %v6740_v52  ;;  %v6843_v7 = vadd.s32 %v6541_v31, %v3804_v2  ;;  %v463_v44 = vld [vmem:[%s6054_s26 + $0x150] sm:$0xff] }
  0xbf   : > { %1637 = vperm.xlu1 %5739, %v6352_v62   ;;  %v6727_v49 = vpop.permute.xlu1 %1183  ;;  %v6729_v10 = vpop.permute.xlu0 %2049  ;;  %10243 = vst [vmem:[#allocation73_spill] sm:$0xff] %v6758_v56  ;;  %10249 = vst [vmem:[#allocation79_spill] sm:$0xff] %v6786_v37  ;;  %v10256_v37 = vld [vmem:[#allocation27_spill] sm:$0xff]  ;;  %v10277_v56 = vld [vmem:[#allocation12_spill] sm:$0xff] }
  0xc0   : > { %10250 = vst [vmem:[#allocation80_spill] sm:$0xff] %v6790_v6  ;;  %10253 = vst [vmem:[#allocation25_spill] sm:$0xff] %v6802_v53  ;;  %v6810_v48 = vadd.s32 %v6541_v31, %v10256_v37  ;;  %v10258_v6 = vld [vmem:[#allocation28_spill] sm:$0xff]  ;;  %v6832_v37 = vadd.s32 %v6541_v31, %v3801_v36  ;;  %v6893_v53 = vld [vmem:[%s6054_s26 + $0x130] sm:$0xff] }
  0xc1   : > { %10255 = vst [vmem:[#allocation26_spill] sm:$0xff] %v6806_v51  ;;  %v6814_v58 = vadd.s32 %v6541_v31, %v10258_v6  ;;  %10262 = vst [vmem:[#allocation82_spill] sm:$0xff] %v6822_v23  ;;  %v6829_v51 = vadd.s32 %v6541_v31, %v3800_v21  ;;  %v10266_v6 = vld [vmem:[#allocation9_spill] sm:$0xff]  ;;  %v6850_v36 = vld [vmem:[%s6054_s26 + $0xe0] sm:$0xff] }
  0xc2   : > { %1258 = vperm.xlu0 %5761, %v6732_v26   ;;  %10257 = vst [vmem:[#allocation27_spill] sm:$0xff] %v6810_v48  ;;  %10263 = vst [vmem:[#allocation83_spill] sm:$0xff] %v6826_v1  ;;  %v467_v40 = vld [vmem:[%s6054_s26 + $0x170] sm:$0xff] }
  0xc3   : > { %5740 = vset.pattern.permute.xlu1 %v10209_v42  ;;  %v6792_v15 = vpop.permute.xlu1 %1193  ;;  %v6794_v59 = vpop.permute.xlu0 %2065  ;;  %10259 = vst [vmem:[#allocation28_spill] sm:$0xff] %v6814_v58  ;;  %10264 = vst [vmem:[#allocation84_spill] sm:$0xff] %v6829_v51  ;;  %v10267_v58 = vld [vmem:[#allocation10_spill] sm:$0xff] }
  0xc4   : > { %2025 = vperm.xlu1 %5740, %v6352_v62   ;;  %v6798_v62 = vadd.s32 %v6541_v31, %v6524_v45  ;;  %v6818_v45 = vadd.s32 %v6541_v31, %v10260_v57  ;;  %10265 = vst [vmem:[#allocation85_spill] sm:$0xff] %v6832_v37  ;;  %v6837_v57 = vadd.s32 %v6541_v31, %v3802_v47  ;;  %10269 = vst [vmem:[#allocation10_spill] sm:$0xff] %v6840_v61  ;;  %v10272_v47 = vld [vmem:[#allocation11_spill] sm:$0xff]  ;;  %v10274_v51 = vld [vmem:[#allocation22_spill] sm:$0xff] }
  0xc5   : > { %10270 = vst [vmem:[#allocation86_spill] sm:$0xff] %v6843_v7  ;;  %v10273_v31 = vld [vmem:[#allocation19_spill] sm:$0xff] }
  0xc6   : > { %10251 = vst [vmem:[#allocation81_spill] sm:$0xff] %v6798_v62  ;;  %10261 = vst [vmem:[#allocation29_spill] sm:$0xff] %v6818_v45  ;;  %1268 = vperm.xlu0 %5761, %v10266_v6   ;;  %v6864_v6 = vld [vmem:[%s6054_s26 + $0x100] sm:$0xff] }
  0xc7   : > { %10268 = vst [vmem:[#allocation9_spill] sm:$0xff] %v6837_v57  ;;  %v6845_v1 = vpop.permute.xlu1 %1203  ;;  %v6847_v21 = vpop.permute.xlu0 %2081  ;;  %v6873_v57 = vld [vmem:[%s6054_s26 + $0x110] sm:$0xff]  ;;  %v6883_v45 = vld [vmem:[%s6054_s26 + $0x120] sm:$0xff] }
  0xc8   : > { %2029 = vperm.xlu1 %5740, %v10267_v58   ;;  %10271 = vst [vmem:[#allocation87_spill] sm:$0xff] %v6847_v21 }
  0xca   : > { %1278 = vperm.xlu0 %5761, %v6850_v36  }
  0xcb   : > { %v6854_v58 = vpop.permute.xlu1 %1213 }
  0xcc   : > { %5741 = vset.pattern.permute.xlu1 %v10191_v54  ;;  %v6857_v46 = vpop.permute.xlu0 %1593 }
  0xcd   : > { %1649 = vperm.xlu1 %5741, %v10272_v47  }
  0xce   : > { %1288 = vperm.xlu0 %5761, %v10273_v31  }
  0xcf   : > { %v6860_v2 = vpop.permute.xlu1 %1223 }
  0xd0   : > { %v6866_v7 = vpop.permute.xlu0 %1597 }
  0xd1   : > { %5742 = vset.pattern.permute.xlu1 %v10209_v42 }
  0xd2   : > { %2037 = vperm.xlu1 %5742, %v10272_v47   ;;  %1298 = vperm.xlu0 %5761, %v6864_v6  }
  0xd3   : > { %v6870_v61 = vpop.permute.xlu1 %1233 }
  0xd4   : > { %v6875_v37 = vpop.permute.xlu0 %1609 }
  0xd6   : > { %5743 = vset.pattern.permute.xlu1 %v10191_v54  ;;  %1308 = vperm.xlu0 %5761, %v6873_v57  }
  0xd7   : > { %1653 = vperm.xlu1 %5743, %v10274_v51   ;;  %v6880_v23 = vpop.permute.xlu1 %1243 }
  0xd8   : > { %10275 = vst [vmem:[#allocation11_spill] sm:$0xff] %v6880_v23  ;;  %v6885_v47 = vpop.permute.xlu0 %1613 }
  0xda   : > { %1318 = vperm.xlu0 %5761, %v6883_v45  }
  0xdb   : > { %5744 = vset.pattern.permute.xlu1 %v10209_v42  ;;  %v6890_v48 = vpop.permute.xlu1 %1253 }
  0xdc   : > { %2041 = vperm.xlu1 %5744, %v10274_v51   ;;  %10276 = vst [vmem:[#allocation19_spill] sm:$0xff] %v6890_v48  ;;  %v6895_v62 = vpop.permute.xlu0 %1625 }
  0xde   : > { %1328 = vperm.xlu0 %5761, %v6893_v53  }
  0xdf   : > { %v6899_v55 = vpop.permute.xlu1 %1263 }
  0xe0   : > { %2045 = vperm.xlu1 %5744, %v10277_v56   ;;  %10278 = vst [vmem:[#allocation22_spill] sm:$0xff] %v6899_v55  ;;  %v6902_v52 = vpop.permute.xlu0 %1629  ;;  %v465_v56 = vld [vmem:[%s6054_s26 + $0x160] sm:$0xff] }
  0xe2   : > { %1338 = vperm.xlu0 %5761, %v461_v18  }
  0xe3   : > { %v6905_v51 = vpop.permute.xlu1 %1273 }
  0xe4   : > { %5745 = vset.pattern.permute.xlu1 %v10191_v54  ;;  %10279 = vst [vmem:[#allocation12_spill] sm:$0xff] %v6905_v51  ;;  %v6909_v43 = vpop.permute.xlu0 %1641 }
  0xe5   : > { %1665 = vperm.xlu1 %5745, %v10280_v50  }
  0xe6   : > { %1348 = vperm.xlu0 %5761, %v463_v44  }
  0xe7   : > { %v6911_v33 = vpop.permute.xlu1 %1283 }
  0xe8   : > { %10281 = vst [vmem:[#allocation13_spill] sm:$0xff] %v6911_v33  ;;  %v6915_v41 = vpop.permute.xlu0 %1645  ;;  %v6991_v33 = vrot.slane %v485_v9, %v1846_v32 }
  0xe9   : > { %5746 = vset.pattern.permute.xlu1 %v10209_v42 }
  0xea   : > { %2053 = vperm.xlu1 %5746, %v10280_v50   ;;  %1358 = vperm.xlu0 %5761, %v465_v56   ;;  %v471_v50 = vld [vmem:[%s6054_s26 + $0x190] sm:$0xff]  ;;  %v1850_v32 = vmul.f32 %v6991_v33, %v6866_v7 }
  0xeb   : > { %v6918_v18 = vpop.permute.xlu1 %1293 }
  0xec   : > { %10282 = vst [vmem:[#allocation88_spill] sm:$0xff] %v6918_v18  ;;  %v6921_v38 = vpop.permute.xlu0 %1657  ;;  %v6987_v18 = vld [vmem:[%s9971_s5] ss:$0 sm:$0xff] }
  0xee   : > { %5747 = vset.pattern.permute.xlu1 %v10191_v54  ;;  %1368 = vperm.xlu0 %5761, %v467_v40   ;;  %v473_v40 = vld [vmem:[%s6054_s26 + $0x1a0] sm:$0xff] }
  0xef   : > { %1669 = vperm.xlu1 %5747, %v6596_v3   ;;  %v6925_v44 = vpop.permute.xlu1 %1303 }
  0xf0   : > { %10283 = vst [vmem:[#allocation89_spill] sm:$0xff] %v6925_v44  ;;  %v6928_v29 = vpop.permute.xlu0 %1661  ;;  %v2234_v44 = vsub.s32 2, %v6332_v60 }
  0xf2   : > { %1378 = vperm.xlu0 %5761, %v469_v25   ;;  %v10286_v25 = vld [vmem:[#allocation15_spill] sm:$0xff] }
  0xf3   : > { %5748 = vset.pattern.permute.xlu1 %v10209_v42 }
  0xf4   : > { %2057 = vperm.xlu1 %5748, %v6596_v3   ;;  %v6933_v56 = vpop.permute.xlu0 %1673  ;;  %v6935_v28 = vpop.permute.xlu1 %1589  ;;  %v475_v3 = vld [vmem:[%s6054_s26 + $0x1b0] sm:$0xff] }
  0xf5   : > { %10284 = vst [vmem:[#allocation90_spill] sm:$0xff] %v6933_v56 }
  0xf6   : > { %1388 = vperm.xlu0 %5761, %v471_v50  }
  0xf8   : > { %2061 = vperm.xlu1 %5748, %v10285_v20   ;;  %v6939_v17 = vpop.permute.xlu0 %1677  ;;  %v477_v20 = vld [vmem:[%s6054_s26 + $0x1c0] sm:$0xff] }
  0xf9   : > { %v6941_v16 = vpop.permute.xlu1 %1977 }
  0xfa   : > { %1398 = vperm.xlu0 %5761, %v473_v40  }
  0xfc   : > { %5749 = vset.pattern.permute.xlu1 %v10191_v54  ;;  %v6946_v63 = vpop.permute.xlu0 %1689 }
  0xfd   : > { %1681 = vperm.xlu1 %5749, %v10286_v25   ;;  %10287 = vst [vmem:[#allocation14_spill] sm:$0xff] %v6946_v63  ;;  %v6948_v27 = vpop.permute.xlu1 %1981 }
  0xfe   : > { %1408 = vperm.xlu0 %5761, %v475_v3  }
 0x100   : > { %v6952_v50 = vpop.permute.xlu0 %1693 }
 0x101   : > { %5750 = vset.pattern.permute.xlu1 %v10209_v42  ;;  %10288 = vst [vmem:[#allocation15_spill] sm:$0xff] %v6952_v50  ;;  %v1849_v50 = vmul.f32 %v6991_v33, %v6857_v46  ;;  %v10298_v46 = vld [vmem:[#allocation18_spill] sm:$0xff] }
 0x102   : > { %2069 = vperm.xlu1 %5750, %v10286_v25   ;;  %1418 = vperm.xlu0 %5761, %v477_v20   ;;  %v6955_v40 = vpop.permute.xlu1 %1601  ;;  %v1458_v20 = vsub.s32 0, %v6332_v60  ;;  %v6996_v60 = vrot.slane %v485_v9, %v2234_v44  ;;  %v10296_v44 = vld [vmem:[#allocation23_spill] sm:$0xff] }
 0x104   : > { %v6958_v11 = vpop.permute.xlu0 %1705  ;;  %v6981_v39 = vrot.slane %v485_v9, %v1458_v20  ;;  %v10294_v20 = vld [vmem:[#allocation20_spill] sm:$0xff]  ;;  %v10295_v9 = vld [vmem:[#allocation17_spill] sm:$0xff]  ;;  %v2236_v7 = vmul.f32 %v6996_v60, %v6941_v16 }
 0x105   : > { %10289 = vst [vmem:[#allocation91_spill] sm:$0xff] %v6958_v11  ;;  %v6961_v8 = vpop.f32.mrb[0].mxu1  ;;  %v5329_v3 = vpop.f32.mrb[0].mxu0 }
 0x106   : > { %5751 = vset.pattern.permute.xlu1 %v10191_v54  ;;  %10290 = vst [vmem:[#allocation92_spill] sm:$0xff] %v6961_v8  ;;  %1428 = vperm.xlu0 %5761, %v479_v12   ;;  %v817_v5 = vpop.f32.mrb[1].mxu0  ;;  %v483_v12 = vld [vmem:[%s6054_s26 + $0x1f0] sm:$0xff]  ;;  %v1465_v16 = vmul.f32 %v6981_v39, %v6590_v0 }
 0x107   : > { %1685 = vperm.xlu1 %5751, %v6732_v26   ;;  %v6964_v4 = vpop.permute.xlu1 %1989 }
 0x108   : > { %v6967_v25 = vpop.permute.xlu0 %1709 }
 0x109   : > { %10291 = vst [vmem:[#allocation93_spill] sm:$0xff] %v6967_v25  ;;  %v5332_v19 = vpop.f32.mrb[2].mxu0  ;;  %v1462_v25 = vmul.f32 %v6981_v39, %v10294_v20 }
 0x10a   : > { %v827_v30 = vpop.f32.mrb[3].mxu0  ;;  %1438 = vperm.xlu0 %5761, %v481_v14   ;;  %v10293_v14 = vld [vmem:[#allocation16_spill] sm:$0xff]  ;;  %v833_v21 = vadd.f32 %v5332_v19, %v6987_v18  ;;  %v1463_v19 = vmul.f32 %v6981_v39, %v10296_v44 }
 0x10b   : > { %5752 = vset.pattern.permute.xlu1 %v10209_v42  ;;  %v828_v11 = vadd.f32 %v6987_v18, %v827_v30 }
 0x10c   : > { %2073 = vperm.xlu1 %5752, %v6732_v26   ;;  %v6977_v34 = vpop.permute.xlu0 %1721  ;;  %v6979_v35 = vpop.permute.xlu1 %1605 }
 0x10d   : > { %10292 = vst [vmem:[#allocation94_spill] sm:$0xff] %v6977_v34  ;;  %v5335_v8 = vpop.f32.mrb[4].mxu0  ;;  %v818_v34 = vadd.f32 %v6987_v18, %v817_v5  ;;  %v1526_v5 = vadd.f32 %v1462_v25, %v828_v11  ;;  %v1527_v25 = vadd.f32 %v1463_v19, %v833_v21 }
 0x10e   : > { %1448 = vperm.xlu0 %5761, %v483_v12   ;;  %v837_v26 = vpop.f32.mrb[5].mxu0  ;;  %v843_v48 = vadd.f32 %v5335_v8, %v6987_v18  ;;  %v1851_v8 = vmul.f32 %v6991_v33, %v6955_v40 }
 0x110   : > { %2077 = vperm.xlu1 %5752, %v10293_v14   ;;  %v823_v14 = vadd.f32 %v5329_v3, %v6987_v18  ;;  %v10297_v3 = vld [vmem:[#allocation21_spill] sm:$0xff]  ;;  %v1915_v0 = vadd.f32 %v1851_v8, %v1527_v25 }
 0x111   : > { %v5338_v51 = vpop.f32.mrb[6].mxu0  ;;  %v1139_v63 = vpop.permute.xlu0 %1138 }
 0x112   : > { %v1460_v12 = vmul.f32 %v6981_v39, %v1139_v63  ;;  %v7000_v55 = vpop.permute.xlu1 %1993  ;;  %5804 = vset.pattern.permute.xlu0 %v10209_v42  ;;  %v847_v30 = vpop.f32.mrb[7].mxu0  ;;  %v1848_v63 = vmul.f32 %v6991_v33, %v6935_v28  ;;  %v853_v25 = vadd.f32 %v5338_v51, %v6987_v18 }
 0x113   : > { %2097 = vperm.xlu0 %5804, %v10273_v31  }
 0x114   : > { %5753 = vset.pattern.permute.xlu1 %v10191_v54  ;;  %v1524_v20 = vadd.f32 %v1460_v12, %v818_v34  ;;  %v2238_v34 = vmul.f32 %v6996_v60, %v10297_v3  ;;  %v1914_v12 = vadd.f32 %v1850_v32, %v1526_v5  ;;  %v2237_v32 = vmul.f32 %v6996_v60, %v6948_v27 }
 0x115   : > { %1697 = vperm.xlu1 %5753, %v10295_v9   ;;  %v7017_v11 = vpop.f32.mrb[8].mxu0  ;;  %v1144_v31 = vpop.permute.xlu0 %1143  ;;  %v838_v5 = vadd.f32 %v6987_v18, %v837_v26  ;;  %v1529_v3 = vadd.f32 %v1465_v16, %v843_v48  ;;  %v2239_v27 = vmul.f32 %v6996_v60, %v6964_v4  ;;  %v848_v48 = vadd.f32 %v6987_v18, %v847_v30 }
 0x116   : > { %v1912_v56 = vadd.f32 %v1848_v63, %v1524_v20  ;;  %v1461_v44 = vmul.f32 %v6981_v39, %v1144_v31  ;;  %v1998_v23 = vpop.permute.xlu1 %1997  ;;  %v7021_v28 = vpop.f32.mrb[9].mxu0  ;;  %v1853_v63 = vmul.f32 %v6991_v33, %v6875_v37  ;;  %v1467_v37 = vmul.f32 %v6981_v39, %v6662_v24 }
 0x117   : > { %2109 = vperm.xlu0 %5804, %v10298_v46   ;;  %v1854_v24 = vmul.f32 %v6991_v33, %v6885_v47  ;;  %v1852_v4 = vmul.f32 %v6991_v33, %v6979_v35  ;;  %v2303_v30 = vadd.f32 %v2239_v27, %v1915_v0  ;;  %v2240_v35 = vmul.f32 %v6996_v60, %v7000_v55 }
 0x118   : > { %v2300_v21 = vadd.f32 %v2236_v7, %v1912_v56  ;;  %v1525_v19 = vadd.f32 %v1461_v44, %v823_v14  ;;  %v7040_v7 = vld [vmem:[%s6054_s26 + $0x118] sm:$0xff]  ;;  %v2241_v44 = vmul.f32 %v6996_v60, %v1998_v23  ;;  %v1917_v16 = vadd.f32 %v1853_v63, %v1529_v3 }
 0x119   : > { %5755 = vset.pattern.permute.xlu1 %v10209_v42  ;;  %v7037_v20 = vpop.f32.mrb[10].mxu0  ;;  %v1159_v31 = vpop.permute.xlu0 %1158  ;;  %v1531_v0 = vadd.f32 %v1467_v37, %v853_v25  ;;  %v7084_v25 = vld [vmem:[%s6054_s26 + $0x138] sm:$0xff] }
 0x11a   : > { %2085 = vperm.xlu1 %5755, %v10295_v9   ;;  %v2364_v40 = vmax.f32 %v2300_v21, 0.0  ;;  %v1913_v46 = vadd.f32 %v1849_v50, %v1525_v19  ;;  %v1618_v56 = vpop.permute.xlu1 %1617  ;;  %v867_v14 = vpop.f32.mrb[11].mxu0  ;;  %v2302_v9 = vadd.f32 %v2238_v34, %v1914_v12  ;;  %v1464_v26 = vmul.f32 %v6981_v39, %v1159_v31 }
 0x11b   : > { %2117 = vperm.xlu0 %5804, %v7040_v7  }
 0x11c   : > { %v2301_v50 = vadd.f32 %v2237_v32, %v1913_v46  ;;  %5431 = vmatprep.mubr.msk.f32.mxu1 %vm2439_vm1, %v2364_v40  ;;  %v1528_v34 = vadd.f32 %v1464_v26, %v838_v5  ;;  %v7064_v32 = vld [vmem:[%s6054_s26 + $0x128] sm:$0xff]  ;;  %v2366_v47 = vmax.f32 %v2302_v9, 0.0  ;;  %v1855_v5 = vmul.f32 %v6991_v33, %v1618_v56 }
 0x11d   : > { %v7057_v12 = vpop.f32.mrb[12].mxu0  ;;  %v1169_v51 = vpop.permute.xlu0 %1168  ;;  %v10299_v40 = vld [vmem:[#allocation24_spill] sm:$0xff]  ;;  %v2305_v46 = vadd.f32 %v2241_v44, %v1917_v16  ;;  %v2367_v56 = vmax.f32 %v2303_v30, 0.0 }
 0x11e   : > { %5756 = vset.pattern.permute.xlu1 %v10191_v54  ;;  %v2365_v8 = vmax.f32 %v2301_v50, 0.0  ;;  %v1466_v21 = vmul.f32 %v6981_v39, %v1169_v51  ;;  %v7061_v19 = vpop.f32.mrb[13].mxu0  ;;  %v1916_v23 = vadd.f32 %v1852_v4, %v1528_v34  ;;  %v2242_v63 = vmul.f32 %v6996_v60, %v10299_v40 }
 0x11f   : > { %1701 = vperm.xlu1 %5756, %v6850_v36   ;;  %v2006_v31 = vpop.permute.xlu1 %2005  ;;  %2125 = vperm.xlu0 %5804, %v7064_v32   ;;  %v858_v50 = vadd.f32 %v6987_v18, %v7021_v28  ;;  %v1919_v44 = vadd.f32 %v1855_v5, %v1531_v0  ;;  %v868_v51 = vadd.f32 %v6987_v18, %v867_v14 }
 0x120   : > { %v1530_v3 = vadd.f32 %v1466_v21, %v848_v48  ;;  %5432 = vmatmul.mubr.msk.f32.vlgmr.msra.gmra.mrb[32].mxu1 %vm2439_vm1, %v2365_v8  ;;  %v2304_v27 = vadd.f32 %v2240_v35, %v1916_v23  ;;  %v2243_v9 = vmul.f32 %v6996_v60, %v2006_v31  ;;  %v863_v28 = vadd.f32 %v7017_v11, %v6987_v18  ;;  %v5809_v31 = vld [vmem:[%s6054_s26 + $0xe8] sm:$0xff] }
 0x121   : > { %v7074_v26 = vpop.f32.mrb[14].mxu0  ;;  %5434 = vmatprep.mubr.msk.f32.mxu1 %vm2439_vm1, %v2366_v47  ;;  %v1179_v55 = vpop.permute.xlu0 %1178  ;;  %v1469_v11 = vmul.f32 %v6981_v39, %v6727_v49  ;;  %v2246_v0 = vmul.f32 %v6996_v60, %v6593_v22  ;;  %v7121_v22 = vld [vmem:[%s6054_s26 + $0x158] sm:$0xff] }
 0x122   : > { %v1918_v4 = vadd.f32 %v1854_v24, %v1530_v3  ;;  %v7081_v37 = vpop.f32.mrb[15].mxu0  ;;  %v2368_v48 = vmax.f32 %v2304_v27, 0.0  ;;  %v1468_v34 = vmul.f32 %v6981_v39, %v1179_v55  ;;  %v2369_v24 = vmax.f32 %v2305_v46, 0.0 }
 0x123   : > { %5757 = vset.pattern.permute.xlu1 %v10209_v42  ;;  %2133 = vperm.xlu0 %5804, %v7084_v25   ;;  %v2307_v8 = vadd.f32 %v2243_v9, %v1919_v44  ;;  %v1857_v3 = vmul.f32 %v6991_v33, %v6895_v62  ;;  %v1533_v46 = vadd.f32 %v1469_v11, %v863_v28  ;;  %v5810_v62 = vld [vmem:[%s6054_s26 + $0xf8] sm:$0xff] }
 0x124   : > { %2089 = vperm.xlu1 %5757, %v6850_v36   ;;  %v2306_v30 = vadd.f32 %v2242_v63, %v1918_v4  ;;  %v1622_v16 = vpop.permute.xlu1 %1621  ;;  %5435 = vmatmul.mubr.msk.f32.gmra.mrb[34].mxu1 %vm2439_vm1, %v2367_v56  ;;  %v1858_v36 = vmul.f32 %v6991_v33, %v6902_v52  ;;  %v1532_v14 = vadd.f32 %v1468_v34, %v858_v50  ;;  %v7103_v52 = vld [vmem:[%s6054_s26 + $0x148] sm:$0xff] }
 0x125   : > { %v7094_v21 = vpop.f32.mrb[16].mxu0  ;;  %5437 = vmatprep.mubr.msk.f32.mxu1 %vm2439_vm1, %v2368_v48  ;;  %v1189_v47 = vpop.permute.xlu0 %1188  ;;  %v1856_v23 = vmul.f32 %v6991_v33, %v1622_v16  ;;  %v2371_v49 = vmax.f32 %v2307_v8, 0.0  ;;  %v1921_v16 = vadd.f32 %v1857_v3, %v1533_v46 }
 0x126   : > { %v2370_v35 = vmax.f32 %v2306_v30, 0.0  ;;  %v1470_v5 = vmul.f32 %v6981_v39, %v1189_v47  ;;  %v7100_v40 = vpop.f32.mrb[17].mxu0  ;;  %v7132_v47 = vld [vmem:[%s6054_s26 + $0x168] sm:$0xff]  ;;  %v7148_v46 = vpop.f32.mrb[1].mxu1 }
 0x127   : > { %2141 = vperm.xlu0 %5804, %v7103_v52   ;;  %v1920_v55 = vadd.f32 %v1856_v23, %v1532_v14 }
 0x128   : > { %2093 = vperm.xlu1 %5757, %v5809_v31   ;;  %v1534_v63 = vadd.f32 %v1470_v5, %v868_v51  ;;  %5438 = vmatmul.mubr.msk.f32.gmra.mrb[36].mxu1 %vm2439_vm1, %v2369_v24  ;;  %v873_v5 = vadd.f32 %v7037_v20, %v6987_v18 }
 0x129   : > { %v7113_v27 = vpop.f32.mrb[18].mxu0  ;;  %v2010_v9 = vpop.permute.xlu1 %2009  ;;  %5440 = vmatprep.mubr.msk.f32.mxu1 %vm2439_vm1, %v2370_v35 }
 0x12a   : > { %v1922_v56 = vadd.f32 %v1858_v36, %v1534_v63  ;;  %v2244_v50 = vmul.f32 %v6996_v60, %v2010_v9  ;;  %v1199_v4 = vpop.permute.xlu0 %1198  ;;  %v7118_v48 = vpop.f32.mrb[19].mxu0  ;;  %v1471_v9 = vmul.f32 %v6981_v39, %v6792_v15 }
 0x12b   : > { %2149 = vperm.xlu0 %5804, %v7121_v22  }
 0x12c   : > { %5758 = vset.pattern.permute.xlu1 %v10191_v54  ;;  %v2308_v44 = vadd.f32 %v2244_v50, %v1920_v55  ;;  %5441 = vmatmul.mubr.msk.f32.gmra.mrb[38].mxu1 %vm2439_vm1, %v2371_v49  ;;  %v2310_v34 = vadd.f32 %v2246_v0, %v1922_v56  ;;  %v7144_v0 = vld [vmem:[%s6054_s26 + $0x178] sm:$0xff]  ;;  %v1535_v55 = vadd.f32 %v1471_v9, %v873_v5 }
 0x12d   : > { %1713 = vperm.xlu1 %5758, %v5810_v62   ;;  %v7126_v51 = vpop.f32.mrb[20].mxu0  ;;  %v2014_v30 = vpop.permute.xlu1 %2013  ;;  %10300 = vst [vmem:[#allocation16_spill] sm:$0xff] %v7144_v0 }
 0x12e   : > { %v2372_v36 = vmax.f32 %v2308_v44, 0.0  ;;  %v2245_v28 = vmul.f32 %v6996_v60, %v2014_v30  ;;  %v1209_v24 = vpop.permute.xlu0 %1208  ;;  %v7129_v8 = vpop.f32.mrb[21].mxu0  ;;  %v2374_v14 = vmax.f32 %v2310_v34, 0.0  ;;  %v888_v34 = vadd.f32 %v6987_v18, %v7081_v37 }
 0x12f   : > { %2157 = vperm.xlu0 %5804, %v7132_v47   ;;  %v1474_v30 = vmul.f32 %v6981_v39, %v1209_v24  ;;  %v1862_v24 = vmul.f32 %v6991_v33, %v6915_v41  ;;  %v7193_v41 = vpop.f32.mrb[2].mxu1 }
 0x130   : > { %v2309_v35 = vadd.f32 %v2245_v28, %v1921_v16  ;;  %5443 = vmatprep.mubr.msk.f32.mxu1 %vm2439_vm1, %v2372_v36  ;;  %v878_v36 = vadd.f32 %v6987_v18, %v7061_v19  ;;  %v1472_v28 = vmul.f32 %v6981_v39, %v1199_v4  ;;  %v883_v19 = vadd.f32 %v7057_v12, %v6987_v18 }
 0x131   : > { %5759 = vset.pattern.permute.xlu1 %v10209_v42  ;;  %v7137_v23 = vpop.f32.mrb[22].mxu0  ;;  %10302 = vst [vmem:[#allocation20_spill] sm:$0xff] %v7193_v41  ;;  %v2250_v12 = vmul.f32 %v6996_v60, %v6664_v13  ;;  %v7209_v13 = vld [vmem:[%s6054_s26 + $0x188] sm:$0xff] }
 0x132   : > { %2101 = vperm.xlu1 %5759, %v5810_v62   ;;  %v2373_v31 = vmax.f32 %v2309_v35, 0.0  ;;  %v7141_v11 = vpop.permute.xlu0 %1218  ;;  %v1634_v63 = vpop.permute.xlu1 %1633 }
 0x133   : > { %v7146_v3 = vpop.f32.mrb[23].mxu0  ;;  %2165 = vperm.xlu0 %5804, %v7144_v0   ;;  %v1859_v49 = vmul.f32 %v6991_v33, %v1634_v63  ;;  %v1538_v63 = vadd.f32 %v1474_v30, %v888_v34 }
 0x134   : > { %5444 = vmatmul.mubr.msk.f32.gmra.mrb[40].mxu1 %vm2439_vm1, %v2373_v31 }
 0x135   : > { %v7156_v20 = vpop.f32.mrb[24].mxu0  ;;  %5446 = vmatprep.mubr.msk.f32.mxu1 %vm2439_vm1, %v2374_v14  ;;  %v1923_v44 = vadd.f32 %v1859_v49, %v1535_v55  ;;  %v1536_v49 = vadd.f32 %v1472_v28, %v878_v36  ;;  %v1861_v36 = vmul.f32 %v6991_v33, %v6909_v43 }
 0x136   : > { %5760 = vset.pattern.permute.xlu1 %v10191_v54  ;;  %v7160_v56 = vpop.permute.xlu0 %1228  ;;  %v7162_v50 = vpop.f32.mrb[25].mxu0 }
 0x137   : > { %1717 = vperm.xlu1 %5760, %v6864_v6   ;;  %2173 = vperm.xlu0 %5804, %v7209_v13  }
 0x139   : > { %v2022_v62 = vpop.permute.xlu1 %2021  ;;  %v7168_v16 = vpop.f32.mrb[26].mxu0 }
 0x13a   : > { %v2247_v15 = vmul.f32 %v6996_v60, %v2022_v62  ;;  %v7174_v14 = vpop.permute.xlu0 %1238  ;;  %v7177_v5 = vpop.f32.mrb[27].mxu0  ;;  %v10301_v62 = vmov 0  }
 0x13b   : > { %5762 = vset.pattern.permute.xlu1 %v10209_v42 }
 0x13c   : > { %v2311_v35 = vadd.f32 %v2247_v15, %v1923_v44  ;;  %2105 = vperm.xlu1 %5762, %v6864_v6   ;;  %v1473_v44 = vmul.f32 %v6981_v39, %v6845_v1  ;;  %v1926_v15 = vadd.f32 %v1862_v24, %v1538_v63  ;;  %v987_v1 = vpop.f32.mrb[3].mxu1 }
 0x13d   : > { %v7181_v9 = vpop.f32.mrb[28].mxu0 }
 0x13e   : > { %v2375_v31 = vmax.f32 %v2311_v35, 0.0  ;;  %v1638_v37 = vpop.permute.xlu1 %1637  ;;  %v7186_v55 = vpop.permute.xlu0 %1248  ;;  %v1537_v28 = vadd.f32 %v1473_v44, %v883_v19  ;;  %v2314_v24 = vadd.f32 %v2250_v12, %v1926_v15 }
 0x13f   : > { %v1860_v4 = vmul.f32 %v6991_v33, %v1638_v37  ;;  %v7190_v6 = vpop.f32.mrb[29].mxu0 }
 0x140   : > { %5763 = vset.pattern.permute.xlu1 %v10301_v62  ;;  %5447 = vmatmul.mubr.msk.f32.gmra.mrb[42].mxu1 %vm2439_vm1, %v2375_v31  ;;  %v1925_v43 = vadd.f32 %v1861_v36, %v1537_v28 }
 0x141   : > { %1313 = vperm.xlu1 %5763, %v7040_v7   ;;  %v7199_v34 = vpop.f32.mrb[30].mxu0  ;;  %v1924_v35 = vadd.f32 %v1860_v4, %v1536_v49 }
 0x142   : > { %v7204_v37 = vpop.permute.xlu0 %1258  ;;  %v967_v41 = vpop.f32.mrb[31].mxu0 }
 0x143   : > { %v2026_v30 = vpop.permute.xlu1 %2025 }
 0x144   : > { %v2248_v31 = vmul.f32 %v6996_v60, %v2026_v30  ;;  %v2378_v30 = vmax.f32 %v2314_v24, 0.0 }
 0x145   : > { %5764 = vset.pattern.permute.xlu1 %v10191_v54 }
 0x146   : > { %v2312_v0 = vadd.f32 %v2248_v31, %v1924_v35  ;;  %1725 = vperm.xlu1 %5764, %v6873_v57   ;;  %v7213_v4 = vpop.permute.xlu0 %1268  ;;  %v893_v35 = vadd.f32 %v7074_v26, %v6987_v18 }
 0x147   : > { %v2030_v63 = vpop.permute.xlu1 %2029 }
 0x148   : > { %v2376_v19 = vmax.f32 %v2312_v0, 0.0  ;;  %v2249_v49 = vmul.f32 %v6996_v60, %v2030_v63  ;;  %v1475_v0 = vmul.f32 %v6981_v39, %v6854_v58 }
 0x14a   : > { %v2313_v44 = vadd.f32 %v2249_v49, %v1925_v43  ;;  %1729 = vperm.xlu1 %5764, %v7040_v7   ;;  %5449 = vmatprep.mubr.msk.f32.mxu1 %vm2439_vm1, %v2376_v19  ;;  %v7219_v12 = vpop.permute.xlu0 %1278  ;;  %v968_v7 = vadd.f32 %v6987_v18, %v967_v41  ;;  %v1539_v26 = vadd.f32 %v1475_v0, %v893_v35 }
 0x14b   : > { %v908_v19 = vadd.f32 %v6987_v18, %v7118_v48  ;;  %v1478_v49 = vmul.f32 %v6981_v39, %v7160_v56  ;;  %v978_v41 = vadd.f32 %v6987_v18, %v7148_v46  ;;  %v7245_v48 = vpop.f32.mrb[4].mxu1  ;;  %v1866_v46 = vmul.f32 %v6991_v33, %v6928_v29  ;;  %v7261_v29 = vld [vmem:[%s6054_s26 + $0x198] sm:$0xff] }
 0x14c   : > { %v2377_v31 = vmax.f32 %v2313_v44, 0.0  ;;  %v1650_v15 = vpop.permute.xlu1 %1649  ;;  %v898_v44 = vadd.f32 %v6987_v18, %v7100_v40  ;;  %2181 = vperm.xlu0 %5804, %v7261_v29  }
 0x14d   : > { %v1863_v36 = vmul.f32 %v6991_v33, %v1650_v15 }
 0x14e   : > { %5765 = vset.pattern.permute.xlu1 %v10209_v42  ;;  %5450 = vmatmul.mubr.msk.f32.gmra.mrb[44].mxu1 %vm2439_vm1, %v2377_v31  ;;  %v1289_v28 = vpop.permute.xlu0 %1288 }
 0x14f   : > { %2113 = vperm.xlu1 %5765, %v6873_v57   ;;  %5452 = vmatprep.mubr.msk.f32.mxu1 %vm2439_vm1, %v2378_v30  ;;  %v1490_v24 = vmul.f32 %v6981_v39, %v1289_v28  ;;  %v1927_v43 = vadd.f32 %v1863_v36, %v1539_v26  ;;  %v1476_v30 = vmul.f32 %v6981_v39, %v7141_v11  ;;  %v997_v36 = vpop.f32.mrb[5].mxu1 }
 0x150   : > { %v988_v11 = vadd.f32 %v6987_v18, %v987_v1  ;;  %v903_v26 = vadd.f32 %v7094_v21, %v6987_v18  ;;  %v1477_v1 = vmul.f32 %v6981_v39, %v6860_v2  ;;  %v2254_v21 = vmul.f32 %v6996_v60, %v6729_v10 }
 0x151   : > { %v2038_v63 = vpop.permute.xlu1 %2037  ;;  %v7236_v57 = vadd.f32 %v1490_v24, %v968_v7  ;;  %v1542_v7 = vadd.f32 %v1478_v49, %v908_v19  ;;  %v1540_v28 = vadd.f32 %v1476_v30, %v898_v44  ;;  %v7271_v44 = vpop.f32.mrb[6].mxu1  ;;  %v1865_v30 = vmul.f32 %v6991_v33, %v6921_v38 }
 0x152   : > { %v2251_v58 = vmul.f32 %v6996_v60, %v2038_v63  ;;  %v1299_v31 = vpop.permute.xlu0 %1298  ;;  %v1007_v10 = vpop.f32.mrb[7].mxu1 }
 0x153   : > { %5766 = vset.pattern.permute.xlu1 %v10301_v62  ;;  %v1492_v56 = vmul.f32 %v6981_v39, %v1299_v31 }
 0x154   : > { %v2315_v35 = vadd.f32 %v2251_v58, %v1927_v43  ;;  %1323 = vperm.xlu1 %5766, %v7064_v32   ;;  %v1930_v58 = vadd.f32 %v1866_v46, %v1542_v7  ;;  %v7278_v46 = vpop.f32.mrb[8].mxu1 }
 0x155   : > { %v7250_v40 = vadd.f32 %v1492_v56, %v978_v41  ;;  %v998_v41 = vadd.f32 %v6987_v18, %v997_v36  ;;  %v1017_v38 = vpop.f32.mrb[9].mxu1 }
 0x156   : > { %v2379_v15 = vmax.f32 %v2315_v35, 0.0  ;;  %v1654_v0 = vpop.permute.xlu1 %1653  ;;  %v1309_v63 = vpop.permute.xlu0 %1308  ;;  %v1541_v35 = vadd.f32 %v1477_v1, %v903_v26  ;;  %v2318_v7 = vadd.f32 %v2254_v21, %v1930_v58 }
 0x157   : > { %v1864_v24 = vmul.f32 %v6991_v33, %v1654_v0  ;;  %v1494_v43 = vmul.f32 %v6981_v39, %v1309_v63  ;;  %v1008_v63 = vadd.f32 %v6987_v18, %v1007_v10  ;;  %v7284_v1 = vpop.f32.mrb[10].mxu1 }
 0x158   : > { %5767 = vset.pattern.permute.xlu1 %v10191_v54  ;;  %5453 = vmatmul.mubr.msk.f32.gmra.mrb[46].mxu1 %vm2439_vm1, %v2379_v15  ;;  %v1929_v26 = vadd.f32 %v1865_v30, %v1541_v35  ;;  %10303 = vst [vmem:[#allocation17_spill] sm:$0xff] %v7284_v1  ;;  %v2382_v58 = vmax.f32 %v2318_v7, 0.0  ;;  %v1018_v30 = vadd.f32 %v6987_v18, %v1017_v38 }
 0x159   : > { %1733 = vperm.xlu1 %5767, %v6883_v45   ;;  %v7268_v49 = vadd.f32 %v1494_v43, %v988_v11  ;;  %v1928_v31 = vadd.f32 %v1864_v24, %v1540_v28 }
 0x15a   : > { %v1319_v56 = vpop.permute.xlu0 %1318 }
 0x15b   : > { %v2042_v19 = vpop.permute.xlu1 %2041  ;;  %v1496_v15 = vmul.f32 %v6981_v39, %v1319_v56 }
 0x15c   : > { %v2252_v2 = vmul.f32 %v6996_v60, %v2042_v19  ;;  %v1027_v19 = vpop.f32.mrb[11].mxu1 }
 0x15d   : > { %1737 = vperm.xlu1 %5767, %v7064_v32   ;;  %v7280_v11 = vadd.f32 %v1496_v15, %v998_v41  ;;  %v7290_v21 = vpop.f32.mrb[12].mxu1  ;;  %v1028_v38 = vadd.f32 %v6987_v18, %v1027_v19  ;;  %v3081_v19 = vld [vmem:[%s9974_s8] sm:$0xff] }
 0x15e   : > { %v2316_v0 = vadd.f32 %v2252_v2, %v1928_v31  ;;  %v1329_v43 = vpop.permute.xlu0 %1328  ;;  %10304 = vst [vmem:[#allocation23_spill] sm:$0xff] %v7290_v21  ;;  %v1037_v35 = vpop.f32.mrb[13].mxu1  ;;  %v913_v2 = vadd.f32 %v7113_v27, %v6987_v18 }
 0x15f   : > { %v2046_v36 = vpop.permute.xlu1 %2045  ;;  %v1498_v32 = vmul.f32 %v6981_v39, %v1329_v43 }
 0x160   : > { %v2380_v28 = vmax.f32 %v2316_v0, 0.0  ;;  %v2253_v24 = vmul.f32 %v6996_v60, %v2046_v36  ;;  %v7298_v36 = vpop.f32.mrb[14].mxu1 }
 0x161   : > { %5768 = vset.pattern.permute.xlu1 %v10209_v42  ;;  %v7292_v41 = vadd.f32 %v1498_v32, %v1008_v63  ;;  %10305 = vst [vmem:[#allocation21_spill] sm:$0xff] %v7298_v36  ;;  %v1047_v63 = vpop.f32.mrb[15].mxu1 }
 0x162   : > { %v2317_v31 = vadd.f32 %v2253_v24, %v1929_v26  ;;  %2121 = vperm.xlu1 %5768, %v6883_v45   ;;  %5455 = vmatprep.mubr.msk.f32.mxu1 %vm2439_vm1, %v2380_v28  ;;  %v1339_v15 = vpop.permute.xlu0 %1338  ;;  %v1479_v45 = vmul.f32 %v6981_v39, %v6870_v61  ;;  %v7310_v26 = vpop.f32.mrb[16].mxu1 }
 0x163   : > { %v1500_v0 = vmul.f32 %v6981_v39, %v1339_v15  ;;  %10306 = vst [vmem:[#allocation18_spill] sm:$0xff] %v7310_v26  ;;  %v1057_v61 = vpop.f32.mrb[17].mxu1  ;;  %v7342_v26 = vld [vmem:[%s6054_s26 + $0x1a8] sm:$0xff] }
 0x164   : > { %v2381_v56 = vmax.f32 %v2317_v31, 0.0  ;;  %v1666_v10 = vpop.permute.xlu1 %1665  ;;  %v1543_v28 = vadd.f32 %v1479_v45, %v913_v2  ;;  %v7313_v31 = vpop.f32.mrb[18].mxu1  ;;  %v3082_v2 = vld [vmem:[%s9974_s8 + $0x8] sm:$0xff]  ;;  %2189 = vperm.xlu0 %5804, %v7342_v26  }
 0x165   : > { %v1867_v7 = vmul.f32 %v6991_v33, %v1666_v10  ;;  %v7307_v27 = vadd.f32 %v1500_v0, %v1018_v30  ;;  %10307 = vst [vmem:[#allocation24_spill] sm:$0xff] %v7313_v31  ;;  %v7318_v30 = vpop.f32.mrb[19].mxu1  ;;  %v1482_v10 = vmul.f32 %v6981_v39, %v7186_v55  ;;  %v1038_v0 = vadd.f32 %v6987_v18, %v1037_v35 }
 0x166   : > { %5769 = vset.pattern.permute.xlu1 %v10301_v62  ;;  %5456 = vmatmul.mubr.msk.f32.gmra.mrb[48].mxu1 %vm2439_vm1, %v2381_v56  ;;  %v1349_v24 = vpop.permute.xlu0 %1348  ;;  %v928_v56 = vadd.f32 %v6987_v18, %v7146_v3  ;;  %v7332_v45 = vpop.f32.mrb[20].mxu1 }
 0x167   : > { %1333 = vperm.xlu1 %5769, %v7084_v25   ;;  %5458 = vmatprep.mubr.msk.f32.mxu1 %vm2439_vm1, %v2382_v58  ;;  %v1502_v43 = vmul.f32 %v6981_v39, %v1349_v24  ;;  %v1931_v15 = vadd.f32 %v1867_v7, %v1543_v28  ;;  %10309 = vst [vmem:[#allocation96_spill] sm:$0xff] %v7332_v45  ;;  %v7339_v55 = vpop.f32.mrb[21].mxu1 }
 0x168   : > { %v5647_v7 = vpack.c.bf16 %v3082_v2, %v3081_v19  ;;  %v918_v28 = vadd.f32 %v6987_v18, %v7129_v8  ;;  %v1480_v24 = vmul.f32 %v6981_v39, %v7174_v14  ;;  %v7345_v35 = vpop.f32.mrb[22].mxu1  ;;  %v1870_v8 = vmul.f32 %v6991_v33, %v6939_v17 }
 0x169   : > { %v2054_v32 = vpop.permute.xlu1 %2053  ;;  %v7329_v3 = vadd.f32 %v1502_v43, %v1028_v38  ;;  %10310 = vst [vmem:[#allocation97_spill] sm:$0xff] %v7345_v35  ;;  %v1546_v19 = vadd.f32 %v1482_v10, %v928_v56  ;;  %v1048_v35 = vadd.f32 %v6987_v18, %v1047_v63  ;;  %v2258_v63 = vmul.f32 %v6996_v60, %v6794_v59 }
 0x16a   : > { %v2255_v58 = vmul.f32 %v6996_v60, %v2054_v32  ;;  %v1359_v31 = vpop.permute.xlu0 %1358  ;;  %5648 = vmatprep.subr.bf16.mxu0 %v5647_v7  ;;  %v1058_v59 = vadd.f32 %v6987_v18, %v1057_v61 }
 0x16b   : > { %5770 = vset.pattern.permute.xlu1 %v10191_v54  ;;  %10308 = vst [vmem:[#allocation95_spill] sm:$0xff] %v7329_v3  ;;  %v1504_v38 = vmul.f32 %v6981_v39, %v1359_v31  ;;  %5650 = vmatpush3.bf16.msra.mxu0 %v5647_v7  ;;  %v3084_v31 = vld [vmem:[%s9974_s8 + $0x18] sm:$0xff]  ;;  %v1544_v7 = vadd.f32 %v1480_v24, %v918_v28 }
 0x16c   : > { %v2319_v32 = vadd.f32 %v2255_v58, %v1931_v15  ;;  %1741 = vperm.xlu1 %5770, %v6893_v53   ;;  %v7350_v15 = vpop.f32.mrb[23].mxu1  ;;  %v3083_v58 = vld [vmem:[%s9974_s8 + $0x10] sm:$0xff]  ;;  %v1934_v24 = vadd.f32 %v1870_v8, %v1546_v19 }
 0x16d   : > { %v7358_v2 = vadd.f32 %v1504_v38, %v1038_v0  ;;  %v7361_v45 = vpop.f32.mrb[24].mxu1  ;;  %v5651_v17 = vpack.c.bf16 %v3084_v31, %v3083_v58  ;;  %v10314_v0 = vld [vmem:[#allocation11_spill] sm:$0xff]  ;;  %v10315_v31 = vld [vmem:[#allocation90_spill] sm:$0xff] }
 0x16e   : > { %v2383_v43 = vmax.f32 %v2319_v32, 0.0  ;;  %v1670_v14 = vpop.permute.xlu1 %1669  ;;  %10312 = vst [vmem:[#allocation99_spill] sm:$0xff] %v7361_v45  ;;  %v923_v32 = vadd.f32 %v7126_v51, %v6987_v18  ;;  %v1369_v21 = vpop.permute.xlu0 %1368  ;;  %v1481_v51 = vmul.f32 %v6981_v39, %v10314_v0 }
 0x16f   : > { %10311 = vst [vmem:[#allocation98_spill] sm:$0xff] %v7358_v2  ;;  %v1868_v36 = vmul.f32 %v6991_v33, %v1670_v14  ;;  %v7368_v3 = vpop.f32.mrb[25].mxu1  ;;  %v1506_v56 = vmul.f32 %v6981_v39, %v1369_v21  ;;  %5652 = vmatprep.subr.bf16.mxu0 %v5651_v17  ;;  %v3086_v21 = vld [vmem:[%s9974_s8 + $0x28] sm:$0xff] }
 0x170   : > { %1745 = vperm.xlu1 %5770, %v7084_v25   ;;  %5459 = vmatmul.mubr.msk.f32.gmra.mrb[50].mxu1 %vm2439_vm1, %v2383_v43  ;;  %v7371_v10 = vpop.f32.mrb[26].mxu1  ;;  %v3085_v25 = vld [vmem:[%s9974_s8 + $0x20] sm:$0xff]  ;;  %v1545_v0 = vadd.f32 %v1481_v51, %v923_v32  ;;  %v3088_v32 = vld [vmem:[%s9974_s8 + $0x38] sm:$0xff] }
 0x171   : > { %10313 = vst [vmem:[#allocation100_spill] sm:$0xff] %v7371_v10  ;;  %v7377_v28 = vpop.f32.mrb[27].mxu1  ;;  %5654 = vmatpush3.bf16.msra.mxu0 %v5651_v17  ;;  %v7385_v43 = vadd.f32 %v1506_v56, %v1048_v35  ;;  %v5655_v58 = vpack.c.bf16 %v3086_v21, %v3085_v25  ;;  %v1869_v17 = vmul.f32 %v6991_v33, %v10315_v31 }
 0x172   : > { %v7388_v14 = vpop.f32.mrb[28].mxu1  ;;  %v1932_v10 = vadd.f32 %v1868_v36, %v1544_v7  ;;  %v1379_v2 = vpop.permute.xlu0 %1378  ;;  %v3087_v36 = vld [vmem:[%s9974_s8 + $0x30] sm:$0xff]  ;;  %v2322_v7 = vadd.f32 %v2258_v63, %v1934_v24 }
 0x173   : > { %v2058_v38 = vpop.permute.xlu1 %2057  ;;  %v7394_v1 = vpop.f32.mrb[29].mxu1  ;;  %v1508_v35 = vmul.f32 %v6981_v39, %v1379_v2  ;;  %5656 = vmatprep.subr.bf16.mxu0 %v5655_v58  ;;  %v5659_v51 = vpack.c.bf16 %v3088_v32, %v3087_v36 }
 0x174   : > { %v2256_v45 = vmul.f32 %v6996_v60, %v2058_v38  ;;  %5771 = vset.pattern.permute.xlu1 %v10209_v42  ;;  %v7398_v61 = vpop.f32.mrb[30].mxu1  ;;  %v2386_v63 = vmax.f32 %v2322_v7, 0.0 }
 0x175   : > { %2129 = vperm.xlu1 %5771, %v6893_v53   ;;  %v7400_v19 = vpop.f32.mrb[31].mxu1  ;;  %5658 = vmatpush3.bf16.msra.mxu0 %v5655_v58  ;;  %v7408_v2 = vadd.f32 %v1508_v35, %v1058_v59  ;;  %v1068_v53 = vadd.f32 %v6987_v18, %v7318_v30  ;;  %v1078_v30 = vadd.f32 %v6987_v18, %v7339_v55  ;;  %v5811_v55 = vld [vmem:[%s6054_s26 + $0x140] sm:$0xff] }
 0x176   : > { %v2320_v8 = vadd.f32 %v2256_v45, %v1932_v10  ;;  %v1933_v45 = vadd.f32 %v1869_v17, %v1545_v0  ;;  %v1389_v21 = vpop.permute.xlu0 %1388  ;;  %5660 = vmatprep.subr.bf16.mxu0 %v5659_v51  ;;  %v933_v59 = vadd.f32 %v7137_v23, %v6987_v18  ;;  %v1088_v23 = vadd.f32 %v6987_v18, %v7350_v15 }
 0x177   : > { %v2062_v56 = vpop.permute.xlu1 %2061  ;;  %v1510_v38 = vmul.f32 %v6981_v39, %v1389_v21 }
 0x178   : > { %v2384_v10 = vmax.f32 %v2320_v8, 0.0  ;;  %v2257_v25 = vmul.f32 %v6996_v60, %v2062_v56  ;;  %v10316_v8 = vld [vmem:[#allocation19_spill] sm:$0xff] }
 0x179   : > { %5772 = vset.pattern.permute.xlu1 %v10301_v62  ;;  %v7417_v24 = vadd.f32 %v1510_v38, %v1068_v53  ;;  %5662 = vmatpush3.bf16.msra.mxu0 %v5659_v51  ;;  %v1483_v36 = vmul.f32 %v6981_v39, %v10316_v8  ;;  %v7436_v56 = vld [vmem:[%s6054_s26 + $0x1b8] sm:$0xff]  ;;  %v948_v38 = vadd.f32 %v6987_v18, %v7177_v5 }
 0x17a   : > { %v2321_v58 = vadd.f32 %v2257_v25, %v1933_v45  ;;  %1343 = vperm.xlu1 %5772, %v7103_v52   ;;  %5461 = vmatprep.mubr.msk.f32.mxu1 %vm2439_vm1, %v2384_v10  ;;  %v1399_v17 = vpop.permute.xlu0 %1398 }
 0x17b   : > { %v1512_v35 = vmul.f32 %v6981_v39, %v1399_v17  ;;  %v1547_v53 = vadd.f32 %v1483_v36, %v933_v59  ;;  %2197 = vperm.xlu0 %5804, %v7436_v56   ;;  %v1484_v59 = vmul.f32 %v6981_v39, %v7204_v37  ;;  %v943_v37 = vadd.f32 %v7156_v20, %v6987_v18 }
 0x17c   : > { %v2385_v31 = vmax.f32 %v2321_v58, 0.0  ;;  %v1682_v0 = vpop.permute.xlu1 %1681  ;;  %v1486_v58 = vmul.f32 %v6981_v39, %v7213_v4  ;;  %v10317_v4 = vld [vmem:[#allocation15_spill] sm:$0xff]  ;;  %v1118_v20 = vadd.f32 %v6987_v18, %v7394_v1 }
 0x17d   : > { %v1871_v32 = vmul.f32 %v6991_v33, %v1682_v0  ;;  %v7431_v7 = vadd.f32 %v1512_v35, %v1078_v30  ;;  %v938_v30 = vadd.f32 %v6987_v18, %v7162_v50  ;;  %v1108_v50 = vadd.f32 %v6987_v18, %v7377_v28 }
 0x17e   : > { %5773 = vset.pattern.permute.xlu1 %v10191_v54  ;;  %5462 = vmatmul.mubr.msk.f32.gmra.mrb[52].mxu1 %vm2439_vm1, %v2385_v31  ;;  %v1409_v51 = vpop.permute.xlu0 %1408  ;;  %v1550_v8 = vadd.f32 %v1486_v58, %v948_v38  ;;  %v10320_v58 = vld [vmem:[#allocation14_spill] sm:$0xff] }
 0x17f   : > { %1749 = vperm.xlu1 %5773, %v5811_v55   ;;  %5464 = vmatprep.mubr.msk.f32.mxu1 %vm2439_vm1, %v2386_v63  ;;  %v1514_v45 = vmul.f32 %v6981_v39, %v1409_v51  ;;  %v1935_v25 = vadd.f32 %v1871_v32, %v1547_v53  ;;  %v1098_v63 = vadd.f32 %v6987_v18, %v7368_v3  ;;  %v10318_v51 = vld [vmem:[#allocation22_spill] sm:$0xff] }
 0x180   : > { %v1548_v3 = vadd.f32 %v1484_v59, %v938_v30 }
 0x181   : > { %v2070_v10 = vpop.permute.xlu1 %2069  ;;  %v7446_v15 = vadd.f32 %v1514_v45, %v1088_v23  ;;  %v1485_v45 = vmul.f32 %v6981_v39, %v10318_v51  ;;  %v5812_v51 = vld [vmem:[%s6054_s26 + $0x150] sm:$0xff] }
 0x182   : > { %v2259_v21 = vmul.f32 %v6996_v60, %v2070_v10  ;;  %v1419_v17 = vpop.permute.xlu0 %1418  ;;  %v10319_v10 = vld [vmem:[#allocation87_spill] sm:$0xff] }
 0x183   : > { %1753 = vperm.xlu1 %5773, %v7103_v52   ;;  %v1516_v5 = vmul.f32 %v6981_v39, %v1419_v17  ;;  %v1874_v52 = vmul.f32 %v6991_v33, %v10317_v4  ;;  %v7480_v17 = vld [vmem:[%s6054_s26 + $0x1c8] sm:$0xff] }
 0x184   : > { %v2323_v31 = vadd.f32 %v2259_v21, %v1935_v25  ;;  %v2262_v25 = vmul.f32 %v6996_v60, %v10319_v10  ;;  %2205 = vperm.xlu0 %5804, %v7480_v17  }
 0x185   : > { %v7458_v36 = vadd.f32 %v1516_v5, %v1098_v63  ;;  %v1938_v28 = vadd.f32 %v1874_v52, %v1550_v8  ;;  %v1549_v63 = vadd.f32 %v1485_v45, %v943_v37  ;;  %v1128_v52 = vadd.f32 %v6987_v18, %v7400_v19  ;;  %v7490_v8 = vld [vmem:[%s6054_s26 + $0x1d8] sm:$0xff]  ;;  %v7503_v45 = vld [vmem:[%s9971_s5] ss:$0 sm:$0xff] }
 0x186   : > { %v2387_v0 = vmax.f32 %v2323_v31, 0.0  ;;  %v1686_v35 = vpop.permute.xlu1 %1685  ;;  %v1429_v23 = vpop.permute.xlu0 %1428  ;;  %v953_v10 = vadd.f32 %v7503_v45, %v7168_v16  ;;  %v7518_v16 = vld [vmem:[%s6054_s26 + $0x1f0] sm:$0xff] }
 0x187   : > { %5774 = vset.pattern.permute.xlu1 %v10209_v42  ;;  %v1872_v32 = vmul.f32 %v6991_v33, %v1686_v35  ;;  %v1518_v53 = vmul.f32 %v6981_v39, %v1429_v23 }
 0x188   : > { %2137 = vperm.xlu1 %5774, %v5811_v55   ;;  %5465 = vmatmul.mubr.msk.f32.gmra.mrb[54].mxu1 %vm2439_vm1, %v2387_v0  ;;  %v1873_v55 = vmul.f32 %v6991_v33, %v10320_v58  ;;  %v2326_v0 = vadd.f32 %v2262_v25, %v1938_v28 }
 0x189   : > { %v7471_v38 = vadd.f32 %v1518_v53, %v1108_v50  ;;  %v1936_v30 = vadd.f32 %v1872_v32, %v1548_v3  ;;  %2213 = vperm.xlu0 %5804, %v7490_v8  }
 0x18a   : > { %v1439_v31 = vpop.permute.xlu0 %1438  ;;  %v1937_v50 = vadd.f32 %v1873_v55, %v1549_v63  ;;  %v2390_v18 = vmax.f32 %v2326_v0, 0.0 }
 0x18b   : > { %v2074_v21 = vpop.permute.xlu1 %2073  ;;  %v1520_v5 = vmul.f32 %v6981_v39, %v1439_v31 }
 0x18c   : > { %v2260_v59 = vmul.f32 %v6996_v60, %v2074_v21  ;;  %5775 = vset.pattern.permute.xlu1 %v10301_v62  ;;  %v7508_v21 = vld [vmem:[%s6054_s26 + $0x1e8] sm:$0xff] }
 0x18d   : > { %1353 = vperm.xlu1 %5775, %v7121_v22   ;;  %v7485_v4 = vadd.f32 %v1520_v5, %v1118_v20  ;;  %2221 = vperm.xlu0 %5804, %v7508_v21   ;;  %v10321_v20 = vld [vmem:[#allocation12_spill] sm:$0xff]  ;;  %v958_v5 = vadd.f32 %v7503_v45, %v7190_v6  ;;  %v10323_v6 = vld [vmem:[#allocation13_spill] sm:$0xff] }
 0x18e   : > { %v2324_v1 = vadd.f32 %v2260_v59, %v1936_v30  ;;  %v1449_v32 = vpop.permute.xlu0 %1448  ;;  %v1487_v58 = vmul.f32 %v6981_v39, %v10321_v20 }
 0x18f   : > { %v2078_v35 = vpop.permute.xlu1 %2077  ;;  %v1522_v23 = vmul.f32 %v6981_v39, %v1449_v32 }
 0x190   : > { %v2388_v37 = vmax.f32 %v2324_v1, 0.0  ;;  %v2261_v3 = vmul.f32 %v6996_v60, %v2078_v35  ;;  %v1551_v63 = vadd.f32 %v1487_v58, %v953_v10  ;;  %v10324_v10 = vld [vmem:[#allocation91_spill] sm:$0xff] }
 0x191   : > { %5776 = vset.pattern.permute.xlu1 %v10191_v54  ;;  %v7498_v19 = vadd.f32 %v1522_v23, %v1128_v52  ;;  %2225 = vperm.xlu0 %5804, %v7518_v16   ;;  %v10322_v52 = vld [vmem:[#allocation93_spill] sm:$0xff]  ;;  %v5815_v58 = vld [vmem:[%s6054_s26 + $0x160] sm:$0xff] }
 0x192   : > { %v2325_v53 = vadd.f32 %v2261_v3, %v1937_v50  ;;  %1757 = vperm.xlu1 %5776, %v5812_v51   ;;  %5467 = vmatprep.mubr.msk.f32.mxu1 %vm2439_vm1, %v2388_v37  ;;  %v1878_v50 = vmul.f32 %v6991_v33, %v10322_v52  ;;  %v963_v37 = vadd.f32 %v7503_v45, %v7181_v9  ;;  %v2098_v23 = vpop.permute.xlu0 %2097  ;;  %v10325_v52 = vld [vmem:[#allocation88_spill] sm:$0xff] }
 0x194   : > { %v2389_v25 = vmax.f32 %v2325_v53, 0.0  ;;  %v1698_v28 = vpop.permute.xlu1 %1697  ;;  %v2266_v53 = vmul.f32 %v6996_v60, %v2098_v23  ;;  %v10327_v23 = vld [vmem:[#allocation92_spill] sm:$0xff] }
 0x195   : > { %v1875_v55 = vmul.f32 %v6991_v33, %v1698_v28 }
 0x196   : > { %1761 = vperm.xlu1 %5776, %v7121_v22   ;;  %5468 = vmatmul.mubr.msk.f32.gmra.mrb[56].mxu1 %vm2439_vm1, %v2389_v25  ;;  %v1488_v22 = vmul.f32 %v6981_v39, %v7219_v12  ;;  %v1489_v12 = vmul.f32 %v6981_v39, %v10323_v6  ;;  %v1877_v25 = vmul.f32 %v6991_v33, %v10324_v10  ;;  %v10326_v6 = vld [vmem:[#allocation16_spill] sm:$0xff] }
 0x197   : > { %5470 = vmatprep.mubr.msk.f32.mxu1 %vm2439_vm1, %v2390_v18  ;;  %v1939_v59 = vadd.f32 %v1875_v55, %v1551_v63  ;;  %v1942_v18 = vadd.f32 %v1878_v50, %v7236_v57  ;;  %v1491_v50 = vmul.f32 %v6981_v39, %v10325_v52 }
 0x198   : > { %v1552_v3 = vadd.f32 %v1488_v22, %v958_v5  ;;  %v1553_v9 = vadd.f32 %v1489_v12, %v963_v37 }
 0x199   : > { %v2086_v30 = vpop.permute.xlu1 %2085 }
 0x19a   : > { %v2263_v31 = vmul.f32 %v6996_v60, %v2086_v30  ;;  %5777 = vset.pattern.permute.xlu1 %v10209_v42  ;;  %v2330_v30 = vadd.f32 %v2266_v53, %v1942_v18  ;;  %v983_v53 = vadd.f32 %v7503_v45, %v10327_v23  ;;  %v5817_v23 = vld [vmem:[%s6054_s26 + $0x180] sm:$0xff] }
 0x19b   : > { %2145 = vperm.xlu1 %5777, %v5812_v51  }
 0x19c   : > { %v2327_v1 = vadd.f32 %v2263_v31, %v1939_v59  ;;  %v1941_v59 = vadd.f32 %v1877_v25, %v1553_v9  ;;  %v2394_v22 = vmax.f32 %v2330_v30, 0.0  ;;  %v10328_v25 = vld [vmem:[#allocation89_spill] sm:$0xff] }
 0x19d   : > { %v1493_v9 = vmul.f32 %v6981_v39, %v10328_v25 }
 0x19e   : > { %v2391_v0 = vmax.f32 %v2327_v1, 0.0  ;;  %v1702_v35 = vpop.permute.xlu1 %1701  ;;  %v973_v1 = vadd.f32 %v7503_v45, %v7199_v34 }
 0x19f   : > { %5778 = vset.pattern.permute.xlu1 %v10301_v62  ;;  %v1876_v32 = vmul.f32 %v6991_v33, %v1702_v35 }
 0x1a0   : > { %1363 = vperm.xlu1 %5778, %v7132_v47   ;;  %5471 = vmatmul.mubr.msk.f32.gmra.mrb[58].mxu1 %vm2439_vm1, %v2391_v0 }
 0x1a1   : > { %v1940_v28 = vadd.f32 %v1876_v32, %v1552_v3 }
 0x1a3   : > { %v2090_v51 = vpop.permute.xlu1 %2089 }
 0x1a4   : > { %v2264_v20 = vmul.f32 %v6996_v60, %v2090_v51  ;;  %5779 = vset.pattern.permute.xlu1 %v10191_v54  ;;  %v2110_v51 = vpop.permute.xlu0 %2109 }
 0x1a5   : > { %1765 = vperm.xlu1 %5779, %v5815_v58   ;;  %v2269_v30 = vmul.f32 %v6996_v60, %v2110_v51 }
 0x1a6   : > { %v2328_v55 = vadd.f32 %v2264_v20, %v1940_v28  ;;  %v10329_v28 = vld [vmem:[#allocation94_spill] sm:$0xff] }
 0x1a7   : > { %v2094_v63 = vpop.permute.xlu1 %2093  ;;  %v1881_v20 = vmul.f32 %v6991_v33, %v10329_v28 }
 0x1a8   : > { %v2392_v31 = vmax.f32 %v2328_v55, 0.0  ;;  %v2265_v5 = vmul.f32 %v6996_v60, %v2094_v63  ;;  %v5816_v55 = vld [vmem:[%s6054_s26 + $0x170] sm:$0xff]  ;;  %v1557_v63 = vadd.f32 %v1493_v9, %v983_v53 }
 0x1a9   : > { %1769 = vperm.xlu1 %5779, %v7132_v47   ;;  %v1555_v47 = vadd.f32 %v1491_v50, %v973_v1 }
 0x1aa   : > { %v2329_v57 = vadd.f32 %v2265_v5, %v1941_v59  ;;  %5473 = vmatprep.mubr.msk.f32.mxu1 %vm2439_vm1, %v2392_v31  ;;  %v1945_v59 = vadd.f32 %v1881_v20, %v1557_v63 }
 0x1ac   : > { %v2393_v0 = vmax.f32 %v2329_v57, 0.0  ;;  %v1714_v35 = vpop.permute.xlu1 %1713 }
 0x1ad   : > { %5780 = vset.pattern.permute.xlu1 %v10209_v42  ;;  %v1879_v37 = vmul.f32 %v6991_v33, %v1714_v35 }
 0x1ae   : > { %2153 = vperm.xlu1 %5780, %v5815_v58   ;;  %5474 = vmatmul.mubr.msk.f32.gmra.mrb[60].mxu1 %vm2439_vm1, %v2393_v0 }
 0x1af   : > { %5476 = vmatprep.mubr.msk.f32.mxu1 %vm2439_vm1, %v2394_v22  ;;  %v1943_v32 = vadd.f32 %v1879_v37, %v1555_v47  ;;  %v2333_v22 = vadd.f32 %v2269_v30, %v1945_v59  ;;  %v10330_v37 = vld [vmem:[#allocation20_spill] sm:$0xff] }
 0x1b0   : > { %v993_v47 = vadd.f32 %v7503_v45, %v10330_v37 }
 0x1b1   : > { %v2102_v3 = vpop.permute.xlu1 %2101  ;;  %v2397_v52 = vmax.f32 %v2333_v22, 0.0  ;;  %v5818_v22 = vld [vmem:[%s6054_s26 + $0x190] sm:$0xff] }
 0x1b2   : > { %v2267_v34 = vmul.f32 %v6996_v60, %v2102_v3  ;;  %5781 = vset.pattern.permute.xlu1 %v10301_v62 }
 0x1b3   : > { %1373 = vperm.xlu1 %5781, %v10326_v6  }
 0x1b4   : > { %v2331_v12 = vadd.f32 %v2267_v34, %v1943_v32  ;;  %v2118_v32 = vpop.permute.xlu0 %2117 }
 0x1b5   : > { %v2271_v51 = vmul.f32 %v6996_v60, %v2118_v32  ;;  %v1013_v32 = vadd.f32 %v7503_v45, %v7271_v44  ;;  %v7620_v44 = vld [vmem:[%s9973_s7] ss:$0 sm:$0xff] }
 0x1b6   : > { %v2395_v18 = vmax.f32 %v2331_v12, 0.0  ;;  %v1718_v10 = vpop.permute.xlu1 %1717 }
 0x1b7   : > { %5782 = vset.pattern.permute.xlu1 %v10191_v54  ;;  %v1880_v58 = vmul.f32 %v6991_v33, %v1718_v10 }
 0x1b8   : > { %1773 = vperm.xlu1 %5782, %v5816_v55   ;;  %5477 = vmatmul.mubr.msk.f32.gmra.mrb[62].mxu1 %vm2439_vm1, %v2395_v18  ;;  %v2126_v59 = vpop.permute.xlu0 %2125 }
 0x1b9   : > { %v1944_v5 = vadd.f32 %v1880_v58, %v7250_v40 }
 0x1bb   : > { %v2106_v31 = vpop.permute.xlu1 %2105 }
 0x1bc   : > { %v2268_v57 = vmul.f32 %v6996_v60, %v2106_v31  ;;  %1777 = vperm.xlu1 %5782, %v10326_v6  }
 0x1be   : > { %v2332_v1 = vadd.f32 %v2268_v57, %v1944_v5 }
 0x1c0   : > { %v2396_v0 = vmax.f32 %v2332_v1, 0.0  ;;  %5783 = vset.pattern.permute.xlu1 %v10209_v42  ;;  %v1314_v35 = vpop.permute.xlu1 %1313 }
 0x1c1   : > { %2161 = vperm.xlu1 %5783, %v5816_v55   ;;  %v1495_v50 = vmul.f32 %v6981_v39, %v1314_v35 }
 0x1c2   : > { %5479 = vmatprep.mubr.msk.f32.mxu1 %vm2439_vm1, %v2396_v0  ;;  %v2273_v0 = vmul.f32 %v6996_v60, %v2126_v59 }
 0x1c3   : > { %5480 = vmatmul.mubr.msk.f32.gmra.mrb[64].mxu1 %vm2439_vm1, %v2397_v52  ;;  %v1559_v34 = vadd.f32 %v1495_v50, %v993_v47 }
 0x1c5   : > { %5784 = vset.pattern.permute.xlu1 %v10301_v62  ;;  %v1726_v40 = vpop.permute.xlu1 %1725 }
 0x1c6   : > { %1383 = vperm.xlu1 %5784, %v7209_v13   ;;  %v1882_v12 = vmul.f32 %v6991_v33, %v1726_v40 }
 0x1c8   : > { %v1946_v10 = vadd.f32 %v1882_v12, %v7268_v49 }
 0x1c9   : > { %v1730_v3 = vpop.permute.xlu1 %1729 }
 0x1ca   : > { %v1883_v6 = vmul.f32 %v6991_v33, %v1730_v3  ;;  %5785 = vset.pattern.permute.xlu1 %v10191_v54 }
 0x1cb   : > { %1781 = vperm.xlu1 %5785, %v5817_v23  }
 0x1cc   : > { %v1947_v53 = vadd.f32 %v1883_v6, %v1559_v34  ;;  %v2134_v6 = vpop.permute.xlu0 %2133 }
 0x1ce   : > { %v2114_v18 = vpop.permute.xlu1 %2113  ;;  %v2335_v9 = vadd.f32 %v2271_v51, %v1947_v53  ;;  %v5819_v51 = vld [vmem:[%s6054_s26 + $0x1a0] sm:$0xff] }
 0x1cf   : > { %v2270_v25 = vmul.f32 %v6996_v60, %v2114_v18  ;;  %1785 = vperm.xlu1 %5785, %v7209_v13   ;;  %v1003_v13 = vadd.f32 %v7503_v45, %v7245_v48 }
 0x1d0   : > { %v2399_v55 = vmax.f32 %v2335_v9, 0.0 }
 0x1d1   : > { %v2334_v28 = vadd.f32 %v2270_v25, %v1946_v10  ;;  %v2275_v10 = vmul.f32 %v6996_v60, %v2134_v6 }
 0x1d3   : > { %v2398_v20 = vmax.f32 %v2334_v28, 0.0  ;;  %5786 = vset.pattern.permute.xlu1 %v10209_v42  ;;  %v1324_v58 = vpop.permute.xlu1 %1323 }
 0x1d4   : > { %2169 = vperm.xlu1 %5786, %v5817_v23   ;;  %v1497_v63 = vmul.f32 %v6981_v39, %v1324_v58 }
 0x1d5   : > { %5482 = vmatprep.mubr.msk.f32.mxu1 %vm2439_vm1, %v2398_v20 }
 0x1d6   : > { %5483 = vmatmul.mubr.msk.f32.gmra.mrb[66].mxu1 %vm2439_vm1, %v2399_v55  ;;  %v1561_v31 = vadd.f32 %v1497_v63, %v1003_v13 }
 0x1d8   : > { %5787 = vset.pattern.permute.xlu1 %v10301_v62  ;;  %v1734_v49 = vpop.permute.xlu1 %1733 }
 0x1d9   : > { %1393 = vperm.xlu1 %5787, %v7261_v29   ;;  %v1884_v57 = vmul.f32 %v6991_v33, %v1734_v49 }
 0x1db   : > { %v1948_v52 = vadd.f32 %v1884_v57, %v7280_v11 }
 0x1dc   : > { %v1738_v30 = vpop.permute.xlu1 %1737 }
 0x1dd   : > { %v1885_v5 = vmul.f32 %v6991_v33, %v1738_v30  ;;  %5788 = vset.pattern.permute.xlu1 %v10191_v54 }
 0x1de   : > { %1789 = vperm.xlu1 %5788, %v5818_v22  }
 0x1df   : > { %v1949_v1 = vadd.f32 %v1885_v5, %v1561_v31 }
 0x1e1   : > { %v2122_v35 = vpop.permute.xlu1 %2121  ;;  %v2337_v40 = vadd.f32 %v2273_v0, %v1949_v1 }
 0x1e2   : > { %v2272_v48 = vmul.f32 %v6996_v60, %v2122_v35  ;;  %1793 = vperm.xlu1 %5788, %v7261_v29  }
 0x1e3   : > { %v2401_v3 = vmax.f32 %v2337_v40, 0.0 }
 0x1e4   : > { %v2336_v50 = vadd.f32 %v2272_v48, %v1948_v52 }
 0x1e6   : > { %v2400_v37 = vmax.f32 %v2336_v50, 0.0  ;;  %5789 = vset.pattern.permute.xlu1 %v10209_v42  ;;  %v1334_v47 = vpop.permute.xlu1 %1333 }
 0x1e7   : > { %2177 = vperm.xlu1 %5789, %v5818_v22   ;;  %v1499_v29 = vmul.f32 %v6981_v39, %v1334_v47 }
 0x1e8   : > { %5485 = vmatprep.mubr.msk.f32.mxu1 %vm2439_vm1, %v2400_v37  ;;  %v1023_v37 = vadd.f32 %v7503_v45, %v7278_v46 }
 0x1e9   : > { %5486 = vmatmul.mubr.msk.f32.gmra.mrb[68].mxu1 %vm2439_vm1, %v2401_v3  ;;  %v1563_v12 = vadd.f32 %v1499_v29, %v1013_v32  ;;  %v2142_v29 = vpop.permute.xlu0 %2141 }
 0x1eb   : > { %5790 = vset.pattern.permute.xlu1 %v10301_v62  ;;  %v1742_v11 = vpop.permute.xlu1 %1741 }
 0x1ec   : > { %1403 = vperm.xlu1 %5790, %v7342_v26   ;;  %v1886_v53 = vmul.f32 %v6991_v33, %v1742_v11 }
 0x1ee   : > { %v1950_v9 = vadd.f32 %v1886_v53, %v7292_v41 }
 0x1ef   : > { %v1746_v34 = vpop.permute.xlu1 %1745 }
 0x1f0   : > { %v1887_v23 = vmul.f32 %v6991_v33, %v1746_v34  ;;  %5791 = vset.pattern.permute.xlu1 %v10191_v54 }
 0x1f1   : > { %1797 = vperm.xlu1 %5791, %v5819_v51  }
 0x1f2   : > { %v1951_v18 = vadd.f32 %v1887_v23, %v1563_v12 }
 0x1f3   : > { %v5433_v20 = vpop.f32.mrb[32].mxu1 }
 0x1f4   : > { %v2130_v25 = vpop.permute.xlu1 %2129  ;;  %v2339_v58 = vadd.f32 %v2275_v10, %v1951_v18  ;;  %v2704_v55 = vadd.f32 %v5433_v20, %v7620_v44  ;;  %v2698_v49 = vpop.f32.mrb[33].mxu1  ;;  %v5820_v10 = vld [vmem:[%s6054_s26 + $0x1b0] sm:$0xff] }
 0x1f5   : > { %v2274_v28 = vmul.f32 %v6996_v60, %v2130_v25  ;;  %1801 = vperm.xlu1 %5791, %v7342_v26   ;;  %v2699_v13 = vadd.f32 %v7620_v44, %v2698_v49 }
 0x1f6   : > { %v2403_v41 = vmax.f32 %v2339_v58, 0.0  ;;  %v3018_v57 = vmax.f32 %v2704_v55, 0.0 }
 0x1f7   : > { %v2338_v63 = vadd.f32 %v2274_v28, %v1950_v9  ;;  %v3017_v59 = vmax.f32 %v2699_v13, 0.0  ;;  %v5436_v5 = vpop.f32.mrb[34].mxu1  ;;  %v2277_v28 = vmul.f32 %v6996_v60, %v2142_v29 }
 0x1f8   : > { %v2714_v22 = vadd.f32 %v5436_v5, %v7620_v44  ;;  %v2708_v26 = vpop.f32.mrb[35].mxu1 }
 0x1f9   : > { %v2402_v30 = vmax.f32 %v2338_v63, 0.0  ;;  %5792 = vset.pattern.permute.xlu1 %v10209_v42  ;;  %v1344_v31 = vpop.permute.xlu1 %1343  ;;  %v2709_v1 = vadd.f32 %v7620_v44, %v2708_v26  ;;  %5543 = vmatprep.mubr.msk.f32.mxu0 %vm3096_vm2, %v3017_v59 }
 0x1fa   : > { %2185 = vperm.xlu1 %5792, %v5819_v51   ;;  %5544 = vmatmul.mubr.msk.f32.vlgmr.msra.gmra.mrb[32].mxu0 %vm3096_vm2, %v3018_v57  ;;  %v3020_v52 = vmax.f32 %v2714_v22, 0.0  ;;  %v1501_v47 = vmul.f32 %v6981_v39, %v1344_v31 }
 0x1fb   : > { %5488 = vmatprep.mubr.msk.f32.mxu1 %vm2439_vm1, %v2402_v30  ;;  %v3019_v0 = vmax.f32 %v2709_v1, 0.0  ;;  %v5439_v35 = vpop.f32.mrb[36].mxu1  ;;  %v10331_v1 = vld [vmem:[#allocation17_spill] sm:$0xff] }
 0x1fc   : > { %5489 = vmatmul.mubr.msk.f32.gmra.mrb[70].mxu1 %vm2439_vm1, %v2403_v41  ;;  %v2724_v48 = vadd.f32 %v5439_v35, %v7620_v44  ;;  %v2718_v50 = vpop.f32.mrb[37].mxu1  ;;  %v1565_v46 = vadd.f32 %v1501_v47, %v1023_v37  ;;  %v2150_v47 = vpop.permute.xlu0 %2149 }
 0x1fd   : > { %v2719_v3 = vadd.f32 %v7620_v44, %v2718_v50  ;;  %5546 = vmatprep.mubr.msk.f32.mxu0 %vm3096_vm2, %v3019_v0  ;;  %v1033_v0 = vadd.f32 %v7503_v45, %v10331_v1 }
 0x1fe   : > { %5793 = vset.pattern.permute.xlu1 %v10301_v62  ;;  %v1750_v40 = vpop.permute.xlu1 %1749  ;;  %5547 = vmatmul.mubr.msk.f32.gmra.mrb[34].mxu0 %vm3096_vm2, %v3020_v52  ;;  %v3022_v34 = vmax.f32 %v2724_v48, 0.0 }
 0x1ff   : > { %1413 = vperm.xlu1 %5793, %v7436_v56   ;;  %v3021_v11 = vmax.f32 %v2719_v3, 0.0  ;;  %v5442_v32 = vpop.f32.mrb[38].mxu1  ;;  %v1888_v18 = vmul.f32 %v6991_v33, %v1750_v40 }
 0x200   : > { %v2734_v6 = vadd.f32 %v5442_v32, %v7620_v44  ;;  %v2728_v23 = vpop.f32.mrb[39].mxu1 }
 0x201   : > { %v2729_v51 = vadd.f32 %v7620_v44, %v2728_v23  ;;  %5549 = vmatprep.mubr.msk.f32.mxu0 %vm3096_vm2, %v3021_v11  ;;  %v1952_v55 = vadd.f32 %v1888_v18, %v7307_v27  ;;  %v2279_v23 = vmul.f32 %v6996_v60, %v2150_v47 }
 0x202   : > { %v1754_v12 = vpop.permute.xlu1 %1753  ;;  %5550 = vmatmul.mubr.msk.f32.gmra.mrb[36].mxu0 %vm3096_vm2, %v3022_v34  ;;  %v3024_v20 = vmax.f32 %v2734_v6, 0.0  ;;  %v5821_v34 = vld [vmem:[%s6054_s26 + $0x1c0] sm:$0xff] }
 0x203   : > { %v1889_v53 = vmul.f32 %v6991_v33, %v1754_v12  ;;  %5794 = vset.pattern.permute.xlu1 %v10191_v54  ;;  %v3023_v9 = vmax.f32 %v2729_v51, 0.0 }
 0x204   : > { %1805 = vperm.xlu1 %5794, %v5820_v10  }
 0x205   : > { %v1953_v25 = vadd.f32 %v1889_v53, %v1565_v46  ;;  %5552 = vmatprep.mubr.msk.f32.mxu0 %vm3096_vm2, %v3023_v9  ;;  %v10332_v53 = vld [vmem:[#allocation95_spill] sm:$0xff] }
 0x206   : > { %5553 = vmatmul.mubr.msk.f32.gmra.mrb[38].mxu0 %vm3096_vm2, %v3024_v20 }
 0x207   : > { %v2138_v58 = vpop.permute.xlu1 %2137  ;;  %v2341_v63 = vadd.f32 %v2277_v28, %v1953_v25  ;;  %v5445_v13 = vpop.f32.mrb[40].mxu1 }
 0x208   : > { %v2276_v49 = vmul.f32 %v6996_v60, %v2138_v58  ;;  %1809 = vperm.xlu1 %5794, %v7436_v56   ;;  %v2744_v59 = vadd.f32 %v5445_v13, %v7620_v44  ;;  %v2738_v31 = vpop.f32.mrb[41].mxu1  ;;  %v10333_v13 = vld [vmem:[#allocation23_spill] sm:$0xff] }
 0x209   : > { %v2739_v5 = vadd.f32 %v7620_v44, %v2738_v31  ;;  %v2405_v22 = vmax.f32 %v2341_v63, 0.0 }
 0x20a   : > { %v2340_v30 = vadd.f32 %v2276_v49, %v1952_v55  ;;  %v3026_v26 = vmax.f32 %v2744_v59, 0.0 }
 0x20b   : > { %v3025_v27 = vmax.f32 %v2739_v5, 0.0 }
 0x20c   : > { %v2404_v41 = vmax.f32 %v2340_v30, 0.0  ;;  %5795 = vset.pattern.permute.xlu1 %v10209_v42  ;;  %v1354_v57 = vpop.permute.xlu1 %1353  ;;  %v1043_v30 = vadd.f32 %v7503_v45, %v10333_v13 }
 0x20d   : > { %2193 = vperm.xlu1 %5795, %v5820_v10   ;;  %5555 = vmatprep.mubr.msk.f32.mxu0 %vm3096_vm2, %v3025_v27  ;;  %v1503_v35 = vmul.f32 %v6981_v39, %v1354_v57  ;;  %v2158_v57 = vpop.permute.xlu0 %2157 }
 0x20e   : > { %5491 = vmatprep.mubr.msk.f32.mxu1 %vm2439_vm1, %v2404_v41  ;;  %5556 = vmatmul.mubr.msk.f32.gmra.mrb[40].mxu0 %vm3096_vm2, %v3026_v26 }
 0x20f   : > { %5492 = vmatmul.mubr.msk.f32.gmra.mrb[72].mxu1 %vm2439_vm1, %v2405_v22  ;;  %v1567_v3 = vadd.f32 %v1503_v35, %v1033_v0  ;;  %v2281_v0 = vmul.f32 %v6996_v60, %v2158_v57 }
 0x211   : > { %5796 = vset.pattern.permute.xlu1 %v10301_v62  ;;  %v1758_v56 = vpop.permute.xlu1 %1757 }
 0x212   : > { %1423 = vperm.xlu1 %5796, %v7480_v17   ;;  %v1890_v32 = vmul.f32 %v6991_v33, %v1758_v56  ;;  %v5822_v56 = vld [vmem:[%s6054_s26 + $0x1d0] sm:$0xff] }
 0x213   : > { %v5448_v52 = vpop.f32.mrb[42].mxu1 }
 0x214   : > { %v2754_v48 = vadd.f32 %v5448_v52, %v7620_v44  ;;  %v2748_v40 = vpop.f32.mrb[43].mxu1  ;;  %v1954_v51 = vadd.f32 %v1890_v32, %v10332_v53 }
 0x215   : > { %v2749_v50 = vadd.f32 %v7620_v44, %v2748_v40  ;;  %v1762_v37 = vpop.permute.xlu1 %1761 }
 0x216   : > { %v1891_v11 = vmul.f32 %v6991_v33, %v1762_v37  ;;  %5797 = vset.pattern.permute.xlu1 %v10191_v54  ;;  %v3028_v6 = vmax.f32 %v2754_v48, 0.0  ;;  %v10334_v37 = vld [vmem:[#allocation98_spill] sm:$0xff] }
 0x217   : > { %v3027_v29 = vmax.f32 %v2749_v50, 0.0  ;;  %1813 = vperm.xlu1 %5797, %v5821_v34  }
 0x218   : > { %v1955_v12 = vadd.f32 %v1891_v11, %v1567_v3 }
 0x219   : > { %5558 = vmatprep.mubr.msk.f32.mxu0 %vm3096_vm2, %v3027_v29 }
 0x21a   : > { %v2146_v46 = vpop.permute.xlu1 %2145  ;;  %5559 = vmatmul.mubr.msk.f32.gmra.mrb[42].mxu0 %vm3096_vm2, %v3028_v6  ;;  %v2343_v10 = vadd.f32 %v2279_v23, %v1955_v12 }
 0x21b   : > { %v2278_v18 = vmul.f32 %v6996_v60, %v2146_v46  ;;  %1817 = vperm.xlu1 %5797, %v7480_v17   ;;  %v10335_v46 = vld [vmem:[#allocation21_spill] sm:$0xff] }
 0x21c   : > { %v2407_v20 = vmax.f32 %v2343_v10, 0.0  ;;  %v1053_v53 = vadd.f32 %v7503_v45, %v10335_v46 }
 0x21d   : > { %v2342_v25 = vadd.f32 %v2278_v18, %v1954_v51 }
 0x21f   : > { %v2406_v9 = vmax.f32 %v2342_v25, 0.0  ;;  %5798 = vset.pattern.permute.xlu1 %v10209_v42  ;;  %v1364_v28 = vpop.permute.xlu1 %1363 }
 0x220   : > { %2201 = vperm.xlu1 %5798, %v5821_v34   ;;  %v1505_v59 = vmul.f32 %v6981_v39, %v1364_v28 }
 0x221   : > { %v5451_v58 = vpop.f32.mrb[44].mxu1  ;;  %5494 = vmatprep.mubr.msk.f32.mxu1 %vm2439_vm1, %v2406_v9 }
 0x222   : > { %v2764_v55 = vadd.f32 %v5451_v58, %v7620_v44  ;;  %v2758_v49 = vpop.f32.mrb[45].mxu1  ;;  %5495 = vmatmul.mubr.msk.f32.gmra.mrb[74].mxu1 %vm2439_vm1, %v2407_v20  ;;  %v1569_v22 = vadd.f32 %v1505_v59, %v1043_v30  ;;  %v2166_v20 = vpop.permute.xlu0 %2165 }
 0x223   : > { %v2759_v63 = vadd.f32 %v7620_v44, %v2758_v49  ;;  %v2283_v59 = vmul.f32 %v6996_v60, %v2166_v20 }
 0x224   : > { %5799 = vset.pattern.permute.xlu1 %v10301_v62  ;;  %v1766_v17 = vpop.permute.xlu1 %1765  ;;  %v3030_v5 = vmax.f32 %v2764_v55, 0.0 }
 0x225   : > { %v3029_v31 = vmax.f32 %v2759_v63, 0.0  ;;  %1433 = vperm.xlu1 %5799, %v7490_v8   ;;  %v1892_v26 = vmul.f32 %v6991_v33, %v1766_v17  ;;  %v5823_v17 = vld [vmem:[%s6054_s26 + $0x1e0] sm:$0xff] }
 0x227   : > { %5561 = vmatprep.mubr.msk.f32.mxu0 %vm3096_vm2, %v3029_v31  ;;  %v1956_v47 = vadd.f32 %v1892_v26, %v10334_v37 }
 0x228   : > { %v1770_v41 = vpop.permute.xlu1 %1769  ;;  %5562 = vmatmul.mubr.msk.f32.gmra.mrb[44].mxu0 %vm3096_vm2, %v3030_v5 }
 0x229   : > { %v1893_v27 = vmul.f32 %v6991_v33, %v1770_v41  ;;  %5800 = vset.pattern.permute.xlu1 %v10191_v54 }
 0x22a   : > { %1821 = vperm.xlu1 %5800, %v5822_v56  }
 0x22b   : > { %v1957_v1 = vadd.f32 %v1893_v27, %v1569_v22  ;;  %v5454_v35 = vpop.f32.mrb[46].mxu1 }
 0x22c   : > { %v2774_v52 = vadd.f32 %v5454_v35, %v7620_v44  ;;  %v2768_v48 = vpop.f32.mrb[47].mxu1 }
 0x22d   : > { %v2769_v40 = vadd.f32 %v7620_v44, %v2768_v48  ;;  %v2154_v50 = vpop.permute.xlu1 %2153  ;;  %v2345_v11 = vadd.f32 %v2281_v0, %v1957_v1 }
 0x22e   : > { %v2280_v3 = vmul.f32 %v6996_v60, %v2154_v50  ;;  %1825 = vperm.xlu1 %5800, %v7490_v8   ;;  %v3032_v29 = vmax.f32 %v2774_v52, 0.0  ;;  %v10336_v50 = vld [vmem:[#allocation18_spill] sm:$0xff] }
 0x22f   : > { %v3031_v32 = vmax.f32 %v2769_v40, 0.0  ;;  %v2409_v23 = vmax.f32 %v2345_v11, 0.0  ;;  %v1063_v37 = vadd.f32 %v7503_v45, %v10336_v50  ;;  %v2174_v11 = vpop.permute.xlu0 %2173 }
 0x230   : > { %v2344_v34 = vadd.f32 %v2280_v3, %v1956_v47 }
 0x231   : > { %5564 = vmatprep.mubr.msk.f32.mxu0 %vm3096_vm2, %v3031_v32 }
 0x232   : > { %v2408_v6 = vmax.f32 %v2344_v34, 0.0  ;;  %5801 = vset.pattern.permute.xlu1 %v10209_v42  ;;  %v1374_v12 = vpop.permute.xlu1 %1373  ;;  %5565 = vmatmul.mubr.msk.f32.gmra.mrb[46].mxu0 %vm3096_vm2, %v3032_v29 }
 0x233   : > { %2209 = vperm.xlu1 %5801, %v5822_v56   ;;  %v1507_v51 = vmul.f32 %v6981_v39, %v1374_v12 }
 0x234   : > { %5497 = vmatprep.mubr.msk.f32.mxu1 %vm2439_vm1, %v2408_v6  ;;  %v2285_v6 = vmul.f32 %v6996_v60, %v2174_v11 }
 0x235   : > { %5498 = vmatmul.mubr.msk.f32.gmra.mrb[76].mxu1 %vm2439_vm1, %v2409_v23  ;;  %v1571_v58 = vadd.f32 %v1507_v51, %v1053_v53 }
 0x237   : > { %5802 = vset.pattern.permute.xlu1 %v10301_v62  ;;  %v1774_v8 = vpop.permute.xlu1 %1773 }
 0x238   : > { %1443 = vperm.xlu1 %5802, %v7508_v21   ;;  %v1894_v49 = vmul.f32 %v6991_v33, %v1774_v8 }
 0x239   : > { %v5457_v18 = vpop.f32.mrb[48].mxu1 }
 0x23a   : > { %v2784_v10 = vadd.f32 %v5457_v18, %v7620_v44  ;;  %v2778_v25 = vpop.f32.mrb[49].mxu1  ;;  %v1958_v5 = vadd.f32 %v1894_v49, %v7385_v43 }
 0x23b   : > { %v2779_v9 = vadd.f32 %v7620_v44, %v2778_v25  ;;  %v1778_v28 = vpop.permute.xlu1 %1777 }
 0x23c   : > { %v1895_v55 = vmul.f32 %v6991_v33, %v1778_v28  ;;  %5803 = vset.pattern.permute.xlu1 %v10191_v54  ;;  %v3034_v13 = vmax.f32 %v2784_v10, 0.0 }
 0x23d   : > { %v3033_v63 = vmax.f32 %v2779_v9, 0.0  ;;  %1829 = vperm.xlu1 %5803, %v5823_v17  }
 0x23e   : > { %v1959_v30 = vadd.f32 %v1895_v55, %v1571_v58 }
 0x23f   : > { %5567 = vmatprep.mubr.msk.f32.mxu0 %vm3096_vm2, %v3033_v63 }
 0x240   : > { %v2162_v31 = vpop.permute.xlu1 %2161  ;;  %5568 = vmatmul.mubr.msk.f32.gmra.mrb[48].mxu0 %vm3096_vm2, %v3034_v13  ;;  %v2347_v57 = vadd.f32 %v2283_v59, %v1959_v30 }
 0x241   : > { %v2282_v41 = vmul.f32 %v6996_v60, %v2162_v31  ;;  %1833 = vperm.xlu1 %5803, %v7508_v21   ;;  %v484_v21 = vld [vmem:[%s6054_s26 + $0x1f8] sm:$0xff] }
 0x242   : > { %v2411_v52 = vmax.f32 %v2347_v57, 0.0 }
 0x243   : > { %v2346_v22 = vadd.f32 %v2282_v41, %v1958_v5  ;;  %v5460_v27 = vpop.f32.mrb[50].mxu1  ;;  %v2182_v5 = vpop.permute.xlu0 %2181 }
 0x244   : > { %v2794_v26 = vadd.f32 %v5460_v27, %v7620_v44  ;;  %v2788_v56 = vpop.f32.mrb[51].mxu1 }
 0x245   : > { %v2410_v1 = vmax.f32 %v2346_v22, 0.0  ;;  %v2789_v0 = vadd.f32 %v7620_v44, %v2788_v56  ;;  %5805 = vset.pattern.permute.xlu1 %v10209_v42  ;;  %v1384_v35 = vpop.permute.xlu1 %1383 }
 0x246   : > { %2217 = vperm.xlu1 %5805, %v5823_v17   ;;  %v3036_v48 = vmax.f32 %v2794_v26, 0.0  ;;  %v1509_v47 = vmul.f32 %v6981_v39, %v1384_v35  ;;  %v10337_v17 = vld [vmem:[#allocation24_spill] sm:$0xff]  ;;  %v2287_v26 = vmul.f32 %v6996_v60, %v2182_v5 }
 0x247   : > { %v3035_v43 = vmax.f32 %v2789_v0, 0.0  ;;  %5500 = vmatprep.mubr.msk.f32.mxu1 %vm2439_vm1, %v2410_v1  ;;  %v1073_v13 = vadd.f32 %v7503_v45, %v10337_v17 }
 0x248   : > { %5501 = vmatmul.mubr.msk.f32.gmra.mrb[78].mxu1 %vm2439_vm1, %v2411_v52  ;;  %v1573_v32 = vadd.f32 %v1509_v47, %v1063_v37 }
 0x249   : > { %5570 = vmatprep.mubr.msk.f32.mxu0 %vm3096_vm2, %v3035_v43 }
 0x24a   : > { %5806 = vset.pattern.permute.xlu1 %v10301_v62  ;;  %v1782_v40 = vpop.permute.xlu1 %1781  ;;  %5571 = vmatmul.mubr.msk.f32.gmra.mrb[50].mxu0 %vm3096_vm2, %v3036_v48 }
 0x24b   : > { %1453 = vperm.xlu1 %5806, %v484_v21   ;;  %v1896_v34 = vmul.f32 %v6991_v33, %v1782_v40 }
 0x24d   : > { %v1960_v51 = vadd.f32 %v1896_v34, %v7408_v2 }
 0x24e   : > { %v1786_v3 = vpop.permute.xlu1 %1785 }
 0x24f   : > { %v1897_v29 = vmul.f32 %v6991_v33, %v1786_v3  ;;  %5807 = vset.pattern.permute.xlu1 %v10191_v54 }
 0x250   : > { %1837 = vperm.xlu1 %5807, %v7518_v16  }
 0x251   : > { %v1961_v62 = vadd.f32 %v1897_v29, %v1573_v32  ;;  %v5463_v12 = vpop.f32.mrb[52].mxu1  ;;  %v10338_v32 = vld [vmem:[#allocation96_spill] sm:$0xff] }
 0x252   : > { %v2804_v23 = vadd.f32 %v5463_v12, %v7620_v44  ;;  %v2798_v8 = vpop.f32.mrb[53].mxu1  ;;  %v1083_v29 = vadd.f32 %v7503_v45, %v10338_v32 }
 0x253   : > { %v2799_v46 = vadd.f32 %v7620_v44, %v2798_v8  ;;  %v2170_v53 = vpop.permute.xlu1 %2169  ;;  %v2349_v54 = vadd.f32 %v2285_v6, %v1961_v62  ;;  %v2190_v6 = vpop.permute.xlu0 %2189 }
 0x254   : > { %v2284_v18 = vmul.f32 %v6996_v60, %v2170_v53  ;;  %1841 = vperm.xlu1 %5807, %v484_v21   ;;  %v3038_v25 = vmax.f32 %v2804_v23, 0.0 }
 0x255   : > { %v3037_v10 = vmax.f32 %v2799_v46, 0.0  ;;  %v2413_v20 = vmax.f32 %v2349_v54, 0.0 }
 0x256   : > { %v2348_v9 = vadd.f32 %v2284_v18, %v1960_v51 }
 0x257   : > { %5573 = vmatprep.mubr.msk.f32.mxu0 %vm3096_vm2, %v3037_v10 }
 0x258   : > { %v2412_v16 = vmax.f32 %v2348_v9, 0.0  ;;  %5808 = vset.pattern.permute.xlu1 %v10209_v42  ;;  %v1394_v28 = vpop.permute.xlu1 %1393  ;;  %5574 = vmatmul.mubr.msk.f32.gmra.mrb[52].mxu0 %vm3096_vm2, %v3038_v25  ;;  %v2289_v25 = vmul.f32 %v6996_v60, %v2190_v6  ;;  %v10340_v6 = vld [vmem:[#allocation99_spill] sm:$0xff] }
 0x259   : > { %2229 = vperm.xlu1 %5808, %v484_v21   ;;  %v1511_v42 = vmul.f32 %v6981_v39, %v1394_v28 }
 0x25a   : > { %5503 = vmatprep.mubr.msk.f32.mxu1 %vm2439_vm1, %v2412_v16 }
 0x25b   : > { %v5466_v2 = vpop.f32.mrb[54].mxu1  ;;  %5504 = vmatmul.mubr.msk.f32.gmra.mrb[80].mxu1 %vm2439_vm1, %v2413_v20  ;;  %v1575_v41 = vadd.f32 %v1511_v42, %v1073_v13 }
 0x25c   : > { %v2814_v58 = vadd.f32 %v5466_v2, %v7620_v44  ;;  %v2808_v55 = vpop.f32.mrb[55].mxu1 }
 0x25d   : > { %v2809_v49 = vadd.f32 %v7620_v44, %v2808_v55  ;;  %v1790_v63 = vpop.permute.xlu1 %1789 }
 0x25e   : > { %v3040_v59 = vmax.f32 %v2814_v58, 0.0  ;;  %v1898_v22 = vmul.f32 %v6991_v33, %v1790_v63 }
 0x25f   : > { %v3039_v30 = vmax.f32 %v2809_v49, 0.0 }
 0x260   : > { %v1962_v1 = vadd.f32 %v1898_v22, %v7417_v24 }
 0x261   : > { %v1794_v31 = vpop.permute.xlu1 %1793  ;;  %5576 = vmatprep.mubr.msk.f32.mxu0 %vm3096_vm2, %v3039_v30 }
 0x262   : > { %v1899_v57 = vmul.f32 %v6991_v33, %v1794_v31  ;;  %5577 = vmatmul.mubr.msk.f32.gmra.mrb[54].mxu0 %vm3096_vm2, %v3040_v59  ;;  %v10339_v59 = vld [vmem:[#allocation97_spill] sm:$0xff] }
 0x263   : > { %v1093_v31 = vadd.f32 %v7503_v45, %v10339_v59  ;;  %v10341_v59 = vld [vmem:[#allocation100_spill] sm:$0xff] }
 0x264   : > { %v1963_v27 = vadd.f32 %v1899_v57, %v1575_v41 }
 0x266   : > { %v2178_v56 = vpop.permute.xlu1 %2177  ;;  %v2351_v35 = vadd.f32 %v2287_v26, %v1963_v27 }
 0x267   : > { %v2286_v0 = vmul.f32 %v6996_v60, %v2178_v56 }
 0x268   : > { %v2415_v47 = vmax.f32 %v2351_v35, 0.0 }
 0x269   : > { %v2350_v52 = vadd.f32 %v2286_v0, %v1962_v1  ;;  %v5469_v43 = vpop.f32.mrb[56].mxu1  ;;  %v2198_v1 = vpop.permute.xlu0 %2197 }
 0x26a   : > { %v2824_v48 = vadd.f32 %v5469_v43, %v7620_v44  ;;  %v2818_v21 = vpop.f32.mrb[57].mxu1  ;;  %v2291_v0 = vmul.f32 %v6996_v60, %v2198_v1 }
 0x26b   : > { %v2414_v40 = vmax.f32 %v2350_v52, 0.0  ;;  %v2819_v50 = vadd.f32 %v7620_v44, %v2818_v21  ;;  %v1404_v37 = vpop.permute.xlu1 %1403 }
 0x26c   : > { %v3042_v11 = vmax.f32 %v2824_v48, 0.0  ;;  %v1513_v34 = vmul.f32 %v6981_v39, %v1404_v37 }
 0x26d   : > { %v3041_v3 = vmax.f32 %v2819_v50, 0.0  ;;  %5506 = vmatprep.mubr.msk.f32.mxu1 %vm2439_vm1, %v2414_v40 }
 0x26e   : > { %5507 = vmatmul.mubr.msk.f32.gmra.mrb[82].mxu1 %vm2439_vm1, %v2415_v47  ;;  %v1577_v46 = vadd.f32 %v1513_v34, %v1083_v29 }
 0x26f   : > { %5579 = vmatprep.mubr.msk.f32.mxu0 %vm3096_vm2, %v3041_v3 }
 0x270   : > { %v1798_v24 = vpop.permute.xlu1 %1797  ;;  %5580 = vmatmul.mubr.msk.f32.gmra.mrb[56].mxu0 %vm3096_vm2, %v3042_v11 }
 0x271   : > { %v1900_v18 = vmul.f32 %v6991_v33, %v1798_v24 }
 0x273   : > { %v5472_v62 = vpop.f32.mrb[58].mxu1  ;;  %v1964_v28 = vadd.f32 %v1900_v18, %v7431_v7 }
 0x274   : > { %v2834_v12 = vadd.f32 %v5472_v62, %v7620_v44  ;;  %v1802_v23 = vpop.permute.xlu1 %1801  ;;  %v2828_v8 = vpop.f32.mrb[59].mxu1 }
 0x275   : > { %v1901_v53 = vmul.f32 %v6991_v33, %v1802_v23  ;;  %v2829_v51 = vadd.f32 %v7620_v44, %v2828_v8 }
 0x276   : > { %v3044_v9 = vmax.f32 %v2834_v12, 0.0  ;;  %v1103_v12 = vadd.f32 %v7503_v45, %v10340_v6  ;;  %v2206_v45 = vpop.permute.xlu0 %2205 }
 0x277   : > { %v1965_v54 = vadd.f32 %v1901_v53, %v1577_v46  ;;  %v3043_v10 = vmax.f32 %v2829_v51, 0.0 }
 0x279   : > { %v2186_v16 = vpop.permute.xlu1 %2185  ;;  %5582 = vmatprep.mubr.msk.f32.mxu0 %vm3096_vm2, %v3043_v10  ;;  %v2353_v2 = vadd.f32 %v2289_v25, %v1965_v54 }
 0x27a   : > { %v2288_v20 = vmul.f32 %v6996_v60, %v2186_v16  ;;  %5583 = vmatmul.mubr.msk.f32.gmra.mrb[58].mxu0 %vm3096_vm2, %v3044_v9 }
 0x27b   : > { %v2417_v63 = vmax.f32 %v2353_v2, 0.0 }
 0x27c   : > { %v2352_v58 = vadd.f32 %v2288_v20, %v1964_v28  ;;  %v2293_v28 = vmul.f32 %v6996_v60, %v2206_v45 }
 0x27e   : > { %v2416_v55 = vmax.f32 %v2352_v58, 0.0  ;;  %v1414_v49 = vpop.permute.xlu1 %1413 }
 0x27f   : > { %v1515_v5 = vmul.f32 %v6981_v39, %v1414_v49 }
 0x280   : > { %5509 = vmatprep.mubr.msk.f32.mxu1 %vm2439_vm1, %v2416_v55 }
 0x281   : > { %v5475_v17 = vpop.f32.mrb[60].mxu1  ;;  %5510 = vmatmul.mubr.msk.f32.gmra.mrb[84].mxu1 %vm2439_vm1, %v2417_v63  ;;  %v1579_v27 = vadd.f32 %v1515_v5, %v1093_v31 }
 0x282   : > { %v2844_v13 = vadd.f32 %v5475_v17, %v7620_v44  ;;  %v2838_v42 = vpop.f32.mrb[61].mxu1 }
 0x283   : > { %v2839_v30 = vadd.f32 %v7620_v44, %v2838_v42  ;;  %v1806_v7 = vpop.permute.xlu1 %1805 }
 0x284   : > { %v3046_v57 = vmax.f32 %v2844_v13, 0.0  ;;  %v1902_v56 = vmul.f32 %v6991_v33, %v1806_v7  ;;  %v7818_v7 = vld [vmem:[%s9971_s5] ss:$0 sm:$0xff] }
 0x285   : > { %v3045_v41 = vmax.f32 %v2839_v30, 0.0 }
 0x286   : > { %v1966_v40 = vadd.f32 %v1902_v56, %v7446_v15 }
 0x287   : > { %v1810_v22 = vpop.permute.xlu1 %1809  ;;  %5585 = vmatprep.mubr.msk.f32.mxu0 %vm3096_vm2, %v3045_v41 }
 0x288   : > { %v1903_v26 = vmul.f32 %v6991_v33, %v1810_v22  ;;  %5586 = vmatmul.mubr.msk.f32.gmra.mrb[60].mxu0 %vm3096_vm2, %v3046_v57 }
 0x28a   : > { %v1967_v35 = vadd.f32 %v1903_v26, %v1579_v27 }
 0x28b   : > { %v5478_v52 = vpop.f32.mrb[62].mxu1 }
 0x28c   : > { %v2854_v43 = vadd.f32 %v5478_v52, %v7620_v44  ;;  %v2194_v48 = vpop.permute.xlu1 %2193  ;;  %v2848_v21 = vpop.f32.mrb[63].mxu1  ;;  %v2355_v47 = vadd.f32 %v2291_v0, %v1967_v35 }
 0x28d   : > { %v2290_v50 = vmul.f32 %v6996_v60, %v2194_v48  ;;  %v2849_v37 = vadd.f32 %v7620_v44, %v2848_v21  ;;  %v2214_v52 = vpop.permute.xlu0 %2213 }
 0x28e   : > { %v3048_v24 = vmax.f32 %v2854_v43, 0.0  ;;  %v2419_v34 = vmax.f32 %v2355_v47, 0.0  ;;  %v2295_v43 = vmul.f32 %v6996_v60, %v2214_v52 }
 0x28f   : > { %v2354_v3 = vadd.f32 %v2290_v50, %v1966_v40  ;;  %v3047_v11 = vmax.f32 %v2849_v37, 0.0 }
 0x291   : > { %v2418_v32 = vmax.f32 %v2354_v3, 0.0  ;;  %v1424_v29 = vpop.permute.xlu1 %1423  ;;  %5588 = vmatprep.mubr.msk.f32.mxu0 %vm3096_vm2, %v3047_v11 }
 0x292   : > { %5589 = vmatmul.mubr.msk.f32.gmra.mrb[62].mxu0 %vm3096_vm2, %v3048_v24  ;;  %v1517_v23 = vmul.f32 %v6981_v39, %v1424_v29  ;;  %v1123_v29 = vadd.f32 %v7818_v7, %v7388_v14  ;;  %v2222_v14 = vpop.permute.xlu0 %2221 }
 0x293   : > { %5512 = vmatprep.mubr.msk.f32.mxu1 %vm2439_vm1, %v2418_v32 }
 0x294   : > { %5513 = vmatmul.mubr.msk.f32.gmra.mrb[86].mxu1 %vm2439_vm1, %v2419_v34  ;;  %v1581_v54 = vadd.f32 %v1517_v23, %v1103_v12 }
 0x296   : > { %v1814_v15 = vpop.permute.xlu1 %1813  ;;  %v5481_v62 = vpop.f32.mrb[64].mxu1 }
 0x297   : > { %v2864_v8 = vadd.f32 %v5481_v62, %v7620_v44  ;;  %v2858_v46 = vpop.f32.mrb[65].mxu1  ;;  %v1904_v9 = vmul.f32 %v6991_v33, %v1814_v15 }
 0x298   : > { %v2859_v53 = vadd.f32 %v7620_v44, %v2858_v46 }
 0x299   : > { %v3050_v10 = vmax.f32 %v2864_v8, 0.0  ;;  %v1968_v2 = vadd.f32 %v1904_v9, %v7458_v36  ;;  %v1113_v36 = vadd.f32 %v7818_v7, %v10341_v59 }
 0x29a   : > { %v3049_v51 = vmax.f32 %v2859_v53, 0.0  ;;  %v1818_v18 = vpop.permute.xlu1 %1817 }
 0x29b   : > { %v1905_v25 = vmul.f32 %v6991_v33, %v1818_v18  ;;  %v2297_v18 = vmul.f32 %v6996_v60, %v2222_v14 }
 0x29c   : > { %5591 = vmatprep.mubr.msk.f32.mxu0 %vm3096_vm2, %v3049_v51 }
 0x29d   : > { %v1969_v16 = vadd.f32 %v1905_v25, %v1581_v54  ;;  %5592 = vmatmul.mubr.msk.f32.gmra.mrb[64].mxu0 %vm3096_vm2, %v3050_v10 }
 0x29f   : > { %v2202_v20 = vpop.permute.xlu1 %2201  ;;  %v2357_v55 = vadd.f32 %v2293_v28, %v1969_v16 }
 0x2a0   : > { %v2292_v58 = vmul.f32 %v6996_v60, %v2202_v20 }
 0x2a1   : > { %v2421_v13 = vmax.f32 %v2357_v55, 0.0 }
 0x2a2   : > { %v2356_v49 = vadd.f32 %v2292_v58, %v1968_v2  ;;  %v2226_v2 = vpop.permute.xlu0 %2225  ;;  %v7851_v58 = vld [vmem:[%s9975_s9] ss:$0 sm:$0xff] }
 0x2a4   : > { %v2420_v63 = vmax.f32 %v2356_v49, 0.0  ;;  %v1434_v17 = vpop.permute.xlu1 %1433 }
 0x2a5   : > { %v1519_v31 = vmul.f32 %v6981_v39, %v1434_v17 }
 0x2a6   : > { %5515 = vmatprep.mubr.msk.f32.mxu1 %vm2439_vm1, %v2420_v63 }
 0x2a7   : > { %5516 = vmatmul.mubr.msk.f32.gmra.mrb[88].mxu1 %vm2439_vm1, %v2421_v13  ;;  %v1583_v26 = vadd.f32 %v1519_v31, %v1113_v36  ;;  %v2298_v36 = vmul.f32 %v6996_v60, %v2226_v2 }
 0x2a9   : > { %v1822_v42 = vpop.permute.xlu1 %1821  ;;  %v5484_v30 = vpop.f32.mrb[66].mxu1 }
 0x2aa   : > { %v2874_v5 = vadd.f32 %v5484_v30, %v7620_v44  ;;  %v2868_v41 = vpop.f32.mrb[67].mxu1  ;;  %v1906_v0 = vmul.f32 %v6991_v33, %v1822_v42 }
 0x2ab   : > { %v2869_v57 = vadd.f32 %v7620_v44, %v2868_v41  ;;  %v1133_v41 = vadd.f32 %v7818_v7, %v7398_v61 }
 0x2ac   : > { %v3052_v56 = vmax.f32 %v2874_v5, 0.0  ;;  %v1970_v21 = vadd.f32 %v1906_v0, %v7471_v38 }
 0x2ad   : > { %v3051_v22 = vmax.f32 %v2869_v57, 0.0  ;;  %v1826_v27 = vpop.permute.xlu1 %1825 }
 0x2ae   : > { %v1907_v1 = vmul.f32 %v6991_v33, %v1826_v27 }
 0x2af   : > { %5594 = vmatprep.mubr.msk.f32.mxu0 %vm3096_vm2, %v3051_v22 }
 0x2b0   : > { %v1971_v35 = vadd.f32 %v1907_v1, %v1583_v26  ;;  %5595 = vmatmul.mubr.msk.f32.gmra.mrb[66].mxu0 %vm3096_vm2, %v3052_v56 }
 0x2b2   : > { %v2210_v48 = vpop.permute.xlu1 %2209  ;;  %v2359_v50 = vadd.f32 %v2295_v43, %v1971_v35 }
 0x2b3   : > { %v2294_v40 = vmul.f32 %v6996_v60, %v2210_v48 }
 0x2b4   : > { %v2423_v11 = vmax.f32 %v2359_v50, 0.0 }
 0x2b5   : > { %v2358_v37 = vadd.f32 %v2294_v40, %v1970_v21 }
 0x2b7   : > { %v2422_v47 = vmax.f32 %v2358_v37, 0.0  ;;  %v1444_v3 = vpop.permute.xlu1 %1443 }
 0x2b8   : > { %v1521_v34 = vmul.f32 %v6981_v39, %v1444_v3 }
 0x2b9   : > { %5518 = vmatprep.mubr.msk.f32.mxu1 %vm2439_vm1, %v2422_v47 }
 0x2ba   : > { %5519 = vmatmul.mubr.msk.f32.gmra.mrb[90].mxu1 %vm2439_vm1, %v2423_v11  ;;  %v1585_v23 = vadd.f32 %v1521_v34, %v1123_v29 }
 0x2bc   : > { %v1830_v24 = vpop.permute.xlu1 %1829  ;;  %v5487_v32 = vpop.f32.mrb[68].mxu1 }
 0x2bd   : > { %v2884_v38 = vadd.f32 %v5487_v32, %v7620_v44  ;;  %v2878_v15 = vpop.f32.mrb[69].mxu1  ;;  %v1908_v53 = vmul.f32 %v6991_v33, %v1830_v24 }
 0x2be   : > { %v2879_v62 = vadd.f32 %v7620_v44, %v2878_v15 }
 0x2bf   : > { %v3054_v8 = vmax.f32 %v2884_v38, 0.0  ;;  %v1972_v10 = vadd.f32 %v1908_v53, %v7485_v4 }
 0x2c0   : > { %v3053_v6 = vmax.f32 %v2879_v62, 0.0  ;;  %v1834_v12 = vpop.permute.xlu1 %1833 }
 0x2c1   : > { %v1909_v46 = vmul.f32 %v6991_v33, %v1834_v12 }
 0x2c2   : > { %5597 = vmatprep.mubr.msk.f32.mxu0 %vm3096_vm2, %v3053_v6 }
 0x2c3   : > { %v1973_v51 = vadd.f32 %v1909_v46, %v1585_v23  ;;  %5598 = vmatmul.mubr.msk.f32.gmra.mrb[68].mxu0 %vm3096_vm2, %v3054_v8 }
 0x2c5   : > { %v2218_v54 = vpop.permute.xlu1 %2217  ;;  %v2361_v9 = vadd.f32 %v2297_v18, %v1973_v51 }
 0x2c6   : > { %v2296_v25 = vmul.f32 %v6996_v60, %v2218_v54 }
 0x2c7   : > { %v2425_v20 = vmax.f32 %v2361_v9, 0.0 }
 0x2c8   : > { %v2360_v16 = vadd.f32 %v2296_v25, %v1972_v10 }
 0x2ca   : > { %v2424_v45 = vmax.f32 %v2360_v16, 0.0  ;;  %v1454_v28 = vpop.permute.xlu1 %1453 }
 0x2cb   : > { %v1523_v57 = vmul.f32 %v6981_v39, %v1454_v28 }
 0x2cc   : > { %5521 = vmatprep.mubr.msk.f32.mxu1 %vm2439_vm1, %v2424_v45 }
 0x2cd   : > { %5522 = vmatmul.mubr.msk.f32.gmra.mrb[92].mxu1 %vm2439_vm1, %v2425_v20  ;;  %v5545_v17 = vpop.f32.mrb[32].mxu0  ;;  %v1587_v7 = vadd.f32 %v1523_v57, %v1133_v41 }
 0x2ce   : > { %v7856_v42 = vadd.f32 %v5545_v17, %v7851_v58  ;;  %v3355_v59 = vpop.f32.mrb[33].mxu0 }
 0x2cf   : > { %v1838_v55 = vpop.permute.xlu1 %1837  ;;  %v5490_v49 = vpop.f32.mrb[70].mxu1  ;;  %v7862_v5 = vadd.f32 %v7851_v58, %v3355_v59 }
 0x2d0   : > { %v1910_v4 = vmul.f32 %v6991_v33, %v1838_v55  ;;  %v2894_v63 = vadd.f32 %v5490_v49, %v7620_v44  ;;  %v2888_v13 = vpop.f32.mrb[71].mxu1 }
 0x2d1   : > { %v2889_v30 = vadd.f32 %v7620_v44, %v2888_v13  ;;  %10342 = vst [vmem:[#allocation11_spill] sm:$0xff] %v7862_v5  ;;  %v5548_v56 = vpop.f32.mrb[34].mxu0 }
 0x2d2   : > { %v1974_v31 = vadd.f32 %v1910_v4, %v7498_v19  ;;  %v3056_v0 = vmax.f32 %v2894_v63, 0.0  ;;  %v7870_v52 = vadd.f32 %v5548_v56, %v7851_v58  ;;  %v3365_v19 = vpop.f32.mrb[35].mxu0 }
 0x2d3   : > { %v3055_v27 = vmax.f32 %v2889_v30, 0.0  ;;  %v1842_v26 = vpop.permute.xlu1 %1841  ;;  %v7874_v48 = vadd.f32 %v7851_v58, %v3365_v19 }
 0x2d4   : > { %v2362_v1 = vadd.f32 %v2298_v36, %v1974_v31  ;;  %10343 = vst [vmem:[#allocation90_spill] sm:$0xff] %v7870_v52  ;;  %v1911_v43 = vmul.f32 %v6991_v33, %v1842_v26 }
 0x2d5   : > { %5600 = vmatprep.mubr.msk.f32.mxu0 %vm3096_vm2, %v3055_v27  ;;  %v5551_v40 = vpop.f32.mrb[36].mxu0 }
 0x2d6   : > { %v2426_v39 = vmax.f32 %v2362_v1, 0.0  ;;  %5601 = vmatmul.mubr.msk.f32.gmra.mrb[70].mxu0 %vm3096_vm2, %v3056_v0  ;;  %v7881_v50 = vadd.f32 %v5551_v40, %v7851_v58  ;;  %v3375_v33 = vpop.f32.mrb[37].mxu0  ;;  %v1975_v47 = vadd.f32 %v1911_v43, %v1587_v7  ;;  %v7942_v7 = vld [vmem:[%s9973_s7] ss:$0 sm:$0xff] }
 0x2d7   : > { %v7886_v11 = vadd.f32 %v7851_v58, %v3375_v33 }
 0x2d8   : > { %v2230_v37 = vpop.permute.xlu1 %2229  ;;  %5524 = vmatprep.mubr.msk.f32.mxu1 %vm2439_vm1, %v2426_v39 }
 0x2d9   : > { %v2299_v3 = vmul.f32 %v6996_v60, %v2230_v37  ;;  %v5554_v34 = vpop.f32.mrb[38].mxu0 }
 0x2da   : > { %v7891_v38 = vadd.f32 %v5554_v34, %v7851_v58  ;;  %v3385_v15 = vpop.f32.mrb[39].mxu0 }
 0x2db   : > { %v2363_v32 = vadd.f32 %v2299_v3, %v1975_v47  ;;  %v7894_v6 = vadd.f32 %v7851_v58, %v3385_v15 }
 0x2dd   : > { %v2427_v62 = vmax.f32 %v2363_v32, 0.0 }
 0x2df   : > { %5525 = vmatmul.mubr.msk.f32.gmra.mrb[94].mxu1 %vm2439_vm1, %v2427_v62 }
 0x2e1   : > { %v5557_v53 = vpop.f32.mrb[40].mxu0 }
 0x2e2   : > { %v5493_v23 = vpop.f32.mrb[72].mxu1  ;;  %v7902_v14 = vadd.f32 %v5557_v53, %v7851_v58  ;;  %v3395_v18 = vpop.f32.mrb[41].mxu0 }
 0x2e3   : > { %v2904_v8 = vadd.f32 %v5493_v23, %v7620_v44  ;;  %v2898_v46 = vpop.f32.mrb[73].mxu1  ;;  %v7905_v54 = vadd.f32 %v7851_v58, %v3395_v18 }
 0x2e4   : > { %v2899_v51 = vadd.f32 %v7620_v44, %v2898_v46 }
 0x2e5   : > { %10344 = vst [vmem:[#allocation19_spill] sm:$0xff] %v7905_v54  ;;  %v3058_v9 = vmax.f32 %v2904_v8, 0.0 }
 0x2e6   : > { %v3057_v10 = vmax.f32 %v2899_v51, 0.0 }
 0x2e8   : > { %5603 = vmatprep.mubr.msk.f32.mxu0 %vm3096_vm2, %v3057_v10 }
 0x2e9   : > { %5604 = vmatmul.mubr.msk.f32.gmra.mrb[72].mxu0 %vm3096_vm2, %v3058_v9 }
 0x2ed   : > { %v5560_v45 = vpop.f32.mrb[42].mxu0 }
 0x2ee   : > { %v7912_v28 = vadd.f32 %v5560_v45, %v7851_v58  ;;  %v3405_v20 = vpop.f32.mrb[43].mxu0 }
 0x2ef   : > { %v7915_v2 = vadd.f32 %v7851_v58, %v3405_v20 }
 0x2f5   : > { %v5496_v4 = vpop.f32.mrb[74].mxu1 }
 0x2f6   : > { %v2914_v63 = vadd.f32 %v5496_v4, %v7620_v44  ;;  %v2908_v17 = vpop.f32.mrb[75].mxu1 }
 0x2f7   : > { %v2909_v13 = vadd.f32 %v7620_v44, %v2908_v17 }
 0x2f8   : > { %v3060_v59 = vmax.f32 %v2914_v63, 0.0 }
 0x2f9   : > { %v3059_v30 = vmax.f32 %v2909_v13, 0.0 }
 0x2fb   : > { %v5563_v36 = vpop.f32.mrb[44].mxu0  ;;  %5606 = vmatprep.mubr.msk.f32.mxu0 %vm3096_vm2, %v3059_v30 }
 0x2fc   : > { %v7923_v31 = vadd.f32 %v5563_v36, %v7851_v58  ;;  %v3415_v41 = vpop.f32.mrb[45].mxu0  ;;  %5607 = vmatmul.mubr.msk.f32.gmra.mrb[74].mxu0 %vm3096_vm2, %v3060_v59 }
 0x2fd   : > { %v7927_v57 = vadd.f32 %v7851_v58, %v3415_v41 }
 0x305   : > { %v5566_v56 = vpop.f32.mrb[46].mxu0 }
 0x306   : > { %v7932_v44 = vadd.f32 %v5566_v56, %v7851_v58  ;;  %v3425_v1 = vpop.f32.mrb[47].mxu0 }
 0x307   : > { %v7935_v0 = vadd.f32 %v7851_v58, %v3425_v1 }
 0x308   : > { %v5499_v43 = vpop.f32.mrb[76].mxu1 }
 0x309   : > { %v2924_v40 = vadd.f32 %v7942_v7, %v5499_v43  ;;  %v2918_v37 = vpop.f32.mrb[77].mxu1 }
 0x30a   : > { %v2919_v33 = vadd.f32 %v7942_v7, %v2918_v37 }
 0x30b   : > { %v3062_v3 = vmax.f32 %v2924_v40, 0.0 }
 0x30c   : > { %v3061_v47 = vmax.f32 %v2919_v33, 0.0 }
 0x30e   : > { %5609 = vmatprep.mubr.msk.f32.mxu0 %vm3096_vm2, %v3061_v47 }
 0x30f   : > { %5610 = vmatmul.mubr.msk.f32.gmra.mrb[76].mxu0 %vm3096_vm2, %v3062_v3 }
 0x313   : > { %v5569_v32 = vpop.f32.mrb[48].mxu0 }
 0x314   : > { %v7949_v34 = vadd.f32 %v5569_v32, %v7851_v58  ;;  %v3435_v15 = vpop.f32.mrb[49].mxu0 }
 0x315   : > { %v7952_v62 = vadd.f32 %v7851_v58, %v3435_v15 }
 0x31b   : > { %v5502_v46 = vpop.f32.mrb[78].mxu1 }
 0x31c   : > { %v2934_v53 = vadd.f32 %v7942_v7, %v5502_v46  ;;  %v2928_v51 = vpop.f32.mrb[79].mxu1 }
 0x31d   : > { %v2929_v18 = vadd.f32 %v7942_v7, %v2928_v51  ;;  %v5572_v10 = vpop.f32.mrb[50].mxu0 }
 0x31e   : > { %v7959_v9 = vadd.f32 %v5572_v10, %v7851_v58  ;;  %v3445_v45 = vpop.f32.mrb[51].mxu0  ;;  %v3064_v63 = vmax.f32 %v2934_v53, 0.0 }
 0x31f   : > { %v3063_v20 = vmax.f32 %v2929_v18, 0.0  ;;  %v7962_v4 = vadd.f32 %v7851_v58, %v3445_v45 }
 0x321   : > { %5612 = vmatprep.mubr.msk.f32.mxu0 %vm3096_vm2, %v3063_v20 }
 0x322   : > { %5613 = vmatmul.mubr.msk.f32.gmra.mrb[78].mxu0 %vm3096_vm2, %v3064_v63 }
 0x32b   : > { %v5575_v30 = vpop.f32.mrb[52].mxu0 }
 0x32c   : > { %v7969_v59 = vadd.f32 %v5575_v30, %v7851_v58  ;;  %v3455_v36 = vpop.f32.mrb[53].mxu0 }
 0x32d   : > { %v7972_v41 = vadd.f32 %v7851_v58, %v3455_v36 }
 0x32e   : > { %v5505_v1 = vpop.f32.mrb[80].mxu1 }
 0x32f   : > { %v2944_v40 = vadd.f32 %v7942_v7, %v5505_v1  ;;  %v2938_v37 = vpop.f32.mrb[81].mxu1 }
 0x330   : > { %v2939_v33 = vadd.f32 %v7942_v7, %v2938_v37 }
 0x331   : > { %v3066_v3 = vmax.f32 %v2944_v40, 0.0 }
 0x332   : > { %v3065_v47 = vmax.f32 %v2939_v33, 0.0 }
 0x334   : > { %5615 = vmatprep.mubr.msk.f32.mxu0 %vm3096_vm2, %v3065_v47 }
 0x335   : > { %v5578_v32 = vpop.f32.mrb[54].mxu0  ;;  %5616 = vmatmul.mubr.msk.f32.gmra.mrb[80].mxu0 %vm3096_vm2, %v3066_v3 }
 0x336   : > { %v7981_v15 = vadd.f32 %v5578_v32, %v7851_v58  ;;  %v3465_v46 = vpop.f32.mrb[55].mxu0 }
 0x337   : > { %v7984_v53 = vadd.f32 %v7851_v58, %v3465_v46 }
 0x341   : > { %v5508_v10 = vpop.f32.mrb[82].mxu1 }
 0x342   : > { %v2954_v45 = vadd.f32 %v7942_v7, %v5508_v10  ;;  %v2948_v20 = vpop.f32.mrb[83].mxu1 }
 0x343   : > { %v2949_v63 = vadd.f32 %v7942_v7, %v2948_v20  ;;  %v5581_v30 = vpop.f32.mrb[56].mxu0 }
 0x344   : > { %v7991_v36 = vadd.f32 %v5581_v30, %v7851_v58  ;;  %v3475_v1 = vpop.f32.mrb[57].mxu0  ;;  %v3068_v33 = vmax.f32 %v2954_v45, 0.0 }
 0x345   : > { %v3067_v40 = vmax.f32 %v2949_v63, 0.0  ;;  %v7994_v37 = vadd.f32 %v7851_v58, %v3475_v1 }
 0x347   : > { %5618 = vmatprep.mubr.msk.f32.mxu0 %vm3096_vm2, %v3067_v40 }
 0x348   : > { %5619 = vmatmul.mubr.msk.f32.gmra.mrb[82].mxu0 %vm3096_vm2, %v3068_v33 }
 0x34d   : > { %v5584_v32 = vpop.f32.mrb[58].mxu0 }
 0x34e   : > { %v8001_v46 = vadd.f32 %v5584_v32, %v7851_v58  ;;  %v3485_v10 = vpop.f32.mrb[59].mxu0 }
 0x34f   : > { %v8004_v20 = vadd.f32 %v7851_v58, %v3485_v10 }
 0x350   : > { %10345 = vst [vmem:[#allocation15_spill] sm:$0xff] %v8001_v46 }
 0x351   : > { %10346 = vst [vmem:[#allocation22_spill] sm:$0xff] %v8004_v20 }
 0x354   : > { %v5511_v30 = vpop.f32.mrb[84].mxu1 }
 0x355   : > { %v2964_v1 = vadd.f32 %v7942_v7, %v5511_v30  ;;  %v2958_v47 = vpop.f32.mrb[85].mxu1 }
 0x356   : > { %v2959_v40 = vadd.f32 %v7942_v7, %v2958_v47 }
 0x357   : > { %v3070_v33 = vmax.f32 %v2964_v1, 0.0 }
 0x358   : > { %v3069_v3 = vmax.f32 %v2959_v40, 0.0 }
 0x35a   : > { %5621 = vmatprep.mubr.msk.f32.mxu0 %vm3096_vm2, %v3069_v3 }
 0x35b   : > { %v5587_v32 = vpop.f32.mrb[60].mxu0  ;;  %5622 = vmatmul.mubr.msk.f32.gmra.mrb[84].mxu0 %vm3096_vm2, %v3070_v33 }
 0x35c   : > { %v8013_v10 = vadd.f32 %v5587_v32, %v7851_v58  ;;  %v3495_v51 = vpop.f32.mrb[61].mxu0 }
 0x35d   : > { %v8016_v63 = vadd.f32 %v7851_v58, %v3495_v51 }
 0x35e   : > { %10347 = vst [vmem:[#allocation87_spill] sm:$0xff] %v8013_v10 }
 0x35f   : > { %10348 = vst [vmem:[#allocation14_spill] sm:$0xff] %v8016_v63  ;;  %v10467_v63 = vmax.f32 (!%p5112_p6), %v7874_v48, 0.0 }
 0x365   : > { %v5590_v18 = vpop.f32.mrb[62].mxu0 }
 0x366   : > { %v8021_v47 = vadd.f32 %v5590_v18, %v7851_v58  ;;  %v3505_v1 = vpop.f32.mrb[63].mxu0 }
 0x367   : > { %v8024_v3 = vadd.f32 %v7851_v58, %v3505_v1  ;;  %v5514_v40 = vpop.f32.mrb[86].mxu1 }
 0x368   : > { %10349 = vst [vmem:[#allocation12_spill] sm:$0xff] %v8021_v47  ;;  %v2974_v32 = vadd.f32 %v7942_v7, %v5514_v40  ;;  %v2968_v56 = vpop.f32.mrb[87].mxu1  ;;  %v10465_v47 = vmax.f32 (!%p5112_p6), %v7862_v5, 0.0  ;;  %v10469_v5 = vld [vmem:[#allocation58_spill] sm:$0xff] (!%p5112_p6) }
 0x369   : > { %10350 = vst [vmem:[#allocation93_spill] sm:$0xff] %v8024_v3  ;;  %v2969_v45 = vadd.f32 %v7942_v7, %v2968_v56  ;;  %v10466_v3 = vmax.f32 (!%p5112_p6), %v7856_v42, 0.0 }
 0x36a   : > { %v3072_v30 = vmax.f32 %v2974_v32, 0.0 }
 0x36b   : > { %v3071_v43 = vmax.f32 %v2969_v45, 0.0 }
 0x36d   : > { %5624 = vmatprep.mubr.msk.f32.mxu0 %vm3096_vm2, %v3071_v43 }
 0x36e   : > { %5625 = vmatmul.mubr.msk.f32.gmra.mrb[86].mxu0 %vm3096_vm2, %v3072_v30 }
 0x370   : > { %v5593_v18 = vpop.f32.mrb[64].mxu0 }
 0x371   : > { %v8033_v1 = vadd.f32 %v5593_v18, %v7851_v58  ;;  %v3515_v17 = vpop.f32.mrb[65].mxu0 }
 0x372   : > { %v8036_v33 = vadd.f32 %v7851_v58, %v3515_v17 }
 0x373   : > { %10351 = vst [vmem:[#allocation13_spill] sm:$0xff] %v8033_v1  ;;  %v10460_v1 = vld [vmem:[#allocation57_spill] sm:$0xff] (!%p5112_p6) }
 0x374   : > { %10352 = vst [vmem:[#allocation91_spill] sm:$0xff] %v8036_v33  ;;  %v10522_v33 = vmax.f32 (!%p5112_p6), %v7962_v4, 0.0 }
 0x37a   : > { %v5517_v13 = vpop.f32.mrb[88].mxu1 }
 0x37b   : > { %v2984_v56 = vadd.f32 %v7942_v7, %v5517_v13  ;;  %v2978_v45 = vpop.f32.mrb[89].mxu1 }
 0x37c   : > { %v2979_v43 = vadd.f32 %v7942_v7, %v2978_v45 }
 0x37d   : > { %v3074_v30 = vmax.f32 %v2984_v56, 0.0 }
 0x37e   : > { %v3073_v32 = vmax.f32 %v2979_v43, 0.0 }
 0x380   : > { %5627 = vmatprep.mubr.msk.f32.mxu0 %vm3096_vm2, %v3073_v32 }
 0x381   : > { %5628 = vmatmul.mubr.msk.f32.gmra.mrb[88].mxu0 %vm3096_vm2, %v3074_v30 }
 0x383   : > { %v5596_v18 = vpop.f32.mrb[66].mxu0 }
 0x384   : > { %v8045_v17 = vadd.f32 %v5596_v18, %v7851_v58  ;;  %v3525_v23 = vpop.f32.mrb[67].mxu0 }
 0x385   : > { %v8048_v40 = vadd.f32 %v7851_v58, %v3525_v23 }
 0x386   : > { %10353 = vst [vmem:[#allocation88_spill] sm:$0xff] %v8045_v17  ;;  %v10450_v17 = vld [vmem:[#allocation55_spill] sm:$0xff] (!%p5112_p6) }
 0x387   : > { %10354 = vst [vmem:[#allocation16_spill] sm:$0xff] %v8048_v40  ;;  %v10455_v40 = vld [vmem:[#allocation56_spill] sm:$0xff] (!%p5112_p6) }
 0x38d   : > { %v5520_v8 = vpop.f32.mrb[90].mxu1 }
 0x38e   : > { %v2994_v45 = vadd.f32 %v7942_v7, %v5520_v8  ;;  %v2988_v56 = vpop.f32.mrb[91].mxu1 }
 0x38f   : > { %v2989_v43 = vadd.f32 %v7942_v7, %v2988_v56 }
 0x390   : > { %v3076_v30 = vmax.f32 %v2994_v45, 0.0 }
 0x391   : > { %v3075_v32 = vmax.f32 %v2989_v43, 0.0 }
 0x393   : > { %5630 = vmatprep.mubr.msk.f32.mxu0 %vm3096_vm2, %v3075_v32 }
 0x394   : > { %5631 = vmatmul.mubr.msk.f32.gmra.mrb[90].mxu0 %vm3096_vm2, %v3076_v30 }
 0x396   : > { %v5599_v18 = vpop.f32.mrb[68].mxu0 }
 0x397   : > { %v8057_v23 = vadd.f32 %v5599_v18, %v7851_v58  ;;  %v3535_v19 = vpop.f32.mrb[69].mxu0 }
 0x398   : > { %v8060_v51 = vadd.f32 %v7851_v58, %v3535_v19 }
 0x399   : > { %10355 = vst [vmem:[#allocation92_spill] sm:$0xff] %v8057_v23  ;;  %v10440_v23 = vld [vmem:[#allocation53_spill] sm:$0xff] (!%p5112_p6) }
 0x39a   : > { %10356 = vst [vmem:[#allocation89_spill] sm:$0xff] %v8060_v51  ;;  %v10445_v51 = vld [vmem:[#allocation54_spill] sm:$0xff] (!%p5112_p6) }
 0x3a0   : > { %v5523_v39 = vpop.f32.mrb[92].mxu1 }
 0x3a1   : > { %v3004_v56 = vadd.f32 %v7942_v7, %v5523_v39  ;;  %v2998_v45 = vpop.f32.mrb[93].mxu1 }
 0x3a2   : > { %v2999_v43 = vadd.f32 %v7942_v7, %v2998_v45 }
 0x3a3   : > { %v3078_v30 = vmax.f32 %v3004_v56, 0.0 }
 0x3a4   : > { %v3077_v32 = vmax.f32 %v2999_v43, 0.0 }
 0x3a6   : > { %5633 = vmatprep.mubr.msk.f32.mxu0 %vm3096_vm2, %v3077_v32 }
 0x3a7   : > { %5634 = vmatmul.mubr.msk.f32.gmra.mrb[92].mxu0 %vm3096_vm2, %v3078_v30 }
 0x3a9   : > { %v5602_v18 = vpop.f32.mrb[70].mxu0 }
 0x3aa   : > { %v8069_v19 = vadd.f32 %v5602_v18, %v7851_v58  ;;  %v3545_v27 = vpop.f32.mrb[71].mxu0 }
 0x3ab   : > { %v8072_v13 = vadd.f32 %v7851_v58, %v3545_v27 }
 0x3ac   : > { %10357 = vst [vmem:[#allocation94_spill] sm:$0xff] %v8069_v19  ;;  %v10438_v19 = vld [vmem:[#allocation51_spill] sm:$0xff] (!%p5112_p6) }
 0x3ad   : > { %10358 = vst [vmem:[#allocation20_spill] sm:$0xff] %v8072_v13  ;;  %v10439_v13 = vld [vmem:[#allocation52_spill] sm:$0xff] (!%p5112_p6) }
 0x3b2   : > { %v5526_v26 = vpop.f32.mrb[94].mxu1 }
 0x3b3   : > { %v3014_v45 = vadd.f32 %v7942_v7, %v5526_v26  ;;  %v3008_v56 = vpop.f32.mrb[95].mxu1 }
 0x3b4   : > { %v3009_v43 = vadd.f32 %v7942_v7, %v3008_v56 }
 0x3b5   : > { %v3080_v30 = vmax.f32 %v3014_v45, 0.0 }
 0x3b6   : > { %v3079_v32 = vmax.f32 %v3009_v43, 0.0 }
 0x3b8   : > { %5636 = vmatprep.mubr.msk.f32.mxu0 %vm3096_vm2, %v3079_v32 }
 0x3b9   : > { %5637 = vmatmul.mubr.msk.f32.gmra.mrb[94].mxu0 %vm3096_vm2, %v3080_v30 }
 0x3bc   : > { %v5605_v18 = vpop.f32.mrb[72].mxu0 }
 0x3bd   : > { %v8081_v27 = vadd.f32 %v5605_v18, %v7851_v58  ;;  %v3555_v55 = vpop.f32.mrb[73].mxu0 }
 0x3be   : > { %v8084_v8 = vadd.f32 %v7851_v58, %v3555_v55 }
 0x3bf   : > { %10359 = vst [vmem:[#allocation17_spill] sm:$0xff] %v8081_v27  ;;  %v10432_v27 = vld [vmem:[#allocation49_spill] sm:$0xff] (!%p5112_p6) }
 0x3c0   : > { %10360 = vst [vmem:[#allocation95_spill] sm:$0xff] %v8084_v8  ;;  %v10433_v8 = vld [vmem:[#allocation50_spill] sm:$0xff] (!%p5112_p6) }
 0x3cf   : > { %v5608_v49 = vpop.f32.mrb[74].mxu0 }
 0x3d0   : > { %v8089_v7 = vadd.f32 %v5608_v49, %v7851_v58  ;;  %v3565_v45 = vpop.f32.mrb[75].mxu0 }
 0x3d1   : > { %v8092_v56 = vadd.f32 %v7851_v58, %v3565_v45 }
 0x3d2   : > { %10361 = vst [vmem:[#allocation23_spill] sm:$0xff] %v8089_v7  ;;  %v10427_v7 = vld [vmem:[#allocation47_spill] sm:$0xff] (!%p5112_p6) }
 0x3d3   : > { %10362 = vst [vmem:[#allocation98_spill] sm:$0xff] %v8092_v56  ;;  %v10431_v56 = vld [vmem:[#allocation48_spill] sm:$0xff] (!%p5112_p6) }
 0x3e2   : > { %v5611_v30 = vpop.f32.mrb[76].mxu0 }
 0x3e3   : > { %v8097_v55 = vadd.f32 %v5611_v30, %v7851_v58  ;;  %v3575_v18 = vpop.f32.mrb[77].mxu0 }
 0x3e4   : > { %v8100_v39 = vadd.f32 %v7851_v58, %v3575_v18 }
 0x3e5   : > { %10363 = vst [vmem:[#allocation21_spill] sm:$0xff] %v8097_v55  ;;  %v10425_v55 = vld [vmem:[#allocation45_spill] sm:$0xff] (!%p5112_p6) }
 0x3e6   : > { %10364 = vst [vmem:[#allocation18_spill] sm:$0xff] %v8100_v39  ;;  %v10426_v39 = vld [vmem:[#allocation46_spill] sm:$0xff] (!%p5112_p6) }
 0x3f5   : > { %v5614_v25 = vpop.f32.mrb[78].mxu0 }
 0x3f6   : > { %v8105_v45 = vadd.f32 %v5614_v25, %v7851_v58  ;;  %v3585_v16 = vpop.f32.mrb[79].mxu0 }
 0x3f7   : > { %v8108_v43 = vadd.f32 %v7851_v58, %v3585_v16 }
 0x3f8   : > { %10365 = vst [vmem:[#allocation24_spill] sm:$0xff] %v8105_v45  ;;  %v10420_v45 = vld [vmem:[#allocation43_spill] sm:$0xff] (!%p5112_p6) }
 0x3f9   : > { %10366 = vst [vmem:[#allocation96_spill] sm:$0xff] %v8108_v43  ;;  %v10421_v43 = vld [vmem:[#allocation44_spill] sm:$0xff] (!%p5112_p6) }
 0x408   : > { %v5617_v12 = vpop.f32.mrb[80].mxu0 }
 0x409   : > { %v8113_v18 = vadd.f32 %v5617_v12, %v7851_v58  ;;  %v3595_v60 = vpop.f32.mrb[81].mxu0 }
 0x40a   : > { %v8116_v26 = vadd.f32 %v7851_v58, %v3595_v60 }
 0x40b   : > { %10367 = vst [vmem:[#allocation97_spill] sm:$0xff] %v8113_v18  ;;  %v10408_v18 = vmov (!%p5112_p6), 0 }
 0x40c   : > { %10368 = vst [vmem:[#allocation99_spill] sm:$0xff] %v8116_v26  ;;  %v10414_v26 = vld [vmem:[#allocation41_spill] sm:$0xff] (!%p5112_p6) }
 0x41b   : > { %v5620_v24 = vpop.f32.mrb[82].mxu0 }
 0x41c   : > { %v8121_v16 = vadd.f32 %v5620_v24, %v7851_v58  ;;  %v3605_v61 = vpop.f32.mrb[83].mxu0 }
 0x41d   : > { %v8124_v32 = vadd.f32 %v7851_v58, %v3605_v61 }
 0x41e   : > { %10369 = vst [vmem:[#allocation100_spill] sm:$0xff] %v8121_v16 }
 0x41f   : > { %10370 = vst [vmem:[#allocation101_spill] sm:$0xff] %v8124_v32 }
 0x42e   : > { %v5623_v29 = vpop.f32.mrb[84].mxu0 }
 0x42f   : > { %v8129_v60 = vadd.f32 %v5623_v29, %v7851_v58  ;;  %v3615_v21 = vpop.f32.mrb[85].mxu0  ;;  %v10386_v29 = vld [vmem:[#allocation33_spill] sm:$0xff] (!%p5112_p6) }
 0x430   : > { %v8132_v49 = vadd.f32 %v7851_v58, %v3615_v21 }
 0x431   : > { %10371 = vst [vmem:[#allocation102_spill] sm:$0xff] %v8129_v60 }
 0x432   : > { %10372 = vst [vmem:[#allocation103_spill] sm:$0xff] %v8132_v49 }
 0x441   : > { %v5626_v22 = vpop.f32.mrb[86].mxu0 }
 0x442   : > { %v8137_v61 = vadd.f32 %v5626_v22, %v7851_v58  ;;  %v3625_v35 = vpop.f32.mrb[87].mxu0 }
 0x443   : > { %v8140_v30 = vadd.f32 %v7851_v58, %v3625_v35 }
 0x444   : > { %10373 = vst [vmem:[#allocation104_spill] sm:$0xff] %v8137_v61 }
 0x445   : > { %10374 = vst [vmem:[#allocation105_spill] sm:$0xff] %v8140_v30 }
 0x454   : > { %v5629_v16 = vpop.f32.mrb[88].mxu0 }
 0x455   : > { %v8145_v21 = vadd.f32 %v5629_v16, %v7851_v58  ;;  %v3635_v32 = vpop.f32.mrb[89].mxu0 }
 0x456   : > { %v8148_v25 = vadd.f32 %v7851_v58, %v3635_v32 }
 0x457   : > { %10375 = vst [vmem:[#allocation106_spill] sm:$0xff] %v8145_v21  ;;  %v10388_v21 = vld [vmem:[#allocation35_spill] sm:$0xff] (!%p5112_p6) }
 0x458   : > { %10376 = vst [vmem:[#allocation107_spill] sm:$0xff] %v8148_v25 }
 0x467   : > { %v5632_v60 = vpop.f32.mrb[90].mxu0 }
 0x468   : > { %v8153_v35 = vadd.f32 %v5632_v60, %v7851_v58  ;;  %v3645_v49 = vpop.f32.mrb[91].mxu0  ;;  %v8183_v60 = vstv (!%p5112_p6), %s6339_s17 }
 0x469   : > { %v8156_v12 = vadd.f32 %v7851_v58, %v3645_v49  ;;  %vm3950_vm14 = vcmp.lt.s32.totalorder (!%p5112_p6), %v10386_v29, %v8183_v60  ;;  %vm3952_vm15 = vcmp.lt.s32.totalorder (!%p5112_p6), %v10388_v21, %v8183_v60 }
 0x46a   : > { %10377 = vst [vmem:[#allocation108_spill] sm:$0xff] %v8153_v35  ;;  %v10477_v35 = vmax.f32 (!%p5112_p6), %v7894_v6, 0.0 }
 0x46b   : > { %10378 = vst [vmem:[#allocation109_spill] sm:$0xff] %v8156_v12  ;;  %v10475_v12 = vmax.f32 (!%p5112_p6), %v7881_v50, 0.0 }
 0x47a   : > { %v5635_v61 = vpop.f32.mrb[92].mxu0 }
 0x47b   : > { %v8161_v32 = vadd.f32 %v5635_v61, %v7851_v58  ;;  %v3655_v24 = vpop.f32.mrb[93].mxu0  ;;  %v10387_v61 = vld [vmem:[#allocation34_spill] sm:$0xff] (!%p5112_p6) }
 0x47c   : > { %v8164_v22 = vadd.f32 %v7851_v58, %v3655_v24  ;;  %v8180_v24 = vstv (!%p5112_p6), %s6334_s13  ;;  %vm3951_vm12 = vcmp.lt.s32.totalorder (!%p5112_p6), %v10387_v61, %v8183_v60 }
 0x47d   : > { %10379 = vst [vmem:[#allocation110_spill] sm:$0xff] %v8161_v32  ;;  %vm3886_vm7 = vcmp.ge.s32.totalorder (!%p5112_p6), %v10387_v61, %v8180_v24  ;;  %v10391_v32 = vld [vmem:[#allocation38_spill] sm:$0xff] (!%p5112_p6)  ;;  %v10405_v61 = vmov (!%p5112_p6), 0 }
 0x47e   : > { %10380 = vst [vmem:[#allocation111_spill] sm:$0xff] %v8164_v22 }
 0x48a   : > { %3880 = sbr.rel (%p5112_p6) target bundleno = 1270 (0x4f6), region = 64 }
 0x48c   : > { %v5638_v25 = vpop.f32.mrb[94].mxu0 }
 0x48d   : > { %v8169_v49 = vadd.f32 %v5638_v25, %v7851_v58  ;;  %v3665_v30 = vpop.f32.mrb[95].mxu0  ;;  %v10383_v25 = vld [vmem:[#allocation30_spill] sm:$0xff] (!%p5112_p6) }
 0x48e   : > { %v8172_v16 = vadd.f32 %v7851_v58, %v3665_v30  ;;  %vm3882_vm3 = vcmp.ge.s32.totalorder (!%p5112_p6), %v10383_v25, %v8180_v24  ;;  %v10384_v58 = vld [vmem:[#allocation31_spill] sm:$0xff] (!%p5112_p6)  ;;  %v10385_v30 = vld [vmem:[#allocation32_spill] sm:$0xff] (!%p5112_p6)  ;;  %vm3947_vm9 = vcmp.lt.s32.totalorder (!%p5112_p6), %v10383_v25, %v8183_v60 }
 0x48f   : > { %10381 = vst [vmem:[#allocation112_spill] sm:$0xff] %v8169_v49  ;;  %vm3883_vm4 = vcmp.ge.s32.totalorder (!%p5112_p6), %v10384_v58, %v8180_v24  ;;  %vm3884_vm5 = vcmp.ge.s32.totalorder (!%p5112_p6), %v10385_v30, %v8180_v24  ;;  %vm3948_vm10 = vcmp.lt.s32.totalorder (!%p5112_p6), %v10384_v58, %v8183_v60  ;;  %vm3949_vm11 = vcmp.lt.s32.totalorder (!%p5112_p6), %v10385_v30, %v8183_v60  ;;  %v10389_v49 = vld [vmem:[#allocation36_spill] sm:$0xff] (!%p5112_p6)  ;;  %vm8224_vm6 = vmand (!%p5112_p6), %vm3882_vm3, %vm3947_vm9  ;;  %v10400_v58 = vld [vmem:[#allocation39_spill] sm:$0xff] (!%p5112_p6) }
 0x490   : > { %10382 = vst [vmem:[#allocation113_spill] sm:$0xff] %v8172_v16  ;;  %vm3953_vm0 = vcmp.lt.s32.totalorder (!%p5112_p6), %v10389_v49, %v8183_v60  ;;  %v10390_v16 = vld [vmem:[#allocation37_spill] sm:$0xff] (!%p5112_p6)  ;;  %vm8231_vm1 = vmand (!%p5112_p6), %vm3883_vm4, %vm3948_vm10  ;;  %vm3956_vm9 = vcmp.lt.s32.totalorder (!%p5112_p6), %v10400_v58, %v8183_v60  ;;  %vm10401_vm10 = vcmp.ge.s32.totalorder (!%p5112_p6), %v10386_v29, %v8180_v24  ;;  %v10410_v29 = vld [vmem:[#allocation40_spill] sm:$0xff] (!%p5112_p6)  ;;  %v10486_v30 = vmax.f32 (!%p5112_p6), %v7905_v54, 0.0 }
 0x491   : > { %vm3954_vm2 = vcmp.lt.s32.totalorder %v10390_v16, %v8183_v60  ;;  %vm8238_vm8 = vmand %vm3884_vm5, %vm3949_vm11  ;;  %vm10404_vm11 = vcmp.ge.s32.totalorder %v10388_v21, %v8180_v24  ;;  %vm10411_vm13 = vcmp.ge.s32.totalorder %v10390_v16, %v8180_v24  ;;  %v10412_v21 = vmov 0  ;;  %v10419_v16 = vld [vmem:[#allocation42_spill] sm:$0xff]  ;;  %v10496_v54 = vld [vmem:[#allocation61_spill] sm:$0xff] }
 0x492   : > { %vm8245_vm3 = vmand %vm3886_vm7, %vm3951_vm12  ;;  %vm10407_vm12 = vcmp.ge.s32.totalorder %v10389_v49, %v8180_v24  ;;  %v4204_v10 = vsel %vm8231_vm1, %v10466_v3, -inf  ;;  %v4205_v46 = vsel %vm8238_vm8, %v10467_v63, -inf  ;;  %v10474_v63 = vmax.f32 %v7870_v52, 0.0  ;;  %v10481_v52 = vld [vmem:[#allocation59_spill] sm:$0xff] }
 0x493   : > { %vm8256_vm5 = vmand %vm10401_vm10, %vm3950_vm14  ;;  %vm3957_vm10 = vcmp.lt.s32.totalorder %v10410_v29, %v8183_v60  ;;  %vm10416_vm14 = vcmp.ge.s32.totalorder %v10391_v32, %v8180_v24 }
 0x494   : > { %vm8263_vm7 = vmand %vm10404_vm11, %vm3952_vm15  ;;  %vm10441_vm11 = vcmp.lt.s32.totalorder %v10419_v16, %v8183_v60  ;;  %v4206_v3 = vsel %vm8256_vm5, %v10474_v63, -inf  ;;  %vm3974_vm5 = vcmp.lt.s32.totalorder %v10460_v1, %v8183_v60  ;;  %v10492_v63 = vmax.f32 %v7902_v14, 0.0 }
 0x495   : > { %v10406_v61 = vsel %vm8263_vm7, 4294967295, %v10405_v61  ;;  %vm8270_vm4 = vmand %vm10407_vm12, %vm3953_vm0  ;;  %vm10415_vm12 = vcmp.lt.s32.totalorder %v10391_v32, %v8183_v60 }
 0x496   : > { %v10409_v18 = vsel %vm8270_vm4, 4294967295, %v10408_v18  ;;  %vm8281_vm15 = vmand %vm10411_vm13, %vm3954_vm2  ;;  %vm10428_vm13 = vcmp.ge.s32.totalorder %v10410_v29, %v8180_v24  ;;  %v10436_v29 = vmov 0  ;;  %vm10461_vm2 = vcmp.lt.s32.totalorder %v10426_v39, %v8183_v60 }
 0x497   : > { %v10413_v21 = vsel %vm8281_vm15, 4294967295, %v10412_v21  ;;  %vm8295_vm4 = vmand %vm10416_vm14, %vm10415_vm12  ;;  %vm10422_vm15 = vcmp.ge.s32.totalorder %v10400_v58, %v8180_v24  ;;  %vm10434_vm14 = vcmp.lt.s32.totalorder %v10414_v26, %v8183_v60  ;;  %vm3970_vm12 = vcmp.lt.s32.totalorder %v10440_v23, %v8183_v60 }
 0x498   : > { %vm8310_vm7 = vmand %vm10422_vm15, %vm3956_vm9  ;;  %vm3909_vm9 = vcmp.ge.s32.totalorder %v10460_v1, %v8180_v24  ;;  %vm10476_vm8 = vnez %v10406_v61  ;;  %v4211_v61 = vsel %vm8295_vm4, %v10486_v30, -inf  ;;  %v10501_v58 = vmax.f32 %v7927_v57, 0.0 }
 0x499   : > { %vm8325_vm0 = vmand %vm10428_vm13, %vm3957_vm10  ;;  %vm10435_vm10 = vcmp.ge.s32.totalorder %v10414_v26, %v8180_v24  ;;  %v10443_v26 = vmov 0  ;;  %v4208_v22 = vsel %vm10476_vm8, %v10475_v12, -inf  ;;  %vm10482_vm8 = vcmp.lt.s32.totalorder %v10431_v56, %v8183_v60 }
 0x49a   : > { %vm8343_vm13 = vmand %vm10435_vm10, %vm10434_vm14  ;;  %vm10442_vm14 = vcmp.ge.s32.totalorder %v10419_v16, %v8180_v24  ;;  %v10448_v16 = vmov 0  ;;  %v4212_v49 = vsel %vm8310_vm7, %v10492_v63, -inf  ;;  %v10493_v12 = vmax.f32 %v7915_v2, 0.0 }
 0x49b   : > { %v10437_v29 = vsel %vm8343_vm13, 4294967295, %v10436_v29  ;;  %vm8361_vm10 = vmand %vm10442_vm14, %vm10441_vm11  ;;  %vm10446_vm13 = vcmp.lt.s32.totalorder %v10420_v45, %v8183_v60  ;;  %vm10447_vm11 = vcmp.ge.s32.totalorder %v10420_v45, %v8180_v24  ;;  %v10453_v45 = vmov 0 }
 0x49c   : > { %v10444_v26 = vsel %vm8361_vm10, 4294967295, %v10443_v26  ;;  %vm8379_vm14 = vmand %vm10447_vm11, %vm10446_vm13  ;;  %vm10451_vm13 = vcmp.lt.s32.totalorder %v10421_v43, %v8183_v60  ;;  %vm10452_vm11 = vcmp.ge.s32.totalorder %v10421_v43, %v8180_v24  ;;  %vm10462_vm10 = vcmp.ge.s32.totalorder %v10426_v39, %v8180_v24 }
 0x49d   : > { %v10449_v16 = vsel %vm8379_vm14, 4294967295, %v10448_v16  ;;  %vm8399_vm14 = vmand %vm10452_vm11, %vm10451_vm13  ;;  %vm10456_vm13 = vcmp.lt.s32.totalorder %v10425_v55, %v8183_v60  ;;  %vm10457_vm11 = vcmp.ge.s32.totalorder %v10425_v55, %v8180_v24  ;;  %v4203_v55 = vsel %vm8224_vm6, %v10465_v47, -inf }
 0x49e   : > { %v10454_v45 = vsel %vm8399_vm14, 4294967295, %v10453_v45  ;;  %vm8419_vm14 = vmand %vm10457_vm11, %vm10456_vm13  ;;  %v10468_v39 = vmax.f32 %v7886_v11, 0.0  ;;  %vm10470_vm6 = vcmp.lt.s32.totalorder %v10427_v7, %v8183_v60  ;;  %vm10480_vm13 = vnez %v10413_v21  ;;  %v10487_v21 = vld [vmem:[#allocation60_spill] sm:$0xff] }
 0x49f   : > { %vm8431_vm15 = vmand %vm10462_vm10, %vm10461_vm2  ;;  %vm10471_vm10 = vcmp.ge.s32.totalorder %v10427_v7, %v8180_v24  ;;  %v10479_v7 = vmax.f32 %v7891_v38, 0.0  ;;  %vm10495_vm4 = vnez %v10437_v29  ;;  %vm10498_vm7 = vcmp.ge.s32.totalorder %v10433_v8, %v8180_v24 }
 0x4a0   : > { %v4207_v20 = vsel %vm8245_vm3, %v10468_v39, -inf  ;;  %vm8459_vm1 = vmand %vm10471_vm10, %vm10470_vm6  ;;  %vm10478_vm3 = vnez %v10409_v18  ;;  %vm3975_vm6 = vcmp.lt.s32.totalorder %v10469_v5, %v8183_v60  ;;  %vm10488_vm10 = vcmp.lt.s32.totalorder %v10432_v27, %v8183_v60 }
 0x4a1   : > { %v4209_v25 = vsel %vm10478_vm3, %v10477_v35, -inf  ;;  %v4210_v39 = vsel %vm10480_vm13, %v10479_v7, -inf  ;;  %vm10483_vm3 = vcmp.ge.s32.totalorder %v10431_v56, %v8180_v24  ;;  %v4213_v35 = vsel %vm8325_vm0, %v10493_v12, -inf  ;;  %v10503_v12 = vld [vmem:[#allocation62_spill] sm:$0xff] }
 0x4a2   : > { %vm8493_vm2 = vmand %vm10483_vm3, %vm10482_vm8  ;;  %vm10489_vm8 = vcmp.ge.s32.totalorder %v10432_v27, %v8180_v24  ;;  %v10494_v7 = vmax.f32 %v7912_v28, 0.0  ;;  %v4267_v27 = vmax.f32 %v4203_v55, %v4207_v20  ;;  %vm10502_vm0 = vnez %v10444_v26 }
 0x4a3   : > { %vm8511_vm3 = vmand %vm10489_vm8, %vm10488_vm10  ;;  %vm10497_vm8 = vcmp.lt.s32.totalorder %v10433_v8, %v8183_v60  ;;  %v4215_v29 = vsel %vm10502_vm0, %v10501_v58, -inf  ;;  %v4268_v63 = vmax.f32 %v4204_v10, %v4208_v22  ;;  %v4269_v20 = vmax.f32 %v4205_v46, %v4209_v25  ;;  %v10513_v25 = vld [vmem:[#allocation63_spill] sm:$0xff]  ;;  %v10519_v58 = vld [vmem:[#allocation64_spill] sm:$0xff] }
 0x4a4   : > { %v4214_v30 = vsel %vm10495_vm4, %v10494_v7, -inf  ;;  %vm8535_vm13 = vmand %vm10498_vm7, %vm10497_vm8  ;;  %v4270_v55 = vmax.f32 %v4206_v3, %v4210_v39  ;;  %vm10504_vm10 = vcmp.lt.s32.totalorder %v10438_v19, %v8183_v60  ;;  %vm10505_vm8 = vcmp.ge.s32.totalorder %v10438_v19, %v8180_v24 }
 0x4a5   : > { %vm8551_vm7 = vmand %vm10505_vm8, %vm10504_vm10  ;;  %v10508_v7 = vmax.f32 %v7923_v31, 0.0  ;;  %vm10509_vm0 = vnez %v10449_v16  ;;  %v10510_v46 = vmax.f32 %v7935_v0, 0.0  ;;  %vm10511_vm11 = vnez %v10454_v45 }
 0x4a6   : > { %v10512_v3 = vmax.f32 %v7932_v44, 0.0  ;;  %v4271_v19 = vmax.f32 %v4267_v27, %v4211_v61  ;;  %vm3915_vm10 = vcmp.ge.s32.totalorder %v10513_v25, %v8180_v24  ;;  %vm10514_vm8 = vcmp.lt.s32.totalorder %v10439_v13, %v8183_v60 }
 0x4a7   : > { %v4216_v10 = vsel %vm10509_vm0, %v10508_v7, -inf  ;;  %v4217_v26 = vsel %vm10511_vm11, %v10510_v46, -inf  ;;  %vm10515_vm0 = vcmp.ge.s32.totalorder %v10439_v13, %v8180_v24  ;;  %v10518_v45 = vmax.f32 %v7952_v62, 0.0 }
 0x4a8   : > { %v4218_v22 = vsel %vm8419_vm14, %v10512_v3, -inf  ;;  %vm8575_vm4 = vmand %vm10515_vm0, %vm10514_vm8  ;;  %v4272_v39 = vmax.f32 %v4268_v63, %v4212_v49  ;;  %v4273_v61 = vmax.f32 %v4269_v20, %v4213_v35  ;;  %v4274_v27 = vmax.f32 %v4270_v55, %v4214_v30 }
 0x4a9   : > { %v4219_v43 = vsel %vm8431_vm15, %v10518_v45, -inf  ;;  %vm3916_vm14 = vcmp.ge.s32.totalorder %v10519_v58, %v8180_v24  ;;  %vm10520_vm11 = vcmp.ge.s32.totalorder %v10440_v23, %v8180_v24  ;;  %v10521_v13 = vmax.f32 %v7949_v34, 0.0  ;;  %v10536_v45 = vld [vmem:[#allocation22_spill] sm:$0xff] }
 0x4aa   : > { %vm4034_vm8 = vmand %vm10520_vm11, %vm3970_vm12  ;;  %v4221_v49 = vsel %vm8493_vm2, %v10522_v33, -inf  ;;  %v10523_v35 = vmax.f32 %v7959_v9, 0.0  ;;  %v4275_v63 = vmax.f32 %v4271_v19, %v4215_v29  ;;  %vm10524_vm15 = vcmp.lt.s32.totalorder %v10445_v51, %v8183_v60 }
 0x4ab   : > { %v4220_v7 = vsel %vm8459_vm1, %v10521_v13, -inf  ;;  %vm10525_vm12 = vcmp.ge.s32.totalorder %v10445_v51, %v8180_v24  ;;  %v10526_v23 = vmax.f32 %v7972_v41, 0.0  ;;  %v4276_v18 = vmax.f32 %v4272_v39, %v4216_v10 }
 0x4ac   : > { %v4222_v30 = vsel %vm8511_vm3, %v10523_v35, -inf  ;;  %vm4035_vm0 = vmand %vm10525_vm12, %vm10524_vm15  ;;  %v4277_v20 = vmax.f32 %v4273_v61, %v4217_v26  ;;  %v4278_v55 = vmax.f32 %v4274_v27, %v4218_v22  ;;  %vm10527_vm2 = vcmp.lt.s32.totalorder %v10450_v17, %v8183_v60  ;;  %v10539_v27 = vld [vmem:[#allocation15_spill] sm:$0xff] }
 0x4ad   : > { %v4223_v47 = vsel %vm8535_vm13, %v10526_v23, -inf  ;;  %vm10528_vm1 = vcmp.ge.s32.totalorder %v10450_v17, %v8180_v24  ;;  %v10529_v56 = vmax.f32 %v7969_v59, 0.0  ;;  %v10530_v29 = vmax.f32 %v7984_v53, 0.0  ;;  %v10547_v23 = vld [vmem:[#allocation87_spill] sm:$0xff] }
 0x4ae   : > { %vm4036_vm3 = vmand %vm10528_vm1, %vm10527_vm2  ;;  %v10531_v10 = vmax.f32 %v7981_v15, 0.0  ;;  %v4279_v26 = vmax.f32 %v4275_v63, %v4219_v43  ;;  %vm10532_vm13 = vcmp.lt.s32.totalorder %v10455_v40, %v8183_v60  ;;  %vm10533_vm11 = vcmp.ge.s32.totalorder %v10455_v40, %v8180_v24 }
 0x4af   : > { %v4224_v51 = vsel %vm8551_vm7, %v10529_v56, -inf  ;;  %v4225_v32 = vsel %vm8575_vm4, %v10530_v29, -inf  ;;  %vm4037_vm15 = vmand %vm10533_vm11, %vm10532_vm13  ;;  %v10534_v17 = vmax.f32 %v7994_v37, 0.0  ;;  %v4280_v3 = vmax.f32 %v4276_v18, %v4220_v7 }
 0x4b0   : > { %v4226_v46 = vsel %vm4034_vm8, %v10531_v10, -inf  ;;  %v4281_v22 = vmax.f32 %v4277_v20, %v4221_v49  ;;  %v4282_v19 = vmax.f32 %v4278_v55, %v4222_v30  ;;  %vm3978_vm4 = vcmp.lt.s32.totalorder %v10496_v54, %v8183_v60  ;;  %vm4038_vm7 = vmand %vm3909_vm9, %vm3974_vm5  ;;  %v10554_v10 = vld [vmem:[#allocation12_spill] sm:$0xff] }
 0x4b1   : > { %v4227_v8 = vsel %vm4035_vm0, %v10534_v17, -inf  ;;  %v10535_v16 = vmax.f32 %v7991_v36, 0.0  ;;  %v10537_v43 = vmax.f32 %v10536_v45, 0.0  ;;  %v4283_v61 = vmax.f32 %v4279_v26, %v4223_v47 }
 0x4b2   : > { %vm10538_vm8 = vcmp.ge.s32.totalorder %v10469_v5, %v8180_v24  ;;  %v10540_v13 = vmax.f32 %v10539_v27, 0.0  ;;  %v4284_v33 = vmax.f32 %v4280_v3, %v4224_v51  ;;  %v4285_v1 = vmax.f32 %v4281_v22, %v4225_v32  ;;  %v10543_v5 = vld [vmem:[#allocation14_spill] sm:$0xff] }
 0x4b3   : > { %v4228_v40 = vsel %vm4036_vm3, %v10535_v16, -inf  ;;  %v4229_v39 = vsel %vm4037_vm15, %v10537_v43, -inf  ;;  %vm4039_vm12 = vmand %vm10538_vm8, %vm3975_vm6  ;;  %v4286_v49 = vmax.f32 %v4282_v19, %v4226_v46  ;;  %vm3979_vm9 = vcmp.lt.s32.totalorder %v10503_v12, %v8183_v60  ;;  %v10559_v16 = vld [vmem:[#allocation67_spill] sm:$0xff] }
 0x4b4   : > { %v4230_v7 = vsel %vm4038_vm7, %v10540_v13, -inf  ;;  %vm3980_vm5 = vcmp.lt.s32.totalorder %v10513_v25, %v8183_v60  ;;  %vm10541_vm0 = vcmp.lt.s32.totalorder %v10481_v52, %v8183_v60  ;;  %vm10542_vm2 = vcmp.ge.s32.totalorder %v10481_v52, %v8180_v24  ;;  %v10549_v52 = vld [vmem:[#allocation65_spill] sm:$0xff] }
 0x4b5   : > { %vm4040_vm1 = vmand %vm10542_vm2, %vm10541_vm0  ;;  %v10544_v35 = vmax.f32 %v10543_v5, 0.0  ;;  %v4287_v63 = vmax.f32 %v4283_v61, %v4227_v8  ;;  %vm10545_vm6 = vcmp.lt.s32.totalorder %v10487_v21, %v8183_v60  ;;  %vm10546_vm3 = vcmp.ge.s32.totalorder %v10487_v21, %v8180_v24  ;;  %v10551_v21 = vld [vmem:[#allocation93_spill] sm:$0xff]  ;;  %v10556_v8 = vld [vmem:[#allocation66_spill] sm:$0xff] }
 0x4b6   : > { %vm4041_vm13 = vmand %vm10546_vm3, %vm10545_vm6  ;;  %v10548_v47 = vmax.f32 %v10547_v23, 0.0  ;;  %v4288_v20 = vmax.f32 %v4284_v33, %v4228_v40  ;;  %v4289_v55 = vmax.f32 %v4285_v1, %v4229_v39  ;;  %v4290_v56 = vmax.f32 %v4286_v49, %v4230_v7  ;;  %v10560_v40 = vld [vmem:[#allocation13_spill] sm:$0xff]  ;;  %v10562_v39 = vld [vmem:[#allocation68_spill] sm:$0xff] }
 0x4b7   : > { %v4231_v30 = vsel %vm4039_vm12, %v10544_v35, -inf  ;;  %vm3917_vm11 = vcmp.ge.s32.totalorder %v10549_v52, %v8180_v24  ;;  %vm3981_vm15 = vcmp.lt.s32.totalorder %v10519_v58, %v8183_v60  ;;  %vm10550_vm7 = vcmp.ge.s32.totalorder %v10496_v54, %v8180_v24  ;;  %vm4044_vm6 = vmand %vm3915_vm10, %vm3980_vm5  ;;  %v10563_v61 = vld [vmem:[#allocation16_spill] sm:$0xff]  ;;  %v10565_v7 = vld [vmem:[#allocation69_spill] sm:$0xff] }
 0x4b8   : > { %v4232_v18 = vsel %vm4040_vm1, %v10548_v47, -inf  ;;  %vm4042_vm8 = vmand %vm10550_vm7, %vm3978_vm4  ;;  %v10552_v51 = vmax.f32 %v10551_v21, 0.0  ;;  %v4291_v32 = vmax.f32 %v4287_v63, %v4231_v30  ;;  %vm3982_vm12 = vcmp.lt.s32.totalorder %v10549_v52, %v8183_v60  ;;  %v10566_v33 = vld [vmem:[#allocation88_spill] sm:$0xff]  ;;  %v10568_v35 = vld [vmem:[#allocation70_spill] sm:$0xff] }
 0x4b9   : > { %vm10553_vm0 = vcmp.ge.s32.totalorder %v10503_v12, %v8180_v24  ;;  %v10555_v46 = vmax.f32 %v10554_v10, 0.0  ;;  %v4292_v17 = vmax.f32 %v4288_v20, %v4232_v18  ;;  %vm3918_vm4 = vcmp.ge.s32.totalorder %v10556_v8, %v8180_v24  ;;  %v10557_v12 = vld [vmem:[#allocation91_spill] sm:$0xff]  ;;  %vm4046_vm7 = vmand %vm3917_vm11, %vm3982_vm12  ;;  %v10569_v30 = vld [vmem:[#allocation89_spill] sm:$0xff] }
 0x4ba   : > { %v4233_v29 = vsel %vm4041_vm13, %v10552_v51, -inf  ;;  %vm4043_vm2 = vmand %vm10553_vm0, %vm3979_vm9  ;;  %vm3983_vm1 = vcmp.lt.s32.totalorder %v10556_v8, %v8183_v60  ;;  %v10558_v3 = vmax.f32 %v10557_v12, 0.0  ;;  %vm3919_vm9 = vcmp.ge.s32.totalorder %v10559_v16, %v8180_v24  ;;  %v10571_v18 = vld [vmem:[#allocation71_spill] sm:$0xff]  ;;  %v10572_v20 = vld [vmem:[#allocation92_spill] sm:$0xff] }
 0x4bb   : > { %v4234_v26 = vsel %vm4042_vm8, %v10555_v46, -inf  ;;  %v4293_v54 = vmax.f32 %v4289_v55, %v4233_v29  ;;  %vm3984_vm3 = vcmp.lt.s32.totalorder %v10559_v16, %v8183_v60  ;;  %vm4045_vm13 = vmand %vm3916_vm14, %vm3981_vm15  ;;  %v10561_v25 = vmax.f32 %v10560_v40, 0.0  ;;  %v10574_v21 = vld [vmem:[#allocation72_spill] sm:$0xff]  ;;  %v10577_v46 = vld [vmem:[#allocation73_spill] sm:$0xff] }
 0x4bc   : > { %v4235_v22 = vsel %vm4043_vm2, %v10558_v3, -inf  ;;  %v4294_v19 = vmax.f32 %v4290_v56, %v4234_v26  ;;  %vm3920_vm10 = vcmp.ge.s32.totalorder %v10562_v39, %v8180_v24  ;;  %vm3985_vm5 = vcmp.lt.s32.totalorder %v10562_v39, %v8183_v60  ;;  %vm4047_vm8 = vmand %vm3918_vm4, %vm3983_vm1  ;;  %v10575_v51 = vld [vmem:[#allocation20_spill] sm:$0xff]  ;;  %v10578_v26 = vld [vmem:[#allocation94_spill] sm:$0xff] }
 0x4bd   : > { %v4236_v45 = vsel %vm4044_vm6, %v10561_v25, -inf  ;;  %v4295_v43 = vmax.f32 %v4291_v32, %v4235_v22  ;;  %v10564_v58 = vmax.f32 %v10563_v61, 0.0  ;;  %vm3921_vm14 = vcmp.ge.s32.totalorder %v10565_v7, %v8180_v24  ;;  %vm4048_vm0 = vmand %vm3919_vm9, %vm3984_vm3  ;;  %v10580_v12 = vld [vmem:[#allocation74_spill] sm:$0xff]  ;;  %v10581_v3 = vld [vmem:[#allocation95_spill] sm:$0xff] }
 0x4be   : > { %v4296_v13 = vmax.f32 %v4292_v17, %v4236_v45  ;;  %vm3986_vm15 = vcmp.lt.s32.totalorder %v10565_v7, %v8183_v60  ;;  %v10567_v1 = vmax.f32 %v10566_v33, 0.0  ;;  %vm3922_vm11 = vcmp.ge.s32.totalorder %v10568_v35, %v8180_v24  ;;  %vm4049_vm1 = vmand %vm3920_vm10, %vm3985_vm5  ;;  %v10583_v40 = vld [vmem:[#allocation75_spill] sm:$0xff]  ;;  %v10584_v25 = vld [vmem:[#allocation17_spill] sm:$0xff] }
 0x4bf   : > { %v4237_v27 = vsel %vm4045_vm13, %v10564_v58, -inf  ;;  %vm3987_vm12 = vcmp.lt.s32.totalorder %v10568_v35, %v8183_v60  ;;  %v10570_v63 = vmax.f32 %v10569_v30, 0.0  ;;  %vm3923_vm2 = vcmp.ge.s32.totalorder %v10571_v18, %v8180_v24  ;;  %vm4050_vm3 = vmand %vm3921_vm14, %vm3986_vm15  ;;  %v10586_v61 = vld [vmem:[#allocation76_spill] sm:$0xff]  ;;  %v10587_v58 = vld [vmem:[#allocation98_spill] sm:$0xff] }
 0x4c0   : > { %v4238_v49 = vsel %vm4046_vm7, %v10567_v1, -inf  ;;  %v4297_v5 = vmax.f32 %v4293_v54, %v4237_v27  ;;  %vm3988_vm4 = vcmp.lt.s32.totalorder %v10571_v18, %v8183_v60  ;;  %v10573_v55 = vmax.f32 %v10572_v20, 0.0  ;;  %vm4051_vm5 = vmand %vm3922_vm11, %vm3987_vm12  ;;  %v10589_v33 = vld [vmem:[#allocation77_spill] sm:$0xff]  ;;  %v10590_v1 = vld [vmem:[#allocation23_spill] sm:$0xff] }
 0x4c1   : > { %v4239_v23 = vsel %vm4047_vm8, %v10570_v63, -inf  ;;  %v4298_v47 = vmax.f32 %v4294_v19, %v4238_v49  ;;  %vm3924_vm6 = vcmp.ge.s32.totalorder %v10574_v21, %v8180_v24  ;;  %vm3989_vm9 = vcmp.lt.s32.totalorder %v10574_v21, %v8183_v60  ;;  %vm4052_vm15 = vmand %vm3923_vm2, %vm3988_vm4  ;;  %v10592_v30 = vld [vmem:[#allocation78_spill] sm:$0xff]  ;;  %v10595_v20 = vld [vmem:[#allocation79_spill] sm:$0xff] }
 0x4c2   : > { %v4240_v56 = vsel %vm4048_vm0, %v10573_v55, -inf  ;;  %v4299_v52 = vmax.f32 %v4295_v43, %v4239_v23  ;;  %v10576_v29 = vmax.f32 %v10575_v51, 0.0  ;;  %vm3925_vm13 = vcmp.ge.s32.totalorder %v10577_v46, %v8180_v24  ;;  %vm4053_vm12 = vmand %vm3924_vm6, %vm3989_vm9  ;;  %v10593_v63 = vld [vmem:[#allocation18_spill] sm:$0xff]  ;;  %v10596_v55 = vld [vmem:[#allocation21_spill] sm:$0xff] }
 0x4c3   : > { %v4300_v10 = vmax.f32 %v4296_v13, %v4240_v56  ;;  %vm3990_vm10 = vcmp.lt.s32.totalorder %v10577_v46, %v8183_v60  ;;  %v10579_v17 = vmax.f32 %v10578_v26, 0.0  ;;  %vm3926_vm7 = vcmp.ge.s32.totalorder %v10580_v12, %v8180_v24  ;;  %v10598_v51 = vld [vmem:[#allocation80_spill] sm:$0xff]  ;;  %v10601_v26 = vld [vmem:[#allocation81_spill] sm:$0xff] }
 0x4c4   : > { %v4241_v32 = vsel %vm4049_vm1, %v10576_v29, -inf  ;;  %vm3991_vm14 = vcmp.lt.s32.totalorder %v10580_v12, %v8183_v60  ;;  %v10582_v22 = vmax.f32 %v10581_v3, 0.0  ;;  %vm3927_vm8 = vcmp.ge.s32.totalorder %v10583_v40, %v8180_v24  ;;  %vm4054_vm4 = vmand %vm3925_vm13, %vm3990_vm10  ;;  %v10599_v29 = vld [vmem:[#allocation96_spill] sm:$0xff]  ;;  %v10604_v3 = vld [vmem:[#allocation25_spill] sm:$0xff] }
 0x4c5   : > { %v4242_v54 = vsel %vm4050_vm3, %v10579_v17, -inf  ;;  %v4301_v8 = vmax.f32 %v4297_v5, %v4241_v32  ;;  %vm3992_vm11 = vcmp.lt.s32.totalorder %v10583_v40, %v8183_v60  ;;  %v10585_v45 = vmax.f32 %v10584_v25, 0.0  ;;  %vm4055_vm9 = vmand %vm3926_vm7, %vm3991_vm14  ;;  %v10602_v17 = vld [vmem:[#allocation24_spill] sm:$0xff]  ;;  %v10607_v25 = vld [vmem:[#allocation26_spill] sm:$0xff] }
 0x4c6   : > { %v4243_v19 = vsel %vm4051_vm5, %v10582_v22, -inf  ;;  %v4302_v16 = vmax.f32 %v4298_v47, %v4242_v54  ;;  %vm3928_vm0 = vcmp.ge.s32.totalorder %v10586_v61, %v8180_v24  ;;  %vm3993_vm2 = vcmp.lt.s32.totalorder %v10586_v61, %v8183_v60  ;;  %vm4056_vm10 = vmand %vm3927_vm8, %vm3992_vm11  ;;  %v10605_v22 = vld [vmem:[#allocation99_spill] sm:$0xff] }
 0x4c7   : > { %v4244_v43 = vsel %vm4052_vm15, %v10585_v45, -inf  ;;  %v4303_v39 = vmax.f32 %v4299_v52, %v4243_v19  ;;  %v10588_v27 = vmax.f32 %v10587_v58, 0.0  ;;  %vm3929_vm1 = vcmp.ge.s32.totalorder %v10589_v33, %v8180_v24  ;;  %vm4057_vm14 = vmand %vm3928_vm0, %vm3993_vm2  ;;  %v10608_v45 = vld [vmem:[#allocation97_spill] sm:$0xff]  ;;  %v10610_v58 = vld [vmem:[#allocation27_spill] sm:$0xff] }
 0x4c8   : > { %v4304_v7 = vmax.f32 %v4300_v10, %v4244_v43  ;;  %vm3994_vm6 = vcmp.lt.s32.totalorder %v10589_v33, %v8183_v60  ;;  %v10591_v49 = vmax.f32 %v10590_v1, 0.0  ;;  %vm3930_vm3 = vcmp.ge.s32.totalorder %v10592_v30, %v8180_v24  ;;  %v10613_v1 = vld [vmem:[#allocation28_spill] sm:$0xff] }
 0x4c9   : > { %v4245_v13 = vsel %vm4053_vm12, %v10588_v27, -inf  ;;  %vm3995_vm13 = vcmp.lt.s32.totalorder %v10592_v30, %v8183_v60  ;;  %v10594_v23 = vmax.f32 %v10593_v63, 0.0  ;;  %vm3931_vm5 = vcmp.ge.s32.totalorder %v10595_v20, %v8180_v24  ;;  %vm4058_vm11 = vmand %vm3929_vm1, %vm3994_vm6  ;;  %v10611_v27 = vld [vmem:[#allocation101_spill] sm:$0xff] }
 0x4ca   : > { %v4246_v5 = vsel %vm4054_vm4, %v10591_v49, -inf  ;;  %v4305_v35 = vmax.f32 %v4301_v8, %v4245_v13  ;;  %vm3996_vm7 = vcmp.lt.s32.totalorder %v10595_v20, %v8183_v60  ;;  %v10597_v56 = vmax.f32 %v10596_v55, 0.0  ;;  %vm4059_vm2 = vmand %vm3930_vm3, %vm3995_vm13  ;;  %v10614_v49 = vld [vmem:[#allocation100_spill] sm:$0xff]  ;;  %v10616_v63 = vld [vmem:[#allocation29_spill] sm:$0xff] }
 0x4cb   : > { %v4247_v47 = vsel %vm4055_vm9, %v10594_v23, -inf  ;;  %v4306_v18 = vmax.f32 %v4302_v16, %v4246_v5  ;;  %vm3932_vm15 = vcmp.ge.s32.totalorder %v10598_v51, %v8180_v24  ;;  %vm3997_vm8 = vcmp.lt.s32.totalorder %v10598_v51, %v8183_v60  ;;  %vm4060_vm6 = vmand %vm3931_vm5, %vm3996_vm7  ;;  %v10617_v23 = vld [vmem:[#allocation103_spill] sm:$0xff]  ;;  %v10619_v55 = vld [vmem:[#allocation82_spill] sm:$0xff] }
 0x4cc   : > { %v4248_v52 = vsel %vm4056_vm10, %v10597_v56, -inf  ;;  %v4307_v21 = vmax.f32 %v4303_v39, %v4247_v47  ;;  %v10600_v32 = vmax.f32 %v10599_v29, 0.0  ;;  %vm3933_vm12 = vcmp.ge.s32.totalorder %v10601_v26, %v8180_v24  ;;  %vm4061_vm13 = vmand %vm3932_vm15, %vm3997_vm8  ;;  %v10620_v56 = vld [vmem:[#allocation102_spill] sm:$0xff]  ;;  %v10622_v29 = vld [vmem:[#allocation83_spill] sm:$0xff] }
 0x4cd   : > { %v4308_v46 = vmax.f32 %v4304_v7, %v4248_v52  ;;  %vm3998_vm0 = vcmp.lt.s32.totalorder %v10601_v26, %v8183_v60  ;;  %v10603_v54 = vmax.f32 %v10602_v17, 0.0  ;;  %vm3934_vm4 = vcmp.ge.s32.totalorder %v10604_v3, %v8180_v24  ;;  %v10625_v17 = vld [vmem:[#allocation84_spill] sm:$0xff] }
 0x4ce   : > { %v4249_v10 = vsel %vm4057_vm14, %v10600_v32, -inf  ;;  %vm3999_vm1 = vcmp.lt.s32.totalorder %v10604_v3, %v8183_v60  ;;  %v10606_v19 = vmax.f32 %v10605_v22, 0.0  ;;  %vm3935_vm9 = vcmp.ge.s32.totalorder %v10607_v25, %v8180_v24  ;;  %vm4062_vm7 = vmand %vm3933_vm12, %vm3998_vm0  ;;  %v10623_v32 = vld [vmem:[#allocation105_spill] sm:$0xff] }
 0x4cf   : > { %v4250_v8 = vsel %vm4058_vm11, %v10603_v54, -inf  ;;  %v4309_v12 = vmax.f32 %v4305_v35, %v4249_v10  ;;  %vm4000_vm3 = vcmp.lt.s32.totalorder %v10607_v25, %v8183_v60  ;;  %v10609_v43 = vmax.f32 %v10608_v45, 0.0  ;;  %vm4063_vm8 = vmand %vm3934_vm4, %vm3999_vm1  ;;  %v10626_v54 = vld [vmem:[#allocation104_spill] sm:$0xff]  ;;  %v10628_v22 = vld [vmem:[#allocation85_spill] sm:$0xff] }
 0x4d0   : > { %v4251_v16 = vsel %vm4059_vm2, %v10606_v19, -inf  ;;  %v4310_v40 = vmax.f32 %v4306_v18, %v4250_v8  ;;  %vm3936_vm10 = vcmp.ge.s32.totalorder %v10610_v58, %v8180_v24  ;;  %vm4001_vm5 = vcmp.lt.s32.totalorder %v10610_v58, %v8183_v60  ;;  %vm4064_vm0 = vmand %vm3935_vm9, %vm4000_vm3  ;;  %v10629_v19 = vld [vmem:[#allocation107_spill] sm:$0xff]  ;;  %v10631_v45 = vld [vmem:[#allocation9_spill] sm:$0xff] }
 0x4d1   : > { %v4252_v39 = vsel %vm4060_vm6, %v10609_v43, -inf  ;;  %v4311_v61 = vmax.f32 %v4307_v21, %v4251_v16  ;;  %v10612_v13 = vmax.f32 %v10611_v27, 0.0  ;;  %vm3937_vm14 = vcmp.ge.s32.totalorder %v10613_v1, %v8180_v24  ;;  %vm4065_vm1 = vmand %vm3936_vm10, %vm4001_vm5  ;;  %v10632_v43 = vld [vmem:[#allocation106_spill] sm:$0xff] }
 0x4d2   : > { %v4312_v33 = vmax.f32 %v4308_v46, %v4252_v39  ;;  %vm4002_vm15 = vcmp.lt.s32.totalorder %v10613_v1, %v8183_v60  ;;  %v10615_v5 = vmax.f32 %v10614_v49, 0.0  ;;  %vm3938_vm11 = vcmp.ge.s32.totalorder %v10616_v63, %v8180_v24  ;;  %v10634_v27 = vld [vmem:[#allocation10_spill] sm:$0xff] }
 0x4d3   : > { %v4253_v7 = vsel %vm4061_vm13, %v10612_v13, -inf  ;;  %vm4003_vm12 = vcmp.lt.s32.totalorder %v10616_v63, %v8183_v60  ;;  %v10618_v47 = vmax.f32 %v10617_v23, 0.0  ;;  %vm3939_vm2 = vcmp.ge.s32.totalorder %v10619_v55, %v8180_v24  ;;  %vm4066_vm3 = vmand %vm3937_vm14, %vm4002_vm15  ;;  %v10635_v13 = vld [vmem:[#allocation109_spill] sm:$0xff]  ;;  %v10637_v49 = vld [vmem:[#allocation86_spill] sm:$0xff] }
 0x4d4   : > { %v4254_v35 = vsel %vm4062_vm7, %v10615_v5, -inf  ;;  %v4313_v30 = vmax.f32 %v4309_v12, %v4253_v7  ;;  %vm4004_vm4 = vcmp.lt.s32.totalorder %v10619_v55, %v8183_v60  ;;  %v10621_v52 = vmax.f32 %v10620_v56, 0.0  ;;  %vm4067_vm5 = vmand %vm3938_vm11, %vm4003_vm12  ;;  %v10638_v5 = vld [vmem:[#allocation108_spill] sm:$0xff]  ;;  %v10640_v23 = vld [vmem:[#allocation111_spill] sm:$0xff] }
 0x4d5   : > { %v4255_v18 = vsel %vm4063_vm8, %v10618_v47, -inf  ;;  %v4314_v20 = vmax.f32 %v4310_v40, %v4254_v35  ;;  %vm3940_vm6 = vcmp.ge.s32.totalorder %v10622_v29, %v8180_v24  ;;  %vm4005_vm9 = vcmp.lt.s32.totalorder %v10622_v29, %v8183_v60  ;;  %vm4068_vm15 = vmand %vm3939_vm2, %vm4004_vm4  ;;  %v10642_v55 = vld [vmem:[#allocation110_spill] sm:$0xff] }
 0x4d6   : > { %v4256_v21 = vsel %vm4064_vm0, %v10621_v52, -inf  ;;  %v4315_v51 = vmax.f32 %v4311_v61, %v4255_v18  ;;  %v10624_v10 = vmax.f32 %v10623_v32, 0.0  ;;  %vm3941_vm13 = vcmp.ge.s32.totalorder %v10625_v17, %v8180_v24  ;;  %vm4069_vm12 = vmand %vm3940_vm6, %vm4005_vm9 }
 0x4d7   : > { %v4316_v26 = vmax.f32 %v4312_v33, %v4256_v21  ;;  %vm4006_vm10 = vcmp.lt.s32.totalorder %v10625_v17, %v8183_v60  ;;  %v10627_v8 = vmax.f32 %v10626_v54, 0.0  ;;  %vm3942_vm7 = vcmp.ge.s32.totalorder %v10628_v22, %v8180_v24  ;;  %v10644_v21 = vld [vmem:[#allocation113_spill] sm:$0xff] }
 0x4d8   : > { %v4257_v46 = vsel %vm4065_vm1, %v10624_v10, -inf  ;;  %vm4007_vm14 = vcmp.lt.s32.totalorder %v10628_v22, %v8183_v60  ;;  %v10630_v16 = vmax.f32 %v10629_v19, 0.0  ;;  %vm3943_vm8 = vcmp.ge.s32.totalorder %v10631_v45, %v8180_v24  ;;  %vm4070_vm4 = vmand %vm3941_vm13, %vm4006_vm10  ;;  %v10646_v10 = vld [vmem:[#allocation112_spill] sm:$0xff] }
 0x4d9   : > { %v4258_v12 = vsel %vm4066_vm3, %v10627_v8, -inf  ;;  %v4317_v3 = vmax.f32 %v4313_v30, %v4257_v46  ;;  %vm4008_vm11 = vcmp.lt.s32.totalorder %v10631_v45, %v8183_v60  ;;  %v10633_v39 = vmax.f32 %v10632_v43, 0.0  ;;  %vm4071_vm9 = vmand %vm3942_vm7, %vm4007_vm14 }
 0x4da   : > { %v4259_v40 = vsel %vm4067_vm5, %v10630_v16, -inf  ;;  %v4318_v25 = vmax.f32 %v4314_v20, %v4258_v12  ;;  %vm3944_vm0 = vcmp.ge.s32.totalorder %v10634_v27, %v8180_v24  ;;  %vm4009_vm2 = vcmp.lt.s32.totalorder %v10634_v27, %v8183_v60  ;;  %vm4072_vm3 = vmand %vm3943_vm8, %vm4008_vm11 }
 0x4db   : > { %v4260_v61 = vsel %vm4068_vm15, %v10633_v39, -inf  ;;  %v4319_v58 = vmax.f32 %v4315_v51, %v4259_v40  ;;  %v10636_v7 = vmax.f32 %v10635_v13, 0.0  ;;  %vm3945_vm1 = vcmp.ge.s32.totalorder %v10637_v49, %v8180_v24  ;;  %vm4073_vm13 = vmand %vm3944_vm0, %vm4009_vm2 }
 0x4dc   : > { %v4320_v1 = vmax.f32 %v4316_v26, %v4260_v61  ;;  %vm4010_vm6 = vcmp.lt.s32.totalorder %v10637_v49, %v8183_v60  ;;  %v10639_v35 = vmax.f32 %v10638_v5, 0.0  ;;  %v10641_v47 = vmax.f32 %v10640_v23, 0.0 }
 0x4dd   : > { %v4261_v33 = vsel %vm4069_vm12, %v10636_v7, -inf  ;;  %v10643_v56 = vmax.f32 %v10642_v55, 0.0  ;;  %vm4074_vm10 = vmand %vm3945_vm1, %vm4010_vm6  ;;  %v10645_v51 = vmax.f32 %v10644_v21, 0.0  ;;  %v10647_v46 = vmax.f32 %v10646_v10, 0.0 }
 0x4de   : > { %v4262_v30 = vsel %vm4070_vm4, %v10639_v35, -inf  ;;  %v4321_v63 = vmax.f32 %v4317_v3, %v4261_v33  ;;  %v4263_v18 = vsel %vm4071_vm9, %v10641_v47, -inf }
 0x4df   : > { %v4322_v20 = vmax.f32 %v4318_v25, %v4262_v30  ;;  %v4264_v60 = vsel %vm4072_vm3, %v10643_v56, -inf  ;;  %v4323_v52 = vmax.f32 %v4319_v58, %v4263_v18  ;;  %v4265_v29 = vsel %vm4073_vm13, %v10645_v51, -inf  ;;  %v4336_v25 = vld [vmem:[#allocation2] sm:$0x1] }
 0x4e0   : > { %v4324_v32 = vmax.f32 %v4320_v1, %v4264_v60  ;;  %v4266_v26 = vsel %vm4074_vm10, %v10647_v46, -inf  ;;  %v4325_v17 = vmax.f32 %v4321_v63, %v4265_v29 }
 0x4e1   : > { %v4326_v24 = vmax.f32 %v4322_v20, %v4266_v26 }
 0x4e2   : > { %v4327_v54 = vmax.f32 %v4323_v52, %v4324_v32 }
 0x4e3   : > { %v4328_v8 = vmax.f32 %v4325_v17, %v4326_v24 }
 0x4e5   : > { %v4329_v12 = vmax.f32 %v4327_v54, %v4328_v8 }
 0x4e7   : > { %v4330_v3 = vrot.slane %v4329_v12, 4 }
 0x4e9   : > { %v4331_v22 = vmax.f32 %v4329_v12, %v4330_v3 }
 0x4eb   : > { %v4332_v19 = vrot.slane %v4331_v22, 2 }
 0x4ed   : > { %v4333_v16 = vmax.f32 %v4331_v22, %v4332_v19 }
 0x4ef   : > { %v4334_v40 = vrot.slane %v4333_v16, 1 }
 0x4f1   : > { %v4335_v45 = vmax.f32 %v4333_v16, %v4334_v40 }
 0x4f3   : > { %v4337_v43 = vmax.f32 %v4336_v25, %v4335_v45 }
 0x4f5   : > { %4338 = vst [vmem:[#allocation2] sm:$0x1] %v4337_v43 }
 0x4f6 PF: > { %s5113_s13 = sld [smem:[#allocation4 + $0x1]]  ;;  %s5114_s17 = sld [smem:[#allocation4 + $0x2]] }
 0x4fc   : > { %p4341_p7 = scmp.gt.s32.totalorder %s5113_s13, %s6337_s16  ;;  %p4343_p8 = scmp.lt.s32.totalorder %s5114_s17, %s6379_s23 }
 0x4fe   : > { %s4342_s24 = scalar_select %p4341_p7, %s5113_s13, %s6337_s16 }
 0x4ff   : > { %s4344_s28 = scalar_select %p4343_p8, %s5114_s17, %s6379_s23 }
 0x501   : > { %p5115_p10 = scmp.ge.s32.totalorder %s4342_s24, %s4344_s28 }
 0x502   : > { %v9050_v39 = vstv (!%p5115_p10), %s5113_s13  ;;  %v9052_v61 = vstv (!%p5115_p10), %s5114_s17  ;;  %v10648_v58 = vld [vmem:[#allocation30_spill] sm:$0xff] (!%p5115_p10)  ;;  %v10649_v27 = vld [vmem:[#allocation31_spill] sm:$0xff] (!%p5115_p10)  ;;  %v10650_v13 = vld [vmem:[#allocation32_spill] sm:$0xff] (!%p5115_p10)  ;;  %v10670_v55 = vmov (!%p5115_p10), 0  ;;  %v10673_v56 = vmov (!%p5115_p10), 0 }
 0x503   : > { %4348 = sbr.rel (%p5115_p10) target bundleno = 1391 (0x56f), region = 68  ;;  %vm4350_vm5 = vcmp.ge.s32.totalorder (!%p5115_p10), %v10648_v58, %v9050_v39  ;;  %vm4351_vm7 = vcmp.ge.s32.totalorder (!%p5115_p10), %v10649_v27, %v9050_v39  ;;  %vm4352_vm14 = vcmp.ge.s32.totalorder (!%p5115_p10), %v10650_v13, %v9050_v39  ;;  %v10651_v7 = vld [vmem:[#allocation33_spill] sm:$0xff] (!%p5115_p10)  ;;  %v10652_v33 = vld [vmem:[#allocation34_spill] sm:$0xff] (!%p5115_p10)  ;;  %v10653_v1 = vld [vmem:[#allocation35_spill] sm:$0xff] (!%p5115_p10)  ;;  %vm4415_vm12 = vcmp.lt.s32.totalorder (!%p5115_p10), %v10648_v58, %v9052_v61 }
 0x504   : > { %vm4354_vm8 = vcmp.ge.s32.totalorder (!%p5115_p10), %v10652_v33, %v9050_v39  ;;  %vm4416_vm0 = vcmp.lt.s32.totalorder (!%p5115_p10), %v10649_v27, %v9052_v61  ;;  %vm4417_vm2 = vcmp.lt.s32.totalorder (!%p5115_p10), %v10650_v13, %v9052_v61  ;;  %vm4419_vm4 = vcmp.lt.s32.totalorder (!%p5115_p10), %v10652_v33, %v9052_v61  ;;  %v10654_v49 = vld [vmem:[#allocation36_spill] sm:$0xff] (!%p5115_p10)  ;;  %v10655_v5 = vld [vmem:[#allocation37_spill] sm:$0xff] (!%p5115_p10)  ;;  %v10656_v35 = vld [vmem:[#allocation38_spill] sm:$0xff] (!%p5115_p10) }
 0x505   : > { %vm4418_vm6 = vcmp.lt.s32.totalorder (!%p5115_p10), %v10651_v7, %v9052_v61  ;;  %vm4420_vm9 = vcmp.lt.s32.totalorder (!%p5115_p10), %v10653_v1, %v9052_v61  ;;  %vm4421_vm3 = vcmp.lt.s32.totalorder (!%p5115_p10), %v10654_v49, %v9052_v61  ;;  %vm4422_vm10 = vcmp.lt.s32.totalorder (!%p5115_p10), %v10655_v5, %v9052_v61  ;;  %vm9093_vm15 = vmand (!%p5115_p10), %vm4350_vm5, %vm4415_vm12  ;;  %v10665_v18 = vld [vmem:[#allocation39_spill] sm:$0xff] (!%p5115_p10)  ;;  %v10675_v60 = vld [vmem:[#allocation40_spill] sm:$0xff] (!%p5115_p10) }
 0x506   : > { %vm9100_vm13 = vmand (!%p5115_p10), %vm4351_vm7, %vm4416_vm0  ;;  %vm4424_vm12 = vcmp.lt.s32.totalorder (!%p5115_p10), %v10665_v18, %v9052_v61  ;;  %vm10666_vm0 = vcmp.ge.s32.totalorder (!%p5115_p10), %v10651_v7, %v9050_v39  ;;  %vm10676_vm1 = vcmp.ge.s32.totalorder (!%p5115_p10), %v10655_v5, %v9050_v39  ;;  %v10677_v52 = vmov (!%p5115_p10), 0  ;;  %v10679_v21 = vld [vmem:[#allocation41_spill] sm:$0xff] (!%p5115_p10)  ;;  %v10684_v29 = vld [vmem:[#allocation42_spill] sm:$0xff] (!%p5115_p10) }
 0x507   : > { %vm9107_vm11 = vmand (!%p5115_p10), %vm4352_vm14, %vm4417_vm2  ;;  %vm10669_vm2 = vcmp.ge.s32.totalorder (!%p5115_p10), %v10653_v1, %v9050_v39  ;;  %v10685_v32 = vld [vmem:[#allocation43_spill] sm:$0xff] (!%p5115_p10)  ;;  %v10686_v10 = vld [vmem:[#allocation44_spill] sm:$0xff] (!%p5115_p10)  ;;  %v10701_v22 = vmov (!%p5115_p10), 0  ;;  %v10708_v25 = vmov (!%p5115_p10), 0  ;;  %v10713_v43 = vmov (!%p5115_p10), 0 }
 0x508   : > { %vm9114_vm5 = vmand (!%p5115_p10), %vm4354_vm8, %vm4419_vm4  ;;  %vm10672_vm4 = vcmp.ge.s32.totalorder (!%p5115_p10), %v10654_v49, %v9050_v39  ;;  %v10690_v26 = vld [vmem:[#allocation45_spill] sm:$0xff] (!%p5115_p10)  ;;  %v10691_v17 = vld [vmem:[#allocation46_spill] sm:$0xff] (!%p5115_p10)  ;;  %v10718_v27 = vmov (!%p5115_p10), 0  ;;  %v10742_v63 = vmax.f32 (!%p5115_p10), %v7881_v50, 0.0  ;;  %v10744_v47 = vmax.f32 (!%p5115_p10), %v7894_v6, 0.0 }
 0x509   : > { %vm9125_vm14 = vmand (!%p5115_p10), %vm10666_vm0, %vm4418_vm6  ;;  %vm4425_vm0 = vcmp.lt.s32.totalorder (!%p5115_p10), %v10675_v60, %v9052_v61  ;;  %vm10681_vm6 = vcmp.ge.s32.totalorder (!%p5115_p10), %v10656_v35, %v9050_v39  ;;  %v10692_v24 = vld [vmem:[#allocation47_spill] sm:$0xff] (!%p5115_p10)  ;;  %v10696_v8 = vld [vmem:[#allocation48_spill] sm:$0xff] (!%p5115_p10)  ;;  %v10790_v1 = vmax.f32 (!%p5115_p10), %v7962_v4, 0.0 }
 0x50a   : > { %vm9132_vm8 = vmand %vm10669_vm2, %vm4420_vm9  ;;  %v10697_v12 = vld [vmem:[#allocation49_spill] sm:$0xff]  ;;  %v10698_v3 = vld [vmem:[#allocation50_spill] sm:$0xff]  ;;  %vm10706_vm2 = vcmp.lt.s32.totalorder %v10684_v29, %v9052_v61 }
 0x50b   : > { %v10671_v55 = vsel %vm9132_vm8, 4294967295, %v10670_v55  ;;  %vm9139_vm7 = vmand %vm10672_vm4, %vm4421_vm3  ;;  %vm10680_vm4 = vcmp.lt.s32.totalorder %v10656_v35, %v9052_v61  ;;  %v10703_v19 = vld [vmem:[#allocation51_spill] sm:$0xff]  ;;  %v10704_v16 = vld [vmem:[#allocation52_spill] sm:$0xff] }
 0x50c   : > { %v10674_v56 = vsel %vm9139_vm7, 4294967295, %v10673_v56  ;;  %vm9150_vm9 = vmand %vm10676_vm1, %vm4422_vm10  ;;  %vm10693_vm1 = vcmp.ge.s32.totalorder %v10675_v60, %v9050_v39  ;;  %v10705_v40 = vld [vmem:[#allocation53_spill] sm:$0xff]  ;;  %v10710_v45 = vld [vmem:[#allocation54_spill] sm:$0xff]  ;;  %vm10726_vm10 = vcmp.lt.s32.totalorder %v10691_v17, %v9052_v61 }
 0x50d   : > { %v10678_v52 = vsel %vm9150_vm9, 4294967295, %v10677_v52  ;;  %vm9164_vm7 = vmand %vm10681_vm6, %vm10680_vm4  ;;  %vm10687_vm9 = vcmp.ge.s32.totalorder %v10665_v18, %v9050_v39  ;;  %vm10699_vm6 = vcmp.lt.s32.totalorder %v10679_v21, %v9052_v61  ;;  %v10715_v58 = vld [vmem:[#allocation55_spill] sm:$0xff]  ;;  %v10720_v13 = vld [vmem:[#allocation56_spill] sm:$0xff]  ;;  %vm4438_vm4 = vcmp.lt.s32.totalorder %v10705_v40, %v9052_v61 }
 0x50e   : > { %vm9179_vm8 = vmand %vm10687_vm9, %vm4424_vm12  ;;  %v10725_v33 = vld [vmem:[#allocation57_spill] sm:$0xff]  ;;  %v10730_v49 = vld [vmem:[#allocation11_spill] sm:$0xff]  ;;  %v10732_v18 = vmax.f32 %v7856_v42, 0.0 }
 0x50f   : > { %vm9194_vm3 = vmand %vm10693_vm1, %vm4425_vm0  ;;  %vm10700_vm0 = vcmp.ge.s32.totalorder %v10679_v21, %v9050_v39  ;;  %vm4377_vm12 = vcmp.ge.s32.totalorder %v10725_v33, %v9050_v39  ;;  %v10731_v5 = vmax.f32 %v10730_v49, 0.0  ;;  %v10733_v21 = vmax.f32 %v7874_v48, 0.0  ;;  %v10740_v48 = vld [vmem:[#allocation90_spill] sm:$0xff] }
 0x510   : > { %vm9212_vm1 = vmand %vm10700_vm0, %vm10699_vm6  ;;  %vm10707_vm6 = vcmp.ge.s32.totalorder %v10684_v29, %v9050_v39  ;;  %v4672_v60 = vsel %vm9100_vm13, %v10732_v18, -inf  ;;  %v10741_v30 = vmax.f32 %v10740_v48, 0.0  ;;  %v10764_v48 = vld [vmem:[#allocation61_spill] sm:$0xff] }
 0x511   : > { %v10702_v22 = vsel %vm9212_vm1, 4294967295, %v10701_v22  ;;  %vm9230_vm0 = vmand %vm10707_vm6, %vm10706_vm2  ;;  %vm10711_vm1 = vcmp.lt.s32.totalorder %v10685_v32, %v9052_v61  ;;  %vm10712_vm2 = vcmp.ge.s32.totalorder %v10685_v32, %v9050_v39  ;;  %v4671_v35 = vsel %vm9093_vm15, %v10731_v5, -inf  ;;  %v10748_v5 = vld [vmem:[#allocation59_spill] sm:$0xff] }
 0x512   : > { %v10709_v25 = vsel %vm9230_vm0, 4294967295, %v10708_v25  ;;  %vm9248_vm6 = vmand %vm10712_vm2, %vm10711_vm1  ;;  %vm10716_vm1 = vcmp.lt.s32.totalorder %v10686_v10, %v9052_v61  ;;  %vm10717_vm2 = vcmp.ge.s32.totalorder %v10686_v10, %v9050_v39  ;;  %vm10727_vm0 = vcmp.ge.s32.totalorder %v10691_v17, %v9050_v39 }
 0x513   : > { %v10714_v43 = vsel %vm9248_vm6, 4294967295, %v10713_v43  ;;  %vm9268_vm6 = vmand %vm10717_vm2, %vm10716_vm1  ;;  %vm10721_vm1 = vcmp.lt.s32.totalorder %v10690_v26, %v9052_v61  ;;  %vm10722_vm2 = vcmp.ge.s32.totalorder %v10690_v26, %v9050_v39  ;;  %v4673_v29 = vsel %vm9107_vm11, %v10733_v21, -inf  ;;  %v10735_v26 = vld [vmem:[#allocation58_spill] sm:$0xff] }
 0x514   : > { %v10719_v27 = vsel %vm9268_vm6, 4294967295, %v10718_v27  ;;  %vm9288_vm6 = vmand %vm10722_vm2, %vm10721_vm1  ;;  %v10734_v32 = vmax.f32 %v7886_v11, 0.0  ;;  %vm10736_vm15 = vcmp.lt.s32.totalorder %v10692_v24, %v9052_v61  ;;  %v4674_v11 = vsel %vm9125_vm14, %v10741_v30, -inf }
 0x515   : > { %vm9300_vm9 = vmand %vm10727_vm0, %vm10726_vm10  ;;  %vm10737_vm0 = vcmp.ge.s32.totalorder %v10692_v24, %v9050_v39  ;;  %vm10743_vm11 = vnez %v10671_v55  ;;  %v10746_v24 = vmax.f32 %v7891_v38, 0.0  ;;  %vm10747_vm1 = vnez %v10678_v52  ;;  %v10753_v38 = vld [vmem:[#allocation19_spill] sm:$0xff]  ;;  %v10755_v55 = vld [vmem:[#allocation60_spill] sm:$0xff] }
 0x516   : > { %v4675_v10 = vsel %vm9114_vm5, %v10734_v32, -inf  ;;  %vm9328_vm13 = vmand %vm10737_vm0, %vm10736_vm15  ;;  %v4676_v23 = vsel %vm10743_vm11, %v10742_v63, -inf  ;;  %vm10745_vm5 = vnez %v10674_v56  ;;  %vm4442_vm14 = vcmp.lt.s32.totalorder %v10725_v33, %v9052_v61  ;;  %v10787_v63 = vld [vmem:[#allocation64_spill] sm:$0xff] }
 0x517   : > { %v4677_v17 = vsel %vm10745_vm5, %v10744_v47, -inf  ;;  %v4678_v49 = vsel %vm10747_vm1, %v10746_v24, -inf  ;;  %vm4443_vm15 = vcmp.lt.s32.totalorder %v10735_v26, %v9052_v61  ;;  %vm10749_vm11 = vcmp.lt.s32.totalorder %v10696_v8, %v9052_v61 }
 0x518   : > { %vm10750_vm5 = vcmp.ge.s32.totalorder %v10696_v8, %v9050_v39  ;;  %v10754_v6 = vmax.f32 %v10753_v38, 0.0  ;;  %vm10756_vm0 = vcmp.lt.s32.totalorder %v10697_v12, %v9052_v61  ;;  %v10760_v52 = vmax.f32 %v7902_v14, 0.0 }
 0x519   : > { %vm9362_vm10 = vmand %vm10750_vm5, %vm10749_vm11  ;;  %vm10757_vm11 = vcmp.ge.s32.totalorder %v10697_v12, %v9050_v39  ;;  %v10761_v8 = vmax.f32 %v7915_v2, 0.0  ;;  %v10762_v21 = vmax.f32 %v7912_v28, 0.0  ;;  %v4735_v12 = vmax.f32 %v4671_v35, %v4675_v10  ;;  %v10771_v35 = vld [vmem:[#allocation62_spill] sm:$0xff] }
 0x51a   : > { %v4679_v20 = vsel %vm9164_vm7, %v10754_v6, -inf  ;;  %vm9380_vm5 = vmand %vm10757_vm11, %vm10756_vm0  ;;  %v4680_v51 = vsel %vm9179_vm8, %v10760_v52, -inf  ;;  %vm10763_vm7 = vnez %v10702_v22  ;;  %vm10765_vm11 = vcmp.lt.s32.totalorder %v10698_v3, %v9052_v61 }
 0x51b   : > { %v4681_v18 = vsel %vm9194_vm3, %v10761_v8, -inf  ;;  %v4682_v32 = vsel %vm10763_vm7, %v10762_v21, -inf  ;;  %vm10766_vm8 = vcmp.ge.s32.totalorder %v10698_v3, %v9050_v39  ;;  %v10769_v2 = vmax.f32 %v7927_v57, 0.0  ;;  %v10807_v21 = vld [vmem:[#allocation15_spill] sm:$0xff] }
 0x51c   : > { %vm9404_vm1 = vmand %vm10766_vm8, %vm10765_vm11  ;;  %vm10770_vm3 = vnez %v10709_v25  ;;  %v4736_v46 = vmax.f32 %v4672_v60, %v4676_v23  ;;  %v4737_v54 = vmax.f32 %v4673_v29, %v4677_v17  ;;  %v4738_v22 = vmax.f32 %v4674_v11, %v4678_v49  ;;  %v10781_v11 = vld [vmem:[#allocation63_spill] sm:$0xff] }
 0x51d   : > { %v4683_v28 = vsel %vm10770_vm3, %v10769_v2, -inf  ;;  %vm10772_vm0 = vcmp.lt.s32.totalorder %v10703_v19, %v9052_v61  ;;  %vm10773_vm11 = vcmp.ge.s32.totalorder %v10703_v19, %v9050_v39  ;;  %v10776_v57 = vmax.f32 %v7923_v31, 0.0 }
 0x51e   : > { %vm9420_vm8 = vmand %vm10773_vm11, %vm10772_vm0  ;;  %vm10777_vm3 = vnez %v10714_v43  ;;  %v10778_v60 = vmax.f32 %v7935_v0, 0.0  ;;  %vm10779_vm2 = vnez %v10719_v27  ;;  %v10780_v10 = vmax.f32 %v7932_v44, 0.0 }
 0x51f   : > { %v4684_v25 = vsel %vm10777_vm3, %v10776_v57, -inf  ;;  %v4739_v19 = vmax.f32 %v4735_v12, %v4679_v20  ;;  %vm4383_vm0 = vcmp.ge.s32.totalorder %v10781_v11, %v9050_v39  ;;  %vm10782_vm11 = vcmp.lt.s32.totalorder %v10704_v16, %v9052_v61 }
 0x520   : > { %v4685_v29 = vsel %vm10779_vm2, %v10778_v60, -inf  ;;  %v4686_v30 = vsel %vm9288_vm6, %v10780_v10, -inf  ;;  %vm10783_vm3 = vcmp.ge.s32.totalorder %v10704_v16, %v9050_v39  ;;  %v10786_v0 = vmax.f32 %v7952_v62, 0.0 }
 0x521   : > { %vm9444_vm7 = vmand %vm10783_vm3, %vm10782_vm11  ;;  %v4740_v43 = vmax.f32 %v4736_v46, %v4680_v51  ;;  %v4741_v27 = vmax.f32 %v4737_v54, %v4681_v18  ;;  %v4742_v7 = vmax.f32 %v4738_v22, %v4682_v32  ;;  %vm4384_vm6 = vcmp.ge.s32.totalorder %v10787_v63, %v9050_v39  ;;  %v10804_v51 = vld [vmem:[#allocation22_spill] sm:$0xff]  ;;  %v10815_v54 = vld [vmem:[#allocation87_spill] sm:$0xff] }
 0x522   : > { %v4687_v44 = vsel %vm9300_vm9, %v10786_v0, -inf  ;;  %vm10788_vm2 = vcmp.ge.s32.totalorder %v10705_v40, %v9050_v39  ;;  %v10789_v16 = vmax.f32 %v7949_v34, 0.0  ;;  %v4689_v23 = vsel %vm9362_vm10, %v10790_v1, -inf  ;;  %v10828_v1 = vld [vmem:[#allocation13_spill] sm:$0xff] }
 0x523   : > { %vm4502_vm11 = vmand %vm10788_vm2, %vm4438_vm4  ;;  %v10791_v47 = vmax.f32 %v7959_v9, 0.0  ;;  %v4743_v24 = vmax.f32 %v4739_v19, %v4683_v28  ;;  %vm10792_vm9 = vcmp.lt.s32.totalorder %v10710_v45, %v9052_v61  ;;  %vm10793_vm4 = vcmp.ge.s32.totalorder %v10710_v45, %v9050_v39  ;;  %v10822_v19 = vld [vmem:[#allocation12_spill] sm:$0xff] }
 0x524   : > { %v4688_v62 = vsel %vm9328_vm13, %v10789_v16, -inf  ;;  %vm4503_vm3 = vmand %vm10793_vm4, %vm10792_vm9  ;;  %v10794_v34 = vmax.f32 %v7972_v41, 0.0  ;;  %v4744_v40 = vmax.f32 %v4740_v43, %v4684_v25  ;;  %v4745_v42 = vmax.f32 %v4741_v27, %v4685_v29  ;;  %v10824_v43 = vld [vmem:[#allocation66_spill] sm:$0xff] }
 0x525   : > { %v4690_v17 = vsel %vm9380_vm5, %v10791_v47, -inf  ;;  %v4746_v49 = vmax.f32 %v4742_v7, %v4686_v30  ;;  %vm10795_vm10 = vcmp.lt.s32.totalorder %v10715_v58, %v9052_v61  ;;  %vm10796_vm13 = vcmp.ge.s32.totalorder %v10715_v58, %v9050_v39 }
 0x526   : > { %v4691_v4 = vsel %vm9404_vm1, %v10794_v34, -inf  ;;  %vm4504_vm5 = vmand %vm10796_vm13, %vm10795_vm10  ;;  %v10797_v9 = vmax.f32 %v7969_v59, 0.0  ;;  %v10798_v41 = vmax.f32 %v7984_v53, 0.0  ;;  %v10799_v38 = vmax.f32 %v7981_v15, 0.0 }
 0x527   : > { %v4747_v20 = vmax.f32 %v4743_v24, %v4687_v44  ;;  %vm10800_vm1 = vcmp.lt.s32.totalorder %v10720_v13, %v9052_v61  ;;  %vm10801_vm2 = vcmp.ge.s32.totalorder %v10720_v13, %v9050_v39  ;;  %v10802_v59 = vmax.f32 %v7994_v37, 0.0  ;;  %v10831_v24 = vld [vmem:[#allocation16_spill] sm:$0xff] }
 0x528   : > { %v4692_v45 = vsel %vm9420_vm8, %v10797_v9, -inf  ;;  %v4693_v50 = vsel %vm9444_vm7, %v10798_v41, -inf  ;;  %v4694_v6 = vsel %vm4502_vm11, %v10799_v38, -inf  ;;  %vm4505_vm9 = vmand %vm10801_vm2, %vm10800_vm1  ;;  %v4748_v56 = vmax.f32 %v4744_v40, %v4688_v62  ;;  %v10827_v62 = vld [vmem:[#allocation67_spill] sm:$0xff]  ;;  %v10833_v40 = vld [vmem:[#allocation69_spill] sm:$0xff] }
 0x529   : > { %v4695_v58 = vsel %vm4503_vm3, %v10802_v59, -inf  ;;  %v4749_v52 = vmax.f32 %v4745_v42, %v4689_v23  ;;  %v4750_v53 = vmax.f32 %v4746_v49, %v4690_v17  ;;  %vm4446_vm7 = vcmp.lt.s32.totalorder %v10764_v48, %v9052_v61  ;;  %vm4506_vm8 = vmand %vm4377_vm12, %vm4442_vm14  ;;  %v10830_v17 = vld [vmem:[#allocation68_spill] sm:$0xff]  ;;  %v10836_v41 = vld [vmem:[#allocation70_spill] sm:$0xff] }
 0x52a   : > { %v10803_v15 = vmax.f32 %v7991_v36, 0.0  ;;  %v10805_v8 = vmax.f32 %v10804_v51, 0.0  ;;  %v4751_v18 = vmax.f32 %v4747_v20, %v4691_v4  ;;  %vm10806_vm11 = vcmp.ge.s32.totalorder %v10735_v26, %v9050_v39  ;;  %v10811_v36 = vld [vmem:[#allocation14_spill] sm:$0xff]  ;;  %v10834_v42 = vld [vmem:[#allocation88_spill] sm:$0xff]  ;;  %v10839_v59 = vld [vmem:[#allocation71_spill] sm:$0xff] }
 0x52b   : > { %vm4507_vm4 = vmand %vm10806_vm11, %vm4443_vm15  ;;  %v10808_v32 = vmax.f32 %v10807_v21, 0.0  ;;  %v4752_v14 = vmax.f32 %v4748_v56, %v4692_v45  ;;  %v4753_v33 = vmax.f32 %v4749_v52, %v4693_v50  ;;  %v4754_v2 = vmax.f32 %v4750_v53, %v4694_v6  ;;  %v10837_v50 = vld [vmem:[#allocation89_spill] sm:$0xff]  ;;  %v10846_v21 = vld [vmem:[#allocation94_spill] sm:$0xff] }
 0x52c   : > { %v4696_v13 = vsel %vm4504_vm5, %v10803_v15, -inf  ;;  %v4697_v37 = vsel %vm4505_vm9, %v10805_v8, -inf  ;;  %vm4447_vm12 = vcmp.lt.s32.totalorder %v10771_v35, %v9052_v61  ;;  %vm4448_vm14 = vcmp.lt.s32.totalorder %v10781_v11, %v9052_v61  ;;  %v10842_v15 = vld [vmem:[#allocation72_spill] sm:$0xff] }
 0x52d   : > { %v4698_v12 = vsel %vm4506_vm8, %v10808_v32, -inf  ;;  %vm10809_vm3 = vcmp.lt.s32.totalorder %v10748_v5, %v9052_v61  ;;  %vm10810_vm10 = vcmp.ge.s32.totalorder %v10748_v5, %v9050_v39  ;;  %v10812_v26 = vmax.f32 %v10811_v36, 0.0  ;;  %v10817_v5 = vld [vmem:[#allocation65_spill] sm:$0xff] }
 0x52e   : > { %vm4508_vm13 = vmand %vm10810_vm10, %vm10809_vm3  ;;  %v4755_v46 = vmax.f32 %v4751_v18, %v4695_v58  ;;  %vm10813_vm15 = vcmp.lt.s32.totalorder %v10755_v55, %v9052_v61  ;;  %vm10814_vm5 = vcmp.ge.s32.totalorder %v10755_v55, %v9050_v39  ;;  %v10816_v22 = vmax.f32 %v10815_v54, 0.0  ;;  %v10819_v55 = vld [vmem:[#allocation93_spill] sm:$0xff]  ;;  %v10840_v58 = vld [vmem:[#allocation92_spill] sm:$0xff] }
 0x52f   : > { %v4699_v28 = vsel %vm4507_vm4, %v10812_v26, -inf  ;;  %vm4509_vm1 = vmand %vm10814_vm5, %vm10813_vm15  ;;  %v4756_v57 = vmax.f32 %v4752_v14, %v4696_v13  ;;  %v4757_v25 = vmax.f32 %v4753_v33, %v4697_v37  ;;  %v4758_v60 = vmax.f32 %v4754_v2, %v4698_v12  ;;  %v10843_v13 = vld [vmem:[#allocation20_spill] sm:$0xff]  ;;  %v10845_v18 = vld [vmem:[#allocation73_spill] sm:$0xff] }
 0x530   : > { %v4700_v3 = vsel %vm4508_vm13, %v10816_v22, -inf  ;;  %vm4385_vm2 = vcmp.ge.s32.totalorder %v10817_v5, %v9050_v39  ;;  %vm4449_vm9 = vcmp.lt.s32.totalorder %v10787_v63, %v9052_v61  ;;  %vm10818_vm8 = vcmp.ge.s32.totalorder %v10764_v48, %v9050_v39  ;;  %vm4512_vm15 = vmand %vm4383_vm0, %vm4448_vm14  ;;  %v10848_v33 = vld [vmem:[#allocation74_spill] sm:$0xff]  ;;  %v10849_v2 = vld [vmem:[#allocation95_spill] sm:$0xff] }
 0x531   : > { %vm4510_vm11 = vmand %vm10818_vm8, %vm4446_vm7  ;;  %v10820_v29 = vmax.f32 %v10819_v55, 0.0  ;;  %v4759_v30 = vmax.f32 %v4755_v46, %v4699_v28  ;;  %vm4450_vm4 = vcmp.lt.s32.totalorder %v10817_v5, %v9052_v61  ;;  %vm10821_vm3 = vcmp.ge.s32.totalorder %v10771_v35, %v9050_v39  ;;  %v10825_v35 = vld [vmem:[#allocation91_spill] sm:$0xff]  ;;  %v10852_v54 = vld [vmem:[#allocation17_spill] sm:$0xff] }
 0x532   : > { %vm4511_vm10 = vmand %vm10821_vm3, %vm4447_vm12  ;;  %v10823_v31 = vmax.f32 %v10822_v19, 0.0  ;;  %v4760_v44 = vmax.f32 %v4756_v57, %v4700_v3  ;;  %vm4386_vm7 = vcmp.ge.s32.totalorder %v10824_v43, %v9050_v39  ;;  %vm4451_vm13 = vcmp.lt.s32.totalorder %v10824_v43, %v9052_v61  ;;  %v10851_v46 = vld [vmem:[#allocation75_spill] sm:$0xff] }
 0x533   : > { %v4701_v10 = vsel %vm4509_vm1, %v10820_v29, -inf  ;;  %v10826_v27 = vmax.f32 %v10825_v35, 0.0  ;;  %vm4387_vm12 = vcmp.ge.s32.totalorder %v10827_v62, %v9050_v39  ;;  %vm4452_vm5 = vcmp.lt.s32.totalorder %v10827_v62, %v9052_v61  ;;  %vm4513_vm1 = vmand %vm4384_vm6, %vm4449_vm9 }
 0x534   : > { %v4702_v0 = vsel %vm4510_vm11, %v10823_v31, -inf  ;;  %v4761_v48 = vmax.f32 %v4757_v25, %v4701_v10  ;;  %v10829_v11 = vmax.f32 %v10828_v1, 0.0  ;;  %vm4388_vm0 = vcmp.ge.s32.totalorder %v10830_v17, %v9050_v39  ;;  %vm4514_vm8 = vmand %vm4385_vm2, %vm4450_vm4  ;;  %v10854_v25 = vld [vmem:[#allocation76_spill] sm:$0xff]  ;;  %v10857_v10 = vld [vmem:[#allocation77_spill] sm:$0xff] }
 0x535   : > { %v4703_v7 = vsel %vm4511_vm10, %v10826_v27, -inf  ;;  %v4762_v16 = vmax.f32 %v4758_v60, %v4702_v0  ;;  %vm4453_vm14 = vcmp.lt.s32.totalorder %v10830_v17, %v9052_v61  ;;  %v10832_v63 = vmax.f32 %v10831_v24, 0.0  ;;  %vm4515_vm11 = vmand %vm4386_vm7, %vm4451_vm13  ;;  %v10855_v60 = vld [vmem:[#allocation98_spill] sm:$0xff] }
 0x536   : > { %v4704_v23 = vsel %vm4512_vm15, %v10829_v11, -inf  ;;  %v4763_v47 = vmax.f32 %v4759_v30, %v4703_v7  ;;  %vm4389_vm6 = vcmp.ge.s32.totalorder %v10833_v40, %v9050_v39  ;;  %vm4454_vm9 = vcmp.lt.s32.totalorder %v10833_v40, %v9052_v61  ;;  %vm4516_vm3 = vmand %vm4387_vm12, %vm4452_vm5  ;;  %v10858_v30 = vld [vmem:[#allocation23_spill] sm:$0xff] }
 0x537   : > { %v4705_v34 = vsel %vm4513_vm1, %v10832_v63, -inf  ;;  %v4764_v4 = vmax.f32 %v4760_v44, %v4704_v23  ;;  %v10835_v49 = vmax.f32 %v10834_v42, 0.0  ;;  %vm4390_vm2 = vcmp.ge.s32.totalorder %v10836_v41, %v9050_v39  ;;  %vm4517_vm13 = vmand %vm4388_vm0, %vm4453_vm14  ;;  %v10860_v44 = vld [vmem:[#allocation78_spill] sm:$0xff]  ;;  %v10863_v7 = vld [vmem:[#allocation79_spill] sm:$0xff] }
 0x538   : > { %v4765_v45 = vmax.f32 %v4761_v48, %v4705_v34  ;;  %vm4455_vm4 = vcmp.lt.s32.totalorder %v10836_v41, %v9052_v61  ;;  %v10838_v38 = vmax.f32 %v10837_v50, 0.0  ;;  %vm4391_vm10 = vcmp.ge.s32.totalorder %v10839_v59, %v9050_v39  ;;  %vm4518_vm5 = vmand %vm4389_vm6, %vm4454_vm9  ;;  %v10861_v48 = vld [vmem:[#allocation18_spill] sm:$0xff]  ;;  %v10866_v23 = vld [vmem:[#allocation80_spill] sm:$0xff] }
 0x539   : > { %v4706_v9 = vsel %vm4514_vm8, %v10835_v49, -inf  ;;  %vm4456_vm7 = vcmp.lt.s32.totalorder %v10839_v59, %v9052_v61  ;;  %v10841_v56 = vmax.f32 %v10840_v58, 0.0  ;;  %vm4392_vm15 = vcmp.ge.s32.totalorder %v10842_v15, %v9050_v39  ;;  %vm4519_vm14 = vmand %vm4390_vm2, %vm4455_vm4  ;;  %v10869_v34 = vld [vmem:[#allocation81_spill] sm:$0xff] }
 0x53a   : > { %v4707_v6 = vsel %vm4515_vm11, %v10838_v38, -inf  ;;  %v4766_v20 = vmax.f32 %v4762_v16, %v4706_v9  ;;  %vm4457_vm12 = vcmp.lt.s32.totalorder %v10842_v15, %v9052_v61  ;;  %v10844_v51 = vmax.f32 %v10843_v13, 0.0  ;;  %vm4520_vm9 = vmand %vm4391_vm10, %vm4456_vm7  ;;  %v10864_v16 = vld [vmem:[#allocation21_spill] sm:$0xff] }
 0x53b   : > { %v4708_v52 = vsel %vm4516_vm3, %v10841_v56, -inf  ;;  %v4767_v53 = vmax.f32 %v4763_v47, %v4707_v6  ;;  %vm4393_vm1 = vcmp.ge.s32.totalorder %v10845_v18, %v9050_v39  ;;  %vm4458_vm0 = vcmp.lt.s32.totalorder %v10845_v18, %v9052_v61  ;;  %vm4521_vm4 = vmand %vm4392_vm15, %vm4457_vm12  ;;  %v10867_v47 = vld [vmem:[#allocation96_spill] sm:$0xff]  ;;  %v10872_v9 = vld [vmem:[#allocation25_spill] sm:$0xff] }
 0x53c   : > { %v4709_v8 = vsel %vm4517_vm13, %v10844_v51, -inf  ;;  %v4768_v37 = vmax.f32 %v4764_v4, %v4708_v52  ;;  %v10847_v32 = vmax.f32 %v10846_v21, 0.0  ;;  %vm4394_vm8 = vcmp.ge.s32.totalorder %v10848_v33, %v9050_v39  ;;  %vm4522_vm7 = vmand %vm4393_vm1, %vm4458_vm0  ;;  %v10870_v4 = vld [vmem:[#allocation24_spill] sm:$0xff]  ;;  %v10875_v6 = vld [vmem:[#allocation26_spill] sm:$0xff] }
 0x53d   : > { %v4769_v14 = vmax.f32 %v4765_v45, %v4709_v8  ;;  %vm4459_vm6 = vcmp.lt.s32.totalorder %v10848_v33, %v9052_v61  ;;  %v10850_v36 = vmax.f32 %v10849_v2, 0.0  ;;  %vm4395_vm11 = vcmp.ge.s32.totalorder %v10851_v46, %v9050_v39  ;;  %v10873_v45 = vld [vmem:[#allocation99_spill] sm:$0xff]  ;;  %v10881_v8 = vld [vmem:[#allocation28_spill] sm:$0xff] }
 0x53e   : > { %v4710_v12 = vsel %vm4518_vm5, %v10847_v32, -inf  ;;  %vm4460_vm2 = vcmp.lt.s32.totalorder %v10851_v46, %v9052_v61  ;;  %v10853_v22 = vmax.f32 %v10852_v54, 0.0  ;;  %vm4396_vm3 = vcmp.ge.s32.totalorder %v10854_v25, %v9050_v39  ;;  %vm4523_vm12 = vmand %vm4394_vm8, %vm4459_vm6  ;;  %v10878_v52 = vld [vmem:[#allocation27_spill] sm:$0xff] }
 0x53f   : > { %v4711_v26 = vsel %vm4519_vm14, %v10850_v36, -inf  ;;  %v4770_v28 = vmax.f32 %v4766_v20, %v4710_v12  ;;  %vm4461_vm10 = vcmp.lt.s32.totalorder %v10854_v25, %v9052_v61  ;;  %v10856_v5 = vmax.f32 %v10855_v60, 0.0  ;;  %vm4524_vm0 = vmand %vm4395_vm11, %vm4460_vm2  ;;  %v10876_v20 = vld [vmem:[#allocation97_spill] sm:$0xff] }
 0x540   : > { %v4712_v3 = vsel %vm4520_vm9, %v10853_v22, -inf  ;;  %v4771_v57 = vmax.f32 %v4767_v53, %v4711_v26  ;;  %vm4397_vm13 = vcmp.ge.s32.totalorder %v10857_v10, %v9050_v39  ;;  %vm4462_vm15 = vcmp.lt.s32.totalorder %v10857_v10, %v9052_v61  ;;  %vm4525_vm6 = vmand %vm4396_vm3, %vm4461_vm10  ;;  %v10879_v53 = vld [vmem:[#allocation101_spill] sm:$0xff]  ;;  %v10887_v26 = vld [vmem:[#allocation82_spill] sm:$0xff] }
 0x541   : > { %v4713_v55 = vsel %vm4521_vm4, %v10856_v5, -inf  ;;  %v4772_v29 = vmax.f32 %v4768_v37, %v4712_v3  ;;  %v10859_v19 = vmax.f32 %v10858_v30, 0.0  ;;  %vm4398_vm5 = vcmp.ge.s32.totalorder %v10860_v44, %v9050_v39  ;;  %vm4526_vm2 = vmand %vm4397_vm13, %vm4462_vm15  ;;  %v10882_v37 = vld [vmem:[#allocation100_spill] sm:$0xff]  ;;  %v10884_v12 = vld [vmem:[#allocation29_spill] sm:$0xff] }
 0x542   : > { %v4773_v0 = vmax.f32 %v4769_v14, %v4713_v55  ;;  %vm4463_vm1 = vcmp.lt.s32.totalorder %v10860_v44, %v9052_v61  ;;  %v10862_v43 = vmax.f32 %v10861_v48, 0.0  ;;  %vm4399_vm14 = vcmp.ge.s32.totalorder %v10863_v7, %v9050_v39  ;;  %v10885_v14 = vld [vmem:[#allocation103_spill] sm:$0xff]  ;;  %v10893_v55 = vld [vmem:[#allocation84_spill] sm:$0xff] }
 0x543   : > { %v4714_v31 = vsel %vm4522_vm7, %v10859_v19, -inf  ;;  %vm4464_vm8 = vcmp.lt.s32.totalorder %v10863_v7, %v9052_v61  ;;  %v10865_v62 = vmax.f32 %v10864_v16, 0.0  ;;  %vm4400_vm9 = vcmp.ge.s32.totalorder %v10866_v23, %v9050_v39  ;;  %vm4527_vm10 = vmand %vm4398_vm5, %vm4463_vm1  ;;  %v10890_v3 = vld [vmem:[#allocation83_spill] sm:$0xff] }
 0x544   : > { %v4715_v35 = vsel %vm4523_vm12, %v10862_v43, -inf  ;;  %v4774_v27 = vmax.f32 %v4770_v28, %v4714_v31  ;;  %vm4465_vm11 = vcmp.lt.s32.totalorder %v10866_v23, %v9052_v61  ;;  %v10868_v17 = vmax.f32 %v10867_v47, 0.0  ;;  %vm4528_vm15 = vmand %vm4399_vm14, %vm4464_vm8  ;;  %v10888_v28 = vld [vmem:[#allocation102_spill] sm:$0xff]  ;;  %v10896_v31 = vld [vmem:[#allocation85_spill] sm:$0xff] }
 0x545   : > { %v4716_v1 = vsel %vm4524_vm0, %v10865_v62, -inf  ;;  %v4775_v11 = vmax.f32 %v4771_v57, %v4715_v35  ;;  %vm4401_vm4 = vcmp.ge.s32.totalorder %v10869_v34, %v9050_v39  ;;  %vm4466_vm3 = vcmp.lt.s32.totalorder %v10869_v34, %v9052_v61  ;;  %vm4529_vm1 = vmand %vm4400_vm9, %vm4465_vm11  ;;  %v10891_v57 = vld [vmem:[#allocation105_spill] sm:$0xff] }
 0x546   : > { %v4717_v24 = vsel %vm4525_vm6, %v10868_v17, -inf  ;;  %v4776_v63 = vmax.f32 %v4772_v29, %v4716_v1  ;;  %v10871_v40 = vmax.f32 %v10870_v4, 0.0  ;;  %vm4402_vm7 = vcmp.ge.s32.totalorder %v10872_v9, %v9050_v39  ;;  %vm4530_vm8 = vmand %vm4401_vm4, %vm4466_vm3  ;;  %v10894_v29 = vld [vmem:[#allocation104_spill] sm:$0xff]  ;;  %v10899_v35 = vld [vmem:[#allocation9_spill] sm:$0xff] }
 0x547   : > { %v4777_v49 = vmax.f32 %v4773_v0, %v4717_v24  ;;  %vm4467_vm13 = vcmp.lt.s32.totalorder %v10872_v9, %v9052_v61  ;;  %v10874_v41 = vmax.f32 %v10873_v45, 0.0  ;;  %vm4403_vm12 = vcmp.ge.s32.totalorder %v10875_v6, %v9050_v39  ;;  %v10897_v0 = vld [vmem:[#allocation107_spill] sm:$0xff]  ;;  %v10902_v1 = vld [vmem:[#allocation10_spill] sm:$0xff] }
 0x548   : > { %v4718_v42 = vsel %vm4526_vm2, %v10871_v40, -inf  ;;  %vm4468_vm5 = vcmp.lt.s32.totalorder %v10875_v6, %v9052_v61  ;;  %v10877_v59 = vmax.f32 %v10876_v20, 0.0  ;;  %vm4404_vm0 = vcmp.ge.s32.totalorder %v10878_v52, %v9050_v39  ;;  %vm4531_vm11 = vmand %vm4402_vm7, %vm4467_vm13  ;;  %v10905_v24 = vld [vmem:[#allocation86_spill] sm:$0xff]  ;;  %v10912_v6 = vld [vmem:[#allocation113_spill] sm:$0xff] }
 0x549   : > { %v4719_v50 = vsel %vm4527_vm10, %v10874_v41, -inf  ;;  %v4778_v38 = vmax.f32 %v4774_v27, %v4718_v42  ;;  %vm4469_vm14 = vcmp.lt.s32.totalorder %v10878_v52, %v9052_v61  ;;  %v10880_v15 = vmax.f32 %v10879_v53, 0.0  ;;  %vm4532_vm3 = vmand %vm4403_vm12, %vm4468_vm5  ;;  %v10900_v27 = vld [vmem:[#allocation106_spill] sm:$0xff]  ;;  %v10908_v42 = vld [vmem:[#allocation111_spill] sm:$0xff] }
 0x54a   : > { %v4720_v58 = vsel %vm4528_vm15, %v10877_v59, -inf  ;;  %v4779_v56 = vmax.f32 %v4775_v11, %v4719_v50  ;;  %vm4405_vm6 = vcmp.ge.s32.totalorder %v10881_v8, %v9050_v39  ;;  %vm4470_vm9 = vcmp.lt.s32.totalorder %v10881_v8, %v9052_v61  ;;  %vm4533_vm13 = vmand %vm4404_vm0, %vm4469_vm14  ;;  %v10903_v11 = vld [vmem:[#allocation109_spill] sm:$0xff]  ;;  %v10910_v41 = vld [vmem:[#allocation110_spill] sm:$0xff] }
 0x54b   : > { %v4721_v13 = vsel %vm4529_vm1, %v10880_v15, -inf  ;;  %v4780_v51 = vmax.f32 %v4776_v63, %v4720_v58  ;;  %v10883_v18 = vmax.f32 %v10882_v37, 0.0  ;;  %vm4406_vm2 = vcmp.ge.s32.totalorder %v10884_v12, %v9050_v39  ;;  %vm4534_vm5 = vmand %vm4405_vm6, %vm4470_vm9  ;;  %v10906_v63 = vld [vmem:[#allocation108_spill] sm:$0xff] }
 0x54c   : > { %v4781_v32 = vmax.f32 %v4777_v49, %v4721_v13  ;;  %vm4471_vm4 = vcmp.lt.s32.totalorder %v10884_v12, %v9052_v61  ;;  %v10886_v33 = vmax.f32 %v10885_v14, 0.0  ;;  %vm4407_vm10 = vcmp.ge.s32.totalorder %v10887_v26, %v9050_v39  ;;  %v4804_v14 = vld [vmem:[#allocation2 + $0x1] sm:$0x1] }
 0x54d   : > { %v4722_v21 = vsel %vm4530_vm8, %v10883_v18, -inf  ;;  %vm4472_vm7 = vcmp.lt.s32.totalorder %v10887_v26, %v9052_v61  ;;  %v10889_v46 = vmax.f32 %v10888_v28, 0.0  ;;  %vm4408_vm15 = vcmp.ge.s32.totalorder %v10890_v3, %v9050_v39  ;;  %vm4535_vm14 = vmand %vm4406_vm2, %vm4471_vm4 }
 0x54e   : > { %v4723_v2 = vsel %vm4531_vm11, %v10886_v33, -inf  ;;  %v4782_v36 = vmax.f32 %v4778_v38, %v4722_v21  ;;  %vm4473_vm12 = vcmp.lt.s32.totalorder %v10890_v3, %v9052_v61  ;;  %v10892_v25 = vmax.f32 %v10891_v57, 0.0  ;;  %vm4536_vm9 = vmand %vm4407_vm10, %vm4472_vm7 }
 0x54f   : > { %v4724_v54 = vsel %vm4532_vm3, %v10889_v46, -inf  ;;  %v4783_v22 = vmax.f32 %v4779_v56, %v4723_v2  ;;  %vm4409_vm1 = vcmp.ge.s32.totalorder %v10893_v55, %v9050_v39  ;;  %vm4474_vm0 = vcmp.lt.s32.totalorder %v10893_v55, %v9052_v61  ;;  %vm4537_vm4 = vmand %vm4408_vm15, %vm4473_vm12  ;;  %v10914_v56 = vld [vmem:[#allocation112_spill] sm:$0xff] }
 0x550   : > { %v4725_v60 = vsel %vm4533_vm13, %v10892_v25, -inf  ;;  %v4784_v5 = vmax.f32 %v4780_v51, %v4724_v54  ;;  %v10895_v10 = vmax.f32 %v10894_v29, 0.0  ;;  %vm4410_vm8 = vcmp.ge.s32.totalorder %v10896_v31, %v9050_v39  ;;  %vm4538_vm7 = vmand %vm4409_vm1, %vm4474_vm0 }
 0x551   : > { %v4785_v19 = vmax.f32 %v4781_v32, %v4725_v60  ;;  %vm4475_vm6 = vcmp.lt.s32.totalorder %v10896_v31, %v9052_v61  ;;  %v10898_v44 = vmax.f32 %v10897_v0, 0.0  ;;  %vm4411_vm11 = vcmp.ge.s32.totalorder %v10899_v35, %v9050_v39 }
 0x552   : > { %v4726_v30 = vsel %vm4534_vm5, %v10895_v10, -inf  ;;  %vm4476_vm2 = vcmp.lt.s32.totalorder %v10899_v35, %v9052_v61  ;;  %v10901_v7 = vmax.f32 %v10900_v27, 0.0  ;;  %vm4412_vm3 = vcmp.ge.s32.totalorder %v10902_v1, %v9050_v39  ;;  %vm4539_vm12 = vmand %vm4410_vm8, %vm4475_vm6 }
 0x553   : > { %v4727_v48 = vsel %vm4535_vm14, %v10898_v44, -inf  ;;  %v4786_v43 = vmax.f32 %v4782_v36, %v4726_v30  ;;  %vm4477_vm10 = vcmp.lt.s32.totalorder %v10902_v1, %v9052_v61  ;;  %v10904_v23 = vmax.f32 %v10903_v11, 0.0  ;;  %vm4540_vm5 = vmand %vm4411_vm11, %vm4476_vm2 }
 0x554   : > { %v4728_v16 = vsel %vm4536_vm9, %v10901_v7, -inf  ;;  %v4787_v62 = vmax.f32 %v4783_v22, %v4727_v48  ;;  %vm4413_vm13 = vcmp.ge.s32.totalorder %v10905_v24, %v9050_v39  ;;  %vm4478_vm15 = vcmp.lt.s32.totalorder %v10905_v24, %v9052_v61  ;;  %vm4541_vm1 = vmand %vm4412_vm3, %vm4477_vm10 }
 0x555   : > { %v4729_v47 = vsel %vm4537_vm4, %v10904_v23, -inf  ;;  %v4788_v17 = vmax.f32 %v4784_v5, %v4728_v16  ;;  %v10907_v34 = vmax.f32 %v10906_v63, 0.0  ;;  %v10909_v49 = vmax.f32 %v10908_v42, 0.0  ;;  %vm4542_vm0 = vmand %vm4413_vm13, %vm4478_vm15 }
 0x556   : > { %v4789_v40 = vmax.f32 %v4785_v19, %v4729_v47  ;;  %v10911_v50 = vmax.f32 %v10910_v41, 0.0  ;;  %v10913_v20 = vmax.f32 %v10912_v6, 0.0  ;;  %v10915_v52 = vmax.f32 %v10914_v56, 0.0 }
 0x557   : > { %v4730_v4 = vsel %vm4538_vm7, %v10907_v34, -inf  ;;  %v4731_v9 = vsel %vm4539_vm12, %v10909_v49, -inf }
 0x558   : > { %v4790_v45 = vmax.f32 %v4786_v43, %v4730_v4  ;;  %v4732_v61 = vsel %vm4540_vm5, %v10911_v50, -inf  ;;  %v4791_v38 = vmax.f32 %v4787_v62, %v4731_v9  ;;  %v4733_v59 = vsel %vm4541_vm1, %v10913_v20, -inf }
 0x559   : > { %v4792_v58 = vmax.f32 %v4788_v17, %v4732_v61  ;;  %v4734_v53 = vsel %vm4542_vm0, %v10915_v52, -inf  ;;  %v4793_v15 = vmax.f32 %v4789_v40, %v4733_v59 }
 0x55a   : > { %v4794_v39 = vmax.f32 %v4790_v45, %v4734_v53 }
 0x55b   : > { %v4795_v13 = vmax.f32 %v4791_v38, %v4792_v58 }
 0x55c   : > { %v4796_v51 = vmax.f32 %v4793_v15, %v4794_v39 }
 0x55e   : > { %v4797_v8 = vmax.f32 %v4795_v13, %v4796_v51 }
 0x560   : > { %v4798_v37 = vrot.slane %v4797_v8, 4 }
 0x562   : > { %v4799_v18 = vmax.f32 %v4797_v8, %v4798_v37 }
 0x564   : > { %v4800_v21 = vrot.slane %v4799_v18, 2 }
 0x566   : > { %v4801_v32 = vmax.f32 %v4799_v18, %v4800_v21 }
 0x568   : > { %v4802_v12 = vrot.slane %v4801_v32, 1 }
 0x56a   : > { %v4803_v33 = vmax.f32 %v4801_v32, %v4802_v12 }
 0x56c   : > { %v4805_v2 = vmax.f32 %v4804_v14, %v4803_v33 }
 0x56e   : > { %4806 = vst [vmem:[#allocation2 + $0x1] sm:$0x1] %v4805_v2 }
 0x56f PF: > { %s5117_s16 = sshll.u32 %s5910_s20, 5  ;;  %s4826_s15 = sshll.u32 %s391_s1, 4  ;;  %s4827_s15 = int_to_ptr.vmem [resolvable:$true] %s4826_s15 }
 0x570   : > { %s9921_s12 = scalar_lea.hbm %s9976_s10, %s5117_s16  ;;  %s10916_s26 = sand.u32 1, %s5902_s19  }
 0x571   : > { %s4813_s13 = scalar_lea.sflag [#allocation6], %s10916_s26  ;;  %s5838_s17 = scalar_lea.vmem %s4827_s15, 32 }
 0x572   : > { %p5839_p11 = scmp.ne.s32.totalorder %s4827_s15, %s5838_s17  ;;  %s5925_s24 = smov [#allocation5]  }
 0x573   : > { %s5842_s28 = sshll.u32 %s5925_s24, 4  ;;  %s5843_s28 = int_to_ptr.vmem [resolvable:$false] %s5842_s28 }
 0x574   : > { %p5840_p12 = pnand %p5839_p11, %p6024_p9  ;;  %s5844_s20 = scalar_lea.vmem %s5843_s28, 64 }
 0x575   : > { %v4810_v36 = vld [vmem:[#allocation2] sm:$0x3]  ;;  %p5845_p1 = scmp.lt.s32.totalorder %s4827_s15, %s5843_s28  ;;  %p5846_p2 = scmp.lt.s32.totalorder %s5844_s20, %s5838_s17 }
 0x576   : > { %4811 = vst [vmem:[%s391_s1] sm:$0x3] %v4810_v36  ;;  %p5841_p0 = pneg %p5840_p12 }
 0x577   : > { %p5847_p3 = por %p5846_p2, %p5845_p1 }
 0x579   : > { %p5848_p4 = pnand %p5847_p3, %p5841_p0 }
 0x57b   : > { %5851 = shalt.err (!%p5848_p4)
}
 0x57c   : > { %s5852_s14 = scalar_lea.hbm %s9921_s12, 32  ;;  %s5856_s23 = scalar_lea.hbm %s9976_s10, 64 }
 0x57d   : > { %p5853_p5 = scmp.ne.s32.totalorder %s9921_s12, %s5852_s14  ;;  %p5857_p8 = scmp.lt.u32.totalorder %s9921_s12, %s9976_s10 }
 0x57e   : > { %p5858_p10 = scmp.lt.u32.totalorder %s5856_s23, %s5852_s14  ;;  %p5860_p12 = scmp.lt.u32.totalorder %s5852_s14, %s9921_s12 }
 0x57f   : > { %p5854_p6 = pnand %p5853_p5, %p6024_p9 }
 0x580   : > { %p5859_p11 = por %p5858_p10, %p5857_p8 }
 0x581   : > { %p5855_p7 = pneg %p5854_p6 }
 0x582   : > { %p5861_p0 = por %p5860_p12, %p5859_p11 }
 0x584   : > { %p5862_p1 = pnand %p5861_p0, %p5855_p7 }
 0x586   : > { %5865 = shalt.err (!%p5862_p1)
}
 0x587   : > { %5665 = dma.vmem_to_hbm [thread:$0]  (%p6024_p9), %s4827_s15, 32, %s9921_s12, %s4813_s13  }
 0x588 PF: > { %p5671_p2 = scmp.ge.s32.totalorder %s5918_s22, 2  ;;  %s4838_s17 = sand.u32 1, %s5898_s18  }
 0x589   : > { %s4839_s24 = scalar_lea.sflag [#allocation6], %s4838_s17 }
 0x58a   : > { %p5668_p3 = pnand %p5671_p2, %p6031_p13 }
 0x58c   : > { %5893 = dma.done.wait (!%p5668_p3), %s4839_s24, 32  }
 0x58d   : > { %5895 = vsyncadd (!%p5668_p3), %s4839_s24, 4294967264  ;;  %s29_s22 = sadd.s32 1, %s5918_s22   ;;  %s10917_s18 = smov %s5902_s19 }
 0x58e   : > { %p26_p4 = scmp.ge.s32.totalorder %s29_s22, 4   ;;  %s10918_s19 = smov %s5906_s0 }
 0x58f   : > { %s10919_s0 = smov %s6037_s30  ;;  %s10920_s20 = smov %s5914_s21 }
 0x590   : > { %s10921_s21 = smov %s10923_s25  ;;  %28 = sbr.rel (!%p26_p4) target bundleno = 19 (0x13), region = 110 }
 0x597   :  { %4844 = vsyncpa [#allocation6], 1 }
 0x598   :  { %4846 = vsyncpa [#allocation6 + $0x1], 1 }

</bundles_post_ra>
